<compile_context>
chip_gen: v7x
topology: tpu7x:2x2x1
jax: 0.10.0
libtpu: 0.0.40
codegen_flags: <defaults>
</compile_context>

<pallas_src>
import functools

import jax
import jax.numpy as jnp
from jax.experimental import pallas as pl
from jax.experimental.pallas import tpu as pltpu

LANE = 128          # lane width (last-dim alignment for the padded output)
SUBLANE = 16        # bf16 sublane packing; batch tiles kept multiples of this
MAX_TILE_B = 2048   # batch rows per grid step (cap)
_HIDDEN = (512, 1024, 256, 128)


def _round_up(n, m):
    return ((n + m - 1) // m) * m


def _choose_tile_b(batch):
    """Balanced batch tiles: minimal tail padding; >=2 grid steps when B > SUBLANE
    so both v7x TensorCores get work (one extra ~1.8 MiB weight DMA, negligible)."""
    n_tiles = -(-batch // MAX_TILE_B)
    if batch > SUBLANE:
        n_tiles = max(n_tiles, 2)
    return _round_up(-(-batch // n_tiles), SUBLANE)


def _mlp_kernel(x_ref,
                w1_ref, b1_ref,
                w2_ref, b2_ref,
                w3_ref, b3_ref,
                w4_ref, b4_ref,
                wo_ref, bo_ref,
                out_ref):
    """relu(relu(relu(relu(x@W1+b1)@W2+b2)@W3+b3)@W4+b4)@Wo+bo for one batch tile.

    x arrives f32 and is cast to bf16 in-kernel; all matmuls run bf16 on the MXU
    with f32 accumulation; bias add + ReLU stay in f32 (v5e-friendly).
    """
    h = x_ref[...].astype(jnp.bfloat16)            # (TILE_B, dim_in) bf16

    a = jnp.dot(h, w1_ref[...], preferred_element_type=jnp.float32) + b1_ref[...]
    h = jnp.maximum(a, 0.0).astype(jnp.bfloat16)

    a = jnp.dot(h, w2_ref[...], preferred_element_type=jnp.float32) + b2_ref[...]
    h = jnp.maximum(a, 0.0).astype(jnp.bfloat16)

    a = jnp.dot(h, w3_ref[...], preferred_element_type=jnp.float32) + b3_ref[...]
    h = jnp.maximum(a, 0.0).astype(jnp.bfloat16)

    a = jnp.dot(h, w4_ref[...], preferred_element_type=jnp.float32) + b4_ref[...]
    h = jnp.maximum(a, 0.0).astype(jnp.bfloat16)

    out = jnp.dot(h, wo_ref[...], preferred_element_type=jnp.float32) + bo_ref[...]
    out_ref[...] = out.astype(out_ref.dtype)


@functools.partial(jax.jit, static_argnames=("single_buffer_weights",))
def nn_forward(x, params, single_buffer_weights=True):
    """Fused MLP forward.

    x: (B, dim_input) float32
    params: dict w1,b1,...,wo,bo; weights (in, out), biases (1, out), float32.
    Returns (B, dim_output) float32.
    """
    x = x.astype(jnp.float32)
    B, dim_in = x.shape
    dim_out = params["wo"].shape[1]
    dout_pad = _round_up(dim_out, LANE)

    tile_b = _choose_tile_b(B)
    b_pad = _round_up(B, tile_b)
    grid = (b_pad // tile_b,)

    # Pad only the batch (sublane) axis; feature axis stays at dim_in — a block of
    # (tile_b, dim_in) is legal because dim_in equals the full array dim, and it
    # avoids a 4x-wider padded/pre-cast copy of x in HBM.
    xp = jnp.pad(x, ((0, b_pad - B), (0, 0)))

    # Weights -> bf16 for the MXU. Only the last layer's output columns are
    # zero-padded (mathematical no-op) so the output store is lane-dense (128).
    w1 = params["w1"].astype(jnp.bfloat16)
    w2 = params["w2"].astype(jnp.bfloat16)
    w3 = params["w3"].astype(jnp.bfloat16)
    w4 = params["w4"].astype(jnp.bfloat16)
    wo = jnp.pad(params["wo"], ((0, 0), (0, dout_pad - dim_out))).astype(jnp.bfloat16)

    b1 = params["b1"].astype(jnp.float32)
    b2 = params["b2"].astype(jnp.float32)
    b3 = params["b3"].astype(jnp.float32)
    b4 = params["b4"].astype(jnp.float32)
    bo = jnp.pad(params["bo"], ((0, 0), (0, dout_pad - dim_out))).astype(jnp.float32)

    def act_spec(cols):
        # batch-tiled activation: new tile each grid step
        return pl.BlockSpec((tile_b, cols), lambda i: (i, 0))

    def resident_spec(shape):
        # weights / biases: same block every step -> DMA'd once, stay in VMEM.
        if single_buffer_weights:
            return pl.BlockSpec(shape, lambda i: (0, 0), pipeline_mode=pl.Buffered(1))
        return pl.BlockSpec(shape, lambda i: (0, 0))

    flat = (xp, w1, b1, w2, b2, w3, b3, w4, b4, wo, bo)
    in_specs = [act_spec(dim_in)] + [resident_spec(a.shape) for a in flat[1:]]

    # Advisory cost estimate for XLA's scheduler.
    layer_dims = (dim_in,) + _HIDDEN + (dout_pad,)
    mm_sizes = [layer_dims[i] * layer_dims[i + 1] for i in range(5)]
    flops = 2 * b_pad * sum(mm_sizes)
    bytes_accessed = (b_pad * dim_in * 4            # x (f32)
                      + 2 * sum(mm_sizes)           # bf16 weights
                      + 4 * sum(layer_dims[1:])     # f32 biases
                      + b_pad * dout_pad * 4)       # f32 output
    cost = pl.CostEstimate(flops=flops, transcendentals=0,
                           bytes_accessed=bytes_accessed)

    out = pl.pallas_call(
        _mlp_kernel,
        grid=grid,
        out_shape=jax.ShapeDtypeStruct((b_pad, dout_pad), jnp.float32),
        in_specs=in_specs,
        out_specs=act_spec(dout_pad),
        compiler_params=pltpu.CompilerParams(
            dimension_semantics=("parallel",),   # megacore sharding of batch tiles
            vmem_limit_bytes=32 << 20,           # footprint ~20 MiB at tile_b=2048
        ),
        cost_estimate=cost,
    )(*flat)

    return out[:B, :dim_out]


def init_params(key, dim_input, dim_output):
    """Deterministic parameter init matching the layer shapes of the PyTorch NN."""
    dims = [dim_input, 512, 1024, 256, 128, dim_output]
    names = ["1", "2", "3", "4", "o"]
    params = {}
    keys = jax.random.split(key, len(names) * 2)
    for idx, name in enumerate(names):
        fan_in, fan_out = dims[idx], dims[idx + 1]
        bound = 1.0 / jnp.sqrt(fan_in)  # PyTorch Linear default init range
        w = jax.random.uniform(keys[2 * idx], (fan_in, fan_out),
                               minval=-bound, maxval=bound, dtype=jnp.float32)
        b = jax.random.uniform(keys[2 * idx + 1], (1, fan_out),
                               minval=-bound, maxval=bound, dtype=jnp.float32)
        params[f"w{name}"] = w
        params[f"b{name}"] = b
    return params


def reference_forward_f32(x, params):
    """Pure-JAX f32 reference of the PyTorch forward."""
    h = jax.nn.relu(x @ params["w1"] + params["b1"])
    h = jax.nn.relu(h @ params["w2"] + params["b2"])
    h = jax.nn.relu(h @ params["w3"] + params["b3"])
    h = jax.nn.relu(h @ params["w4"] + params["b4"])
    return h @ params["wo"] + params["bo"]


def reference_forward_bf16(x, params):
    """Mixed-precision reference matching the kernel's bf16-matmul / f32-accum."""
    def lin(h, w, b):
        return jnp.dot(h.astype(jnp.bfloat16), w.astype(jnp.bfloat16),
                       preferred_element_type=jnp.float32) + b
    h = jax.nn.relu(lin(x, params["w1"], params["b1"]))
    h = jax.nn.relu(lin(h, params["w2"], params["b2"]))
    h = jax.nn.relu(lin(h, params["w3"], params["b3"]))
    h = jax.nn.relu(lin(h, params["w4"], params["b4"]))
    return lin(h, params["wo"], params["bo"])


if __name__ == "__main__":
    key = jax.random.PRNGKey(0)
    k_param, k_x = jax.random.split(key)

    dim_input, dim_output = 32, 8
    params = init_params(k_param, dim_input, dim_output)

    use_single_buffer = True
    # batch=8  -> grid=(1,); batch=24 -> balanced 2-step grid (tail-padding path).
    for batch in (8, 24):
        x = jax.random.normal(k_x, (batch, dim_input), dtype=jnp.float32)
        try:
            out = jax.block_until_ready(
                nn_forward(x, params, single_buffer_weights=use_single_buffer))
        except Exception:
            # TODO(synk): pl.Buffered(1) single-buffering of resident weights not
            # supported on this jax/libtpu; fall back to default double-buffering.
            use_single_buffer = False
            out = jax.block_until_ready(
                nn_forward(x, params, single_buffer_weights=False))

        assert out.shape == (batch, dim_output)
        ref_bf16 = reference_forward_bf16(x, params)
        ref_f32 = reference_forward_f32(x, params)
        assert jnp.allclose(out, ref_bf16, atol=2e-2, rtol=2e-2), "mismatch vs bf16 reference"
        assert jnp.allclose(out, ref_f32, atol=1e-1, rtol=1e-1), "mismatch vs f32 reference"

    print("KERNEL_OK")
</pallas_src>

<mosaic_0001>
module attributes {stable_mosaic.version = 11 : i64} {
  func.func @_mlp_kernel(%arg0: i32, %arg1: memref<16x32xf32, #tpu.memory_space<vmem>>, %arg2: memref<32x512xbf16, #tpu.memory_space<vmem>>, %arg3: memref<1x512xf32, #tpu.memory_space<vmem>>, %arg4: memref<512x1024xbf16, #tpu.memory_space<vmem>>, %arg5: memref<1x1024xf32, #tpu.memory_space<vmem>>, %arg6: memref<1024x256xbf16, #tpu.memory_space<vmem>>, %arg7: memref<1x256xf32, #tpu.memory_space<vmem>>, %arg8: memref<256x128xbf16, #tpu.memory_space<vmem>>, %arg9: memref<1x128xf32, #tpu.memory_space<vmem>>, %arg10: memref<128x128xbf16, #tpu.memory_space<vmem>>, %arg11: memref<1x128xf32, #tpu.memory_space<vmem>>, %arg12: memref<16x128xf32, #tpu.memory_space<vmem>>) attributes {dimension_semantics = [#tpu.dimension_semantics<parallel>], iteration_bounds = array<i64: 1>, scalar_prefetch = 0 : i64, scratch_operands = 0 : i64, tpu.core_type = #tpu.core_type<tc>, window_params = [{transform_indices = @transform_0, window_bounds = array<i64: 16, 32>}, {pipeline_mode = #tpu.pipeline_mode<synchronous>, transform_indices = @transform_1, window_bounds = array<i64: 32, 512>}, {pipeline_mode = #tpu.pipeline_mode<synchronous>, transform_indices = @transform_2, window_bounds = array<i64: 1, 512>}, {pipeline_mode = #tpu.pipeline_mode<synchronous>, transform_indices = @transform_3, window_bounds = array<i64: 512, 1024>}, {pipeline_mode = #tpu.pipeline_mode<synchronous>, transform_indices = @transform_4, window_bounds = array<i64: 1, 1024>}, {pipeline_mode = #tpu.pipeline_mode<synchronous>, transform_indices = @transform_5, window_bounds = array<i64: 1024, 256>}, {pipeline_mode = #tpu.pipeline_mode<synchronous>, transform_indices = @transform_6, window_bounds = array<i64: 1, 256>}, {pipeline_mode = #tpu.pipeline_mode<synchronous>, transform_indices = @transform_7, window_bounds = array<i64: 256, 128>}, {pipeline_mode = #tpu.pipeline_mode<synchronous>, transform_indices = @transform_8, window_bounds = array<i64: 1, 128>}, {pipeline_mode = #tpu.pipeline_mode<synchronous>, transform_indices = @transform_9, window_bounds = array<i64: 128, 128>}, {pipeline_mode = #tpu.pipeline_mode<synchronous>, transform_indices = @transform_10, window_bounds = array<i64: 1, 128>}, {transform_indices = @transform_11, window_bounds = array<i64: 16, 128>}]} {
    %c0 = arith.constant 0 : index
    %c0_0 = arith.constant 0 : index
    %0 = vector.load %arg1[%c0, %c0_0] : memref<16x32xf32, #tpu.memory_space<vmem>>, vector<16x32xf32>
    %1 = arith.truncf %0 : vector<16x32xf32> to vector<16x32xbf16>
    %c0_1 = arith.constant 0 : index
    %c0_2 = arith.constant 0 : index
    %2 = vector.load %arg2[%c0_1, %c0_2] : memref<32x512xbf16, #tpu.memory_space<vmem>>, vector<32x512xbf16>
    %cst = arith.constant dense<0.000000e+00> : vector<16x512xf32>
    %3 = tpu.matmul %1, %2, %cst {dimension_numbers = #tpu.dot_dimension_numbers<[1], [0], [0], [1], [0, 0, 1, 1], [], []>} : vector<16x32xbf16>, vector<32x512xbf16>, vector<16x512xf32> -> vector<16x512xf32>
    %c0_3 = arith.constant 0 : index
    %c0_4 = arith.constant 0 : index
    %4 = vector.load %arg3[%c0_3, %c0_4] : memref<1x512xf32, #tpu.memory_space<vmem>>, vector<1x512xf32>
    %5 = vector.broadcast %4 : vector<1x512xf32> to vector<16x512xf32>
    %6 = arith.addf %3, %5 : vector<16x512xf32>
    %cst_5 = arith.constant 0.000000e+00 : f32
    %7 = vector.broadcast %cst_5 : f32 to vector<16x512xf32>
    %8 = arith.maximumf %6, %7 : vector<16x512xf32>
    %9 = arith.truncf %8 : vector<16x512xf32> to vector<16x512xbf16>
    %c0_6 = arith.constant 0 : index
    %c0_7 = arith.constant 0 : index
    %10 = vector.load %arg4[%c0_6, %c0_7] : memref<512x1024xbf16, #tpu.memory_space<vmem>>, vector<512x1024xbf16>
    %cst_8 = arith.constant dense<0.000000e+00> : vector<16x1024xf32>
    %11 = tpu.matmul %9, %10, %cst_8 {dimension_numbers = #tpu.dot_dimension_numbers<[1], [0], [0], [1], [0, 0, 1, 1], [], []>} : vector<16x512xbf16>, vector<512x1024xbf16>, vector<16x1024xf32> -> vector<16x1024xf32>
    %c0_9 = arith.constant 0 : index
    %c0_10 = arith.constant 0 : index
    %12 = vector.load %arg5[%c0_9, %c0_10] : memref<1x1024xf32, #tpu.memory_space<vmem>>, vector<1x1024xf32>
    %13 = vector.broadcast %12 : vector<1x1024xf32> to vector<16x1024xf32>
    %14 = arith.addf %11, %13 : vector<16x1024xf32>
    %cst_11 = arith.constant 0.000000e+00 : f32
    %15 = vector.broadcast %cst_11 : f32 to vector<16x1024xf32>
    %16 = arith.maximumf %14, %15 : vector<16x1024xf32>
    %17 = arith.truncf %16 : vector<16x1024xf32> to vector<16x1024xbf16>
    %c0_12 = arith.constant 0 : index
    %c0_13 = arith.constant 0 : index
    %18 = vector.load %arg6[%c0_12, %c0_13] : memref<1024x256xbf16, #tpu.memory_space<vmem>>, vector<1024x256xbf16>
    %cst_14 = arith.constant dense<0.000000e+00> : vector<16x256xf32>
    %19 = tpu.matmul %17, %18, %cst_14 {dimension_numbers = #tpu.dot_dimension_numbers<[1], [0], [0], [1], [0, 0, 1, 1], [], []>} : vector<16x1024xbf16>, vector<1024x256xbf16>, vector<16x256xf32> -> vector<16x256xf32>
    %c0_15 = arith.constant 0 : index
    %c0_16 = arith.constant 0 : index
    %20 = vector.load %arg7[%c0_15, %c0_16] : memref<1x256xf32, #tpu.memory_space<vmem>>, vector<1x256xf32>
    %21 = vector.broadcast %20 : vector<1x256xf32> to vector<16x256xf32>
    %22 = arith.addf %19, %21 : vector<16x256xf32>
    %cst_17 = arith.constant 0.000000e+00 : f32
    %23 = vector.broadcast %cst_17 : f32 to vector<16x256xf32>
    %24 = arith.maximumf %22, %23 : vector<16x256xf32>
    %25 = arith.truncf %24 : vector<16x256xf32> to vector<16x256xbf16>
    %c0_18 = arith.constant 0 : index
    %c0_19 = arith.constant 0 : index
    %26 = vector.load %arg8[%c0_18, %c0_19] : memref<256x128xbf16, #tpu.memory_space<vmem>>, vector<256x128xbf16>
    %cst_20 = arith.constant dense<0.000000e+00> : vector<16x128xf32>
    %27 = tpu.matmul %25, %26, %cst_20 {dimension_numbers = #tpu.dot_dimension_numbers<[1], [0], [0], [1], [0, 0, 1, 1], [], []>} : vector<16x256xbf16>, vector<256x128xbf16>, vector<16x128xf32> -> vector<16x128xf32>
    %c0_21 = arith.constant 0 : index
    %c0_22 = arith.constant 0 : index
    %28 = vector.load %arg9[%c0_21, %c0_22] : memref<1x128xf32, #tpu.memory_space<vmem>>, vector<1x128xf32>
    %29 = vector.broadcast %28 : vector<1x128xf32> to vector<16x128xf32>
    %30 = arith.addf %27, %29 : vector<16x128xf32>
    %cst_23 = arith.constant 0.000000e+00 : f32
    %31 = vector.broadcast %cst_23 : f32 to vector<16x128xf32>
    %32 = arith.maximumf %30, %31 : vector<16x128xf32>
    %33 = arith.truncf %32 : vector<16x128xf32> to vector<16x128xbf16>
    %c0_24 = arith.constant 0 : index
    %c0_25 = arith.constant 0 : index
    %34 = vector.load %arg10[%c0_24, %c0_25] : memref<128x128xbf16, #tpu.memory_space<vmem>>, vector<128x128xbf16>
    %cst_26 = arith.constant dense<0.000000e+00> : vector<16x128xf32>
    %35 = tpu.matmul %33, %34, %cst_26 {dimension_numbers = #tpu.dot_dimension_numbers<[1], [0], [0], [1], [0, 0, 1, 1], [], []>} : vector<16x128xbf16>, vector<128x128xbf16>, vector<16x128xf32> -> vector<16x128xf32>
    %c0_27 = arith.constant 0 : index
    %c0_28 = arith.constant 0 : index
    %36 = vector.load %arg11[%c0_27, %c0_28] : memref<1x128xf32, #tpu.memory_space<vmem>>, vector<1x128xf32>
    %37 = vector.broadcast %36 : vector<1x128xf32> to vector<16x128xf32>
    %38 = arith.addf %35, %37 : vector<16x128xf32>
    %c0_29 = arith.constant 0 : index
    %c0_30 = arith.constant 0 : index
    %39 = vector.load %arg12[%c0_29, %c0_30] : memref<16x128xf32, #tpu.memory_space<vmem>>, vector<16x128xf32>
    tpu.vector_store %arg12[%c0_29, %c0_30], %38 {strides = array<i32>} : memref<16x128xf32, #tpu.memory_space<vmem>>, vector<16x128xf32>,
    return
  }
  func.func @transform_0(%arg0: i32) -> (i32, i32) {
    %c0_i32 = arith.constant 0 : i32
    %c0_i32_0 = arith.constant 0 : i32
    return %arg0, %c0_i32 : i32, i32
  }
  func.func @transform_1(%arg0: i32) -> (i32, i32) {
    %c0_i32 = arith.constant 0 : i32
    %c0_i32_0 = arith.constant 0 : i32
    %c0_i32_1 = arith.constant 0 : i32
    return %c0_i32, %c0_i32_0 : i32, i32
  }
  func.func @transform_2(%arg0: i32) -> (i32, i32) {
    %c0_i32 = arith.constant 0 : i32
    %c0_i32_0 = arith.constant 0 : i32
    %c0_i32_1 = arith.constant 0 : i32
    return %c0_i32, %c0_i32_0 : i32, i32
  }
  func.func @transform_3(%arg0: i32) -> (i32, i32) {
    %c0_i32 = arith.constant 0 : i32
    %c0_i32_0 = arith.constant 0 : i32
    %c0_i32_1 = arith.constant 0 : i32
    return %c0_i32, %c0_i32_0 : i32, i32
  }
  func.func @transform_4(%arg0: i32) -> (i32, i32) {
    %c0_i32 = arith.constant 0 : i32
    %c0_i32_0 = arith.constant 0 : i32
    %c0_i32_1 = arith.constant 0 : i32
    return %c0_i32, %c0_i32_0 : i32, i32
  }
  func.func @transform_5(%arg0: i32) -> (i32, i32) {
    %c0_i32 = arith.constant 0 : i32
    %c0_i32_0 = arith.constant 0 : i32
    %c0_i32_1 = arith.constant 0 : i32
    return %c0_i32, %c0_i32_0 : i32, i32
  }
  func.func @transform_6(%arg0: i32) -> (i32, i32) {
    %c0_i32 = arith.constant 0 : i32
    %c0_i32_0 = arith.constant 0 : i32
    %c0_i32_1 = arith.constant 0 : i32
    return %c0_i32, %c0_i32_0 : i32, i32
  }
  func.func @transform_7(%arg0: i32) -> (i32, i32) {
    %c0_i32 = arith.constant 0 : i32
    %c0_i32_0 = arith.constant 0 : i32
    %c0_i32_1 = arith.constant 0 : i32
    return %c0_i32, %c0_i32_0 : i32, i32
  }
  func.func @transform_8(%arg0: i32) -> (i32, i32) {
    %c0_i32 = arith.constant 0 : i32
    %c0_i32_0 = arith.constant 0 : i32
    %c0_i32_1 = arith.constant 0 : i32
    return %c0_i32, %c0_i32_0 : i32, i32
  }
  func.func @transform_9(%arg0: i32) -> (i32, i32) {
    %c0_i32 = arith.constant 0 : i32
    %c0_i32_0 = arith.constant 0 : i32
    %c0_i32_1 = arith.constant 0 : i32
    return %c0_i32, %c0_i32_0 : i32, i32
  }
  func.func @transform_10(%arg0: i32) -> (i32, i32) {
    %c0_i32 = arith.constant 0 : i32
    %c0_i32_0 = arith.constant 0 : i32
    %c0_i32_1 = arith.constant 0 : i32
    return %c0_i32, %c0_i32_0 : i32, i32
  }
  func.func @transform_11(%arg0: i32) -> (i32, i32) {
    %c0_i32 = arith.constant 0 : i32
    %c0_i32_0 = arith.constant 0 : i32
    return %arg0, %c0_i32 : i32, i32
  }
}

module attributes {stable_mosaic.version = 11 : i64} {
  func.func @_mlp_kernel(%arg0: i32, %arg1: memref<16x32xf32, #tpu.memory_space<vmem>>, %arg2: memref<32x512xbf16, #tpu.memory_space<vmem>>, %arg3: memref<1x512xf32, #tpu.memory_space<vmem>>, %arg4: memref<512x1024xbf16, #tpu.memory_space<vmem>>, %arg5: memref<1x1024xf32, #tpu.memory_space<vmem>>, %arg6: memref<1024x256xbf16, #tpu.memory_space<vmem>>, %arg7: memref<1x256xf32, #tpu.memory_space<vmem>>, %arg8: memref<256x128xbf16, #tpu.memory_space<vmem>>, %arg9: memref<1x128xf32, #tpu.memory_space<vmem>>, %arg10: memref<128x128xbf16, #tpu.memory_space<vmem>>, %arg11: memref<1x128xf32, #tpu.memory_space<vmem>>, %arg12: memref<16x128xf32, #tpu.memory_space<vmem>>) attributes {dimension_semantics = [#tpu.dimension_semantics<parallel>], iteration_bounds = array<i64: 1>, scalar_prefetch = 0 : i64, scratch_operands = 0 : i64, tpu.core_type = #tpu.core_type<tc>, window_params = [{transform_indices = @transform_0, window_bounds = array<i64: 16, 32>}, {pipeline_mode = #tpu.pipeline_mode<synchronous>, transform_indices = @transform_1, window_bounds = array<i64: 32, 512>}, {pipeline_mode = #tpu.pipeline_mode<synchronous>, transform_indices = @transform_2, window_bounds = array<i64: 1, 512>}, {pipeline_mode = #tpu.pipeline_mode<synchronous>, transform_indices = @transform_3, window_bounds = array<i64: 512, 1024>}, {pipeline_mode = #tpu.pipeline_mode<synchronous>, transform_indices = @transform_4, window_bounds = array<i64: 1, 1024>}, {pipeline_mode = #tpu.pipeline_mode<synchronous>, transform_indices = @transform_5, window_bounds = array<i64: 1024, 256>}, {pipeline_mode = #tpu.pipeline_mode<synchronous>, transform_indices = @transform_6, window_bounds = array<i64: 1, 256>}, {pipeline_mode = #tpu.pipeline_mode<synchronous>, transform_indices = @transform_7, window_bounds = array<i64: 256, 128>}, {pipeline_mode = #tpu.pipeline_mode<synchronous>, transform_indices = @transform_8, window_bounds = array<i64: 1, 128>}, {pipeline_mode = #tpu.pipeline_mode<synchronous>, transform_indices = @transform_9, window_bounds = array<i64: 128, 128>}, {pipeline_mode = #tpu.pipeline_mode<synchronous>, transform_indices = @transform_10, window_bounds = array<i64: 1, 128>}, {transform_indices = @transform_11, window_bounds = array<i64: 16, 128>}]} {
    %c0 = arith.constant 0 : index
    %c0_0 = arith.constant 0 : index
    %0 = vector.load %arg1[%c0, %c0_0] : memref<16x32xf32, #tpu.memory_space<vmem>>, vector<16x32xf32>
    %1 = arith.truncf %0 : vector<16x32xf32> to vector<16x32xbf16>
    %c0_1 = arith.constant 0 : index
    %c0_2 = arith.constant 0 : index
    %2 = vector.load %arg2[%c0_1, %c0_2] : memref<32x512xbf16, #tpu.memory_space<vmem>>, vector<32x512xbf16>
    %cst = arith.constant dense<0.000000e+00> : vector<16x512xf32>
    %3 = tpu.matmul %1, %2, %cst {dimension_numbers = #tpu.dot_dimension_numbers<[1], [0], [0], [1], [0, 0, 1, 1], [], []>} : vector<16x32xbf16>, vector<32x512xbf16>, vector<16x512xf32> -> vector<16x512xf32>
    %c0_3 = arith.constant 0 : index
    %c0_4 = arith.constant 0 : index
    %4 = vector.load %arg3[%c0_3, %c0_4] : memref<1x512xf32, #tpu.memory_space<vmem>>, vector<1x512xf32>
    %5 = vector.broadcast %4 : vector<1x512xf32> to vector<16x512xf32>
    %6 = arith.addf %3, %5 : vector<16x512xf32>
    %cst_5 = arith.constant 0.000000e+00 : f32
    %7 = vector.broadcast %cst_5 : f32 to vector<16x512xf32>
    %8 = arith.maximumf %6, %7 : vector<16x512xf32>
    %9 = arith.truncf %8 : vector<16x512xf32> to vector<16x512xbf16>
    %c0_6 = arith.constant 0 : index
    %c0_7 = arith.constant 0 : index
    %10 = vector.load %arg4[%c0_6, %c0_7] : memref<512x1024xbf16, #tpu.memory_space<vmem>>, vector<512x1024xbf16>
    %cst_8 = arith.constant dense<0.000000e+00> : vector<16x1024xf32>
    %11 = tpu.matmul %9, %10, %cst_8 {dimension_numbers = #tpu.dot_dimension_numbers<[1], [0], [0], [1], [0, 0, 1, 1], [], []>} : vector<16x512xbf16>, vector<512x1024xbf16>, vector<16x1024xf32> -> vector<16x1024xf32>
    %c0_9 = arith.constant 0 : index
    %c0_10 = arith.constant 0 : index
    %12 = vector.load %arg5[%c0_9, %c0_10] : memref<1x1024xf32, #tpu.memory_space<vmem>>, vector<1x1024xf32>
    %13 = vector.broadcast %12 : vector<1x1024xf32> to vector<16x1024xf32>
    %14 = arith.addf %11, %13 : vector<16x1024xf32>
    %cst_11 = arith.constant 0.000000e+00 : f32
    %15 = vector.broadcast %cst_11 : f32 to vector<16x1024xf32>
    %16 = arith.maximumf %14, %15 : vector<16x1024xf32>
    %17 = arith.truncf %16 : vector<16x1024xf32> to vector<16x1024xbf16>
    %c0_12 = arith.constant 0 : index
    %c0_13 = arith.constant 0 : index
    %18 = vector.load %arg6[%c0_12, %c0_13] : memref<1024x256xbf16, #tpu.memory_space<vmem>>, vector<1024x256xbf16>
    %cst_14 = arith.constant dense<0.000000e+00> : vector<16x256xf32>
    %19 = tpu.matmul %17, %18, %cst_14 {dimension_numbers = #tpu.dot_dimension_numbers<[1], [0], [0], [1], [0, 0, 1, 1], [], []>} : vector<16x1024xbf16>, vector<1024x256xbf16>, vector<16x256xf32> -> vector<16x256xf32>
    %c0_15 = arith.constant 0 : index
    %c0_16 = arith.constant 0 : index
    %20 = vector.load %arg7[%c0_15, %c0_16] : memref<1x256xf32, #tpu.memory_space<vmem>>, vector<1x256xf32>
    %21 = vector.broadcast %20 : vector<1x256xf32> to vector<16x256xf32>
    %22 = arith.addf %19, %21 : vector<16x256xf32>
    %cst_17 = arith.constant 0.000000e+00 : f32
    %23 = vector.broadcast %cst_17 : f32 to vector<16x256xf32>
    %24 = arith.maximumf %22, %23 : vector<16x256xf32>
    %25 = arith.truncf %24 : vector<16x256xf32> to vector<16x256xbf16>
    %c0_18 = arith.constant 0 : index
    %c0_19 = arith.constant 0 : index
    %26 = vector.load %arg8[%c0_18, %c0_19] : memref<256x128xbf16, #tpu.memory_space<vmem>>, vector<256x128xbf16>
    %cst_20 = arith.constant dense<0.000000e+00> : vector<16x128xf32>
    %27 = tpu.matmul %25, %26, %cst_20 {dimension_numbers = #tpu.dot_dimension_numbers<[1], [0], [0], [1], [0, 0, 1, 1], [], []>} : vector<16x256xbf16>, vector<256x128xbf16>, vector<16x128xf32> -> vector<16x128xf32>
    %c0_21 = arith.constant 0 : index
    %c0_22 = arith.constant 0 : index
    %28 = vector.load %arg9[%c0_21, %c0_22] : memref<1x128xf32, #tpu.memory_space<vmem>>, vector<1x128xf32>
    %29 = vector.broadcast %28 : vector<1x128xf32> to vector<16x128xf32>
    %30 = arith.addf %27, %29 : vector<16x128xf32>
    %cst_23 = arith.constant 0.000000e+00 : f32
    %31 = vector.broadcast %cst_23 : f32 to vector<16x128xf32>
    %32 = arith.maximumf %30, %31 : vector<16x128xf32>
    %33 = arith.truncf %32 : vector<16x128xf32> to vector<16x128xbf16>
    %c0_24 = arith.constant 0 : index
    %c0_25 = arith.constant 0 : index
    %34 = vector.load %arg10[%c0_24, %c0_25] : memref<128x128xbf16, #tpu.memory_space<vmem>>, vector<128x128xbf16>
    %cst_26 = arith.constant dense<0.000000e+00> : vector<16x128xf32>
    %35 = tpu.matmul %33, %34, %cst_26 {dimension_numbers = #tpu.dot_dimension_numbers<[1], [0], [0], [1], [0, 0, 1, 1], [], []>} : vector<16x128xbf16>, vector<128x128xbf16>, vector<16x128xf32> -> vector<16x128xf32>
    %c0_27 = arith.constant 0 : index
    %c0_28 = arith.constant 0 : index
    %36 = vector.load %arg11[%c0_27, %c0_28] : memref<1x128xf32, #tpu.memory_space<vmem>>, vector<1x128xf32>
    %37 = vector.broadcast %36 : vector<1x128xf32> to vector<16x128xf32>
    %38 = arith.addf %35, %37 : vector<16x128xf32>
    %c0_29 = arith.constant 0 : index
    %c0_30 = arith.constant 0 : index
    %39 = vector.load %arg12[%c0_29, %c0_30] : memref<16x128xf32, #tpu.memory_space<vmem>>, vector<16x128xf32>
    tpu.vector_store %arg12[%c0_29, %c0_30], %38 {strides = array<i32>} : memref<16x128xf32, #tpu.memory_space<vmem>>, vector<16x128xf32>,
    return
  }
  func.func @transform_0(%arg0: i32) -> (i32, i32) {
    %c0_i32 = arith.constant 0 : i32
    %c0_i32_0 = arith.constant 0 : i32
    return %arg0, %c0_i32 : i32, i32
  }
  func.func @transform_1(%arg0: i32) -> (i32, i32) {
    %c0_i32 = arith.constant 0 : i32
    %c0_i32_0 = arith.constant 0 : i32
    %c0_i32_1 = arith.constant 0 : i32
    return %c0_i32, %c0_i32_0 : i32, i32
  }
  func.func @transform_2(%arg0: i32) -> (i32, i32) {
    %c0_i32 = arith.constant 0 : i32
    %c0_i32_0 = arith.constant 0 : i32
    %c0_i32_1 = arith.constant 0 : i32
    return %c0_i32, %c0_i32_0 : i32, i32
  }
  func.func @transform_3(%arg0: i32) -> (i32, i32) {
    %c0_i32 = arith.constant 0 : i32
    %c0_i32_0 = arith.constant 0 : i32
    %c0_i32_1 = arith.constant 0 : i32
    return %c0_i32, %c0_i32_0 : i32, i32
  }
  func.func @transform_4(%arg0: i32) -> (i32, i32) {
    %c0_i32 = arith.constant 0 : i32
    %c0_i32_0 = arith.constant 0 : i32
    %c0_i32_1 = arith.constant 0 : i32
    return %c0_i32, %c0_i32_0 : i32, i32
  }
  func.func @transform_5(%arg0: i32) -> (i32, i32) {
    %c0_i32 = arith.constant 0 : i32
    %c0_i32_0 = arith.constant 0 : i32
    %c0_i32_1 = arith.constant 0 : i32
    return %c0_i32, %c0_i32_0 : i32, i32
  }
  func.func @transform_6(%arg0: i32) -> (i32, i32) {
    %c0_i32 = arith.constant 0 : i32
    %c0_i32_0 = arith.constant 0 : i32
    %c0_i32_1 = arith.constant 0 : i32
    return %c0_i32, %c0_i32_0 : i32, i32
  }
  func.func @transform_7(%arg0: i32) -> (i32, i32) {
    %c0_i32 = arith.constant 0 : i32
    %c0_i32_0 = arith.constant 0 : i32
    %c0_i32_1 = arith.constant 0 : i32
    return %c0_i32, %c0_i32_0 : i32, i32
  }
  func.func @transform_8(%arg0: i32) -> (i32, i32) {
    %c0_i32 = arith.constant 0 : i32
    %c0_i32_0 = arith.constant 0 : i32
    %c0_i32_1 = arith.constant 0 : i32
    return %c0_i32, %c0_i32_0 : i32, i32
  }
  func.func @transform_9(%arg0: i32) -> (i32, i32) {
    %c0_i32 = arith.constant 0 : i32
    %c0_i32_0 = arith.constant 0 : i32
    %c0_i32_1 = arith.constant 0 : i32
    return %c0_i32, %c0_i32_0 : i32, i32
  }
  func.func @transform_10(%arg0: i32) -> (i32, i32) {
    %c0_i32 = arith.constant 0 : i32
    %c0_i32_0 = arith.constant 0 : i32
    %c0_i32_1 = arith.constant 0 : i32
    return %c0_i32, %c0_i32_0 : i32, i32
  }
  func.func @transform_11(%arg0: i32) -> (i32, i32) {
    %c0_i32 = arith.constant 0 : i32
    %c0_i32_0 = arith.constant 0 : i32
    return %arg0, %c0_i32 : i32, i32
  }
}

</mosaic_0001>

<bundles_post_ra>
// kernel: nn_forward.1
= control target key start
LH: loop header
LB: loop body
LE: loop exit
PB: predicated region body
PF: predicated region fallthrough
CT: control target
= control target key end

     0   :  { %v4165_v1 = vmov 0   ;;  %vm112_vm0 = vcmask 261120   ;;  %vm4167_vm1 = vmmov 0   ;;  %s5585_s1 = inlined_call_operand.vmem [shape: bf16[32,512], index: 1, kind: input, shape index: {}]   ;;  %s5586_s0 = inlined_call_operand.vmem [shape: f32[16,32], index: 0, kind: input, shape index: {}]   ;;  %s5587_s3 = inlined_call_operand.vmem [shape: bf16[512,1024], index: 3, kind: input, shape index: {}]   ;;  %s5588_s2 = inlined_call_operand.vmem [shape: f32[1,512], index: 2, kind: input, shape index: {}]   ;;  %s5589_s5 = inlined_call_operand.vmem [shape: bf16[1024,256], index: 5, kind: input, shape index: {}]   ;;  %s5590_s4 = inlined_call_operand.vmem [shape: f32[1,1024], index: 4, kind: input, shape index: {}]   ;;  %s5591_s7 = inlined_call_operand.vmem [shape: bf16[256,128], index: 7, kind: input, shape index: {}]   ;;  %s5592_s9 = inlined_call_operand.vmem [shape: bf16[128,128], index: 9, kind: input, shape index: {}]   ;;  %s5593_s6 = inlined_call_operand.vmem [shape: f32[1,256], index: 6, kind: input, shape index: {}]   ;;  %s5594_s8 = inlined_call_operand.vmem [shape: f32[1,128], index: 8, kind: input, shape index: {}]   ;;  %s5595_s10 = inlined_call_operand.vmem [shape: f32[1,128], index: 10, kind: input, shape index: {}]   ;;  %s5596_s11 = inlined_call_operand.vmem [shape: f32[16,128], index: 11, kind: output, shape index: {}]  }
   0x1   :  { %v3937_v0 = vld [vmem:[%s5585_s1 + $0x4] ss:$16 sps:$4 sm:$0xff]   ;;  %148 = vmatprep.mubr.bf16.mxu1 %v4165_v1  ;;  %v3939_v2 = vld [vmem:[%s5585_s1] ss:$16 sps:$4 sm:$0xff]   ;;  %v40_v6 = vld [vmem:[%s5586_s0 + $0x8] sm:$0xff] }
   0x2   :  { %116 = vmatprep.subr.bf16.mxu1 %v3937_v0  ;;  %v3940_v3 = vld [vmem:[%s5585_s1 + $0x24] ss:$16 sps:$4 sm:$0xff]   ;;  %v3942_v4 = vld [vmem:[%s5585_s1 + $0x20] ss:$16 sps:$4 sm:$0xff]   ;;  %v3945_v7 = vld [vmem:[%s5585_s1 + $0xc] ss:$16 sps:$4 sm:$0xff]  }
   0x3   :  { %v39_v5 = vld [vmem:[%s5586_s0] sm:$0xff]  ;;  %117 = vmatpush1.bf16.msra.mxu1 %v3939_v2  ;;  %v3943_v9 = vld [vmem:[%s5585_s1 + $0x8] ss:$16 sps:$4 sm:$0xff]   ;;  %v3948_v10 = vld [vmem:[%s5585_s1 + $0x2c] ss:$16 sps:$4 sm:$0xff]  }
   0x4   :  { %118 = vmatprep.subr.bf16.mxu1 %v3940_v3  ;;  %v41_v8 = vpack.c.bf16 %v40_v6, %v39_v5  ;;  %v214_v11 = vld [vmem:[%s5587_s3] sm:$0xff]  ;;  %v3946_v20 = vld [vmem:[%s5585_s1 + $0x28] ss:$16 sps:$4 sm:$0xff]  }
   0x5   :  { %v342_v12 = vld [vmem:[%s5587_s3 + $0x400] sm:$0xff] }
   0x6   :  { %v346_v13 = vld [vmem:[%s5587_s3 + $0x420] sm:$0xff] }
   0x7   :  { %119 = vmatpush1.bf16.msra.mxu1 %v3942_v4  ;;  %v218_v14 = vld [vmem:[%s5587_s3 + $0x20] sm:$0xff]  ;;  %v3554_v15 = vcombine.high %v342_v12, %v346_v13  ;;  %v3553_v16 = vcombine.low %v342_v12, %v346_v13 }
   0x8   :  { %159 = vmatprep.subr.bf16.mxu1 %v3945_v7  ;;  %v350_v17 = vld [vmem:[%s5587_s3 + $0x440] sm:$0xff]  ;;  %v3426_v23 = vcombine.high %v214_v11, %v218_v14  ;;  %v3425_v28 = vcombine.low %v214_v11, %v218_v14 }
   0x9   :  { %v354_v18 = vld [vmem:[%s5587_s3 + $0x460] sm:$0xff]  ;;  %1835 = vmatprep.subr.bf16.mxu0 %v3554_v15 }
   0xa   :  { %3423 = vmatmul.mubr.msk.bf16.vlgmr.msra.gmra.mrb[0].mxu1 %vm112_vm0, %v41_v8  ;;  %v3562_v19 = vcombine.high %v350_v17, %v354_v18  ;;  %v358_v21 = vld [vmem:[%s5587_s3 + $0x480] sm:$0xff]  ;;  %1836 = vmatpush1.bf16.msra.mxu0 %v3553_v16  ;;  %v3561_v26 = vcombine.low %v350_v17, %v354_v18 }
   0xb   :  { %160 = vmatpush1.bf16.msra.mxu1 %v3943_v9  ;;  %191 = vmatprep.mubr.bf16.mxu1 %v4165_v1  ;;  %v362_v22 = vld [vmem:[%s5587_s3 + $0x4a0] sm:$0xff] }
   0xc   :  { %161 = vmatprep.subr.bf16.mxu1 %v3948_v10  ;;  %v222_v24 = vld [vmem:[%s5587_s3 + $0x40] sm:$0xff]  ;;  %1837 = vmatprep.subr.bf16.mxu0 %v3562_v19  ;;  %v3570_v27 = vcombine.high %v358_v21, %v362_v22  ;;  %v3569_v34 = vcombine.low %v358_v21, %v362_v22 }
   0xd   :  { %v226_v25 = vld [vmem:[%s5587_s3 + $0x60] sm:$0xff] }
   0xe   :  { %v366_v29 = vld [vmem:[%s5587_s3 + $0x4c0] sm:$0xff]  ;;  %v3434_v31 = vcombine.high %v222_v24, %v226_v25  ;;  %1838 = vmatpush1.bf16.msra.mxu0 %v3561_v26  ;;  %v3433_v36 = vcombine.low %v222_v24, %v226_v25 }
   0xf   :  { %162 = vmatpush1.bf16.msra.mxu1 %v3946_v20  ;;  %v370_v30 = vld [vmem:[%s5587_s3 + $0x4e0] sm:$0xff]  ;;  %1839 = vmatprep.subr.bf16.mxu0 %v3570_v27 }
  0x10   :  { %1792 = vmatprep.subr.bf16.mxu1 %v3426_v23  ;;  %v230_v32 = vld [vmem:[%s5587_s3 + $0x80] sm:$0xff]  ;;  %v3578_v35 = vcombine.high %v366_v29, %v370_v30  ;;  %v3577_v42 = vcombine.low %v366_v29, %v370_v30 }
  0x11   :  { %v234_v33 = vld [vmem:[%s5587_s3 + $0xa0] sm:$0xff] }
  0x12   :  { %3424 = vmatmul.mubr.msk.bf16.vlgmr.msra.gmra.mrb[4].mxu1 %vm112_vm0, %v41_v8  ;;  %v374_v37 = vld [vmem:[%s5587_s3 + $0x500] sm:$0xff]  ;;  %v3442_v39 = vcombine.high %v230_v32, %v234_v33  ;;  %1840 = vmatpush1.bf16.msra.mxu0 %v3569_v34  ;;  %v3441_v44 = vcombine.low %v230_v32, %v234_v33 }
  0x13   :  { %1793 = vmatpush1.bf16.msra.mxu1 %v3425_v28  ;;  %v378_v38 = vld [vmem:[%s5587_s3 + $0x520] sm:$0xff]  ;;  %1841 = vmatprep.subr.bf16.mxu0 %v3578_v35 }
  0x14   :  { %1794 = vmatprep.subr.bf16.mxu1 %v3434_v31  ;;  %v238_v40 = vld [vmem:[%s5587_s3 + $0xc0] sm:$0xff]  ;;  %v3586_v43 = vcombine.high %v374_v37, %v378_v38  ;;  %v3585_v50 = vcombine.low %v374_v37, %v378_v38 }
  0x15   :  { %v242_v41 = vld [vmem:[%s5587_s3 + $0xe0] sm:$0xff] }
  0x16   :  { %v382_v45 = vld [vmem:[%s5587_s3 + $0x540] sm:$0xff]  ;;  %v3450_v47 = vcombine.high %v238_v40, %v242_v41  ;;  %1842 = vmatpush1.bf16.msra.mxu0 %v3577_v42  ;;  %v3449_v52 = vcombine.low %v238_v40, %v242_v41 }
  0x17   :  { %1795 = vmatpush1.bf16.msra.mxu1 %v3433_v36  ;;  %v386_v46 = vld [vmem:[%s5587_s3 + $0x560] sm:$0xff]  ;;  %1843 = vmatprep.subr.bf16.mxu0 %v3586_v43 }
  0x18   :  { %1796 = vmatprep.subr.bf16.mxu1 %v3442_v39  ;;  %v246_v48 = vld [vmem:[%s5587_s3 + $0x100] sm:$0xff]  ;;  %v3594_v51 = vcombine.high %v382_v45, %v386_v46  ;;  %v3593_v58 = vcombine.low %v382_v45, %v386_v46 }
  0x19   :  { %v250_v49 = vld [vmem:[%s5587_s3 + $0x120] sm:$0xff] }
  0x1a   :  { %v390_v53 = vld [vmem:[%s5587_s3 + $0x580] sm:$0xff]  ;;  %v3458_v55 = vcombine.high %v246_v48, %v250_v49  ;;  %1844 = vmatpush1.bf16.msra.mxu0 %v3585_v50  ;;  %v3457_v60 = vcombine.low %v246_v48, %v250_v49 }
  0x1b   :  { %1797 = vmatpush1.bf16.msra.mxu1 %v3441_v44  ;;  %v394_v54 = vld [vmem:[%s5587_s3 + $0x5a0] sm:$0xff]  ;;  %1845 = vmatprep.subr.bf16.mxu0 %v3594_v51 }
  0x1c   :  { %1798 = vmatprep.subr.bf16.mxu1 %v3450_v47  ;;  %v254_v56 = vld [vmem:[%s5587_s3 + $0x140] sm:$0xff]  ;;  %v3602_v59 = vcombine.high %v390_v53, %v394_v54  ;;  %v3601_v2 = vcombine.low %v390_v53, %v394_v54 }
  0x1d   :  { %v258_v57 = vld [vmem:[%s5587_s3 + $0x160] sm:$0xff] }
  0x1e   :  { %v398_v61 = vld [vmem:[%s5587_s3 + $0x5c0] sm:$0xff]  ;;  %v3466_v63 = vcombine.high %v254_v56, %v258_v57  ;;  %1846 = vmatpush1.bf16.msra.mxu0 %v3593_v58  ;;  %v3465_v4 = vcombine.low %v254_v56, %v258_v57 }
  0x1f   :  { %1799 = vmatpush1.bf16.msra.mxu1 %v3449_v52  ;;  %v402_v62 = vld [vmem:[%s5587_s3 + $0x5e0] sm:$0xff]  ;;  %1847 = vmatprep.subr.bf16.mxu0 %v3602_v59 }
  0x20   :  { %1800 = vmatprep.subr.bf16.mxu1 %v3458_v55  ;;  %v262_v0 = vld [vmem:[%s5587_s3 + $0x180] sm:$0xff]  ;;  %v3610_v3 = vcombine.high %v398_v61, %v402_v62  ;;  %v3609_v10 = vcombine.low %v398_v61, %v402_v62 }
  0x21   :  { %v266_v1 = vld [vmem:[%s5587_s3 + $0x1a0] sm:$0xff] }
  0x22   :  { %v406_v5 = vld [vmem:[%s5587_s3 + $0x600] sm:$0xff]  ;;  %v3474_v7 = vcombine.high %v262_v0, %v266_v1  ;;  %1848 = vmatpush1.bf16.msra.mxu0 %v3601_v2  ;;  %v3473_v12 = vcombine.low %v262_v0, %v266_v1 }
  0x23   :  { %1801 = vmatpush1.bf16.msra.mxu1 %v3457_v60  ;;  %v410_v6 = vld [vmem:[%s5587_s3 + $0x620] sm:$0xff]  ;;  %1849 = vmatprep.subr.bf16.mxu0 %v3610_v3 }
  0x24   :  { %1802 = vmatprep.subr.bf16.mxu1 %v3466_v63  ;;  %v270_v8 = vld [vmem:[%s5587_s3 + $0x1c0] sm:$0xff]  ;;  %v3618_v11 = vcombine.high %v406_v5, %v410_v6  ;;  %v3617_v18 = vcombine.low %v406_v5, %v410_v6  ;;  %v4449_v6 = vld [vmem:[%s5587_s3 + $0x8] sm:$0xff] }
  0x25   :  { %v274_v9 = vld [vmem:[%s5587_s3 + $0x1e0] sm:$0xff] }
  0x26   :  { %v414_v13 = vld [vmem:[%s5587_s3 + $0x640] sm:$0xff]  ;;  %v3482_v15 = vcombine.high %v270_v8, %v274_v9  ;;  %1850 = vmatpush1.bf16.msra.mxu0 %v3609_v10  ;;  %v3481_v20 = vcombine.low %v270_v8, %v274_v9  ;;  %v219_v8 = vld [vmem:[%s5587_s3 + $0x28] sm:$0xff] }
  0x27   :  { %1803 = vmatpush1.bf16.msra.mxu1 %v3465_v4  ;;  %v418_v14 = vld [vmem:[%s5587_s3 + $0x660] sm:$0xff]  ;;  %1851 = vmatprep.subr.bf16.mxu0 %v3618_v11  ;;  %v3427_v9 = vcombine.low %v4449_v6, %v219_v8  ;;  %v3428_v10 = vcombine.high %v4449_v6, %v219_v8  ;;  %v247_v8 = vld [vmem:[%s5587_s3 + $0x108] sm:$0xff] }
  0x28   :  { %1804 = vmatprep.subr.bf16.mxu1 %v3474_v7  ;;  %v278_v16 = vld [vmem:[%s5587_s3 + $0x200] sm:$0xff]  ;;  %v3626_v19 = vcombine.high %v414_v13, %v418_v14  ;;  %v3625_v26 = vcombine.low %v414_v13, %v418_v14 }
  0x29   :  { %v282_v17 = vld [vmem:[%s5587_s3 + $0x220] sm:$0xff] }
  0x2a   :  { %v422_v21 = vld [vmem:[%s5587_s3 + $0x680] sm:$0xff]  ;;  %v3490_v23 = vcombine.high %v278_v16, %v282_v17  ;;  %1852 = vmatpush1.bf16.msra.mxu0 %v3617_v18  ;;  %v3489_v28 = vcombine.low %v278_v16, %v282_v17  ;;  %v4465_v16 = vld [vmem:[%s5587_s3 + $0x10] sm:$0xff] }
  0x2b   :  { %1805 = vmatpush1.bf16.msra.mxu1 %v3473_v12  ;;  %v426_v22 = vld [vmem:[%s5587_s3 + $0x6a0] sm:$0xff]  ;;  %1853 = vmatprep.subr.bf16.mxu0 %v3626_v19  ;;  %v4470_v17 = vld [vmem:[%s5587_s3 + $0x30] sm:$0xff] }
  0x2c   :  { %1806 = vmatprep.subr.bf16.mxu1 %v3482_v15  ;;  %v286_v24 = vld [vmem:[%s5587_s3 + $0x240] sm:$0xff]  ;;  %v3634_v27 = vcombine.high %v422_v21, %v426_v22  ;;  %v3633_v34 = vcombine.low %v422_v21, %v426_v22  ;;  %v3429_v18 = vcombine.low %v4465_v16, %v4470_v17  ;;  %v3430_v19 = vcombine.high %v4465_v16, %v4470_v17  ;;  %v240_v16 = vld [vmem:[%s5587_s3 + $0xd0] sm:$0xff] }
  0x2d   :  { %v290_v25 = vld [vmem:[%s5587_s3 + $0x260] sm:$0xff]  ;;  %v244_v17 = vld [vmem:[%s5587_s3 + $0xf0] sm:$0xff] }
  0x2e   :  { %v430_v29 = vld [vmem:[%s5587_s3 + $0x6c0] sm:$0xff]  ;;  %v3498_v31 = vcombine.high %v286_v24, %v290_v25  ;;  %1854 = vmatpush1.bf16.msra.mxu0 %v3625_v26  ;;  %v3497_v36 = vcombine.low %v286_v24, %v290_v25 }
  0x2f   :  { %1807 = vmatpush1.bf16.msra.mxu1 %v3481_v20  ;;  %v434_v30 = vld [vmem:[%s5587_s3 + $0x6e0] sm:$0xff]  ;;  %1855 = vmatprep.subr.bf16.mxu0 %v3634_v27  ;;  %v52_v20 = vlaneseq }
  0x30   :  { %1808 = vmatprep.subr.bf16.mxu1 %v3490_v23  ;;  %v294_v32 = vld [vmem:[%s5587_s3 + $0x280] sm:$0xff]  ;;  %v3642_v35 = vcombine.high %v430_v29, %v434_v30  ;;  %v3641_v40 = vcombine.low %v430_v29, %v434_v30 }
  0x31   :  { %v298_v33 = vld [vmem:[%s5587_s3 + $0x2a0] sm:$0xff]  ;;  %v4476_v21 = vshrl.u32 %v52_v20, 7  ;;  %v255_v20 = vld [vmem:[%s5587_s3 + $0x148] sm:$0xff] }
  0x32   :  { %v3506_v37 = vcombine.high %v294_v32, %v298_v33  ;;  %v302_v38 = vld [vmem:[%s5587_s3 + $0x2c0] sm:$0xff]  ;;  %1856 = vmatpush1.bf16.msra.mxu0 %v3633_v34  ;;  %v3505_v41 = vcombine.low %v294_v32, %v298_v33 }
  0x33   :  { %1809 = vmatpush1.bf16.msra.mxu1 %v3489_v28  ;;  %v306_v39 = vld [vmem:[%s5587_s3 + $0x2e0] sm:$0xff]  ;;  %1857 = vmatprep.subr.bf16.mxu0 %v3642_v35  ;;  %v4479_v22 = vsub.s32 0, %v4476_v21  ;;  %v4485_v24 = vsub.s32 1, %v4476_v21  ;;  %v62_v30 = vsub.s32 2, %v4476_v21  ;;  %v66_v33 = vsub.s32 3, %v4476_v21 }
  0x34   :  { %1810 = vmatprep.subr.bf16.mxu1 %v3498_v31  ;;  %v3514_v42 = vcombine.high %v302_v38, %v306_v39  ;;  %v310_v43 = vld [vmem:[%s5587_s3 + $0x300] sm:$0xff]  ;;  %v3513_v45 = vcombine.low %v302_v38, %v306_v39 }
  0x35   :  { %v314_v44 = vld [vmem:[%s5587_s3 + $0x320] sm:$0xff] }
  0x36   :  { %1858 = vmatpush1.bf16.msra.mxu0 %v3641_v40  ;;  %v3522_v46 = vcombine.high %v310_v43, %v314_v44  ;;  %v318_v47 = vld [vmem:[%s5587_s3 + $0x340] sm:$0xff]  ;;  %v3521_v49 = vcombine.low %v310_v43, %v314_v44  ;;  %v223_v43 = vld [vmem:[%s5587_s3 + $0x48] sm:$0xff] }
  0x37   :  { %1811 = vmatpush1.bf16.msra.mxu1 %v3497_v36  ;;  %v322_v48 = vld [vmem:[%s5587_s3 + $0x360] sm:$0xff]  ;;  %v227_v44 = vld [vmem:[%s5587_s3 + $0x68] sm:$0xff] }
  0x38   :  { %1812 = vmatprep.subr.bf16.mxu1 %v3506_v37  ;;  %v3530_v50 = vcombine.high %v318_v47, %v322_v48  ;;  %v3529_v51 = vcombine.low %v318_v47, %v322_v48  ;;  %v326_v52 = vld [vmem:[%s5587_s3 + $0x380] sm:$0xff] }
  0x39   :  { %v330_v53 = vld [vmem:[%s5587_s3 + $0x3a0] sm:$0xff] }
  0x3a   :  { %v438_v54 = vld [vmem:[%s5587_s3 + $0x700] sm:$0xff]  ;;  %v3538_v55 = vcombine.high %v326_v52, %v330_v53  ;;  %v3537_v57 = vcombine.low %v326_v52, %v330_v53  ;;  %v231_v53 = vld [vmem:[%s5587_s3 + $0x88] sm:$0xff] }
  0x3b   :  { %1813 = vmatpush1.bf16.msra.mxu1 %v3505_v41  ;;  %v442_v56 = vld [vmem:[%s5587_s3 + $0x720] sm:$0xff] }
  0x3c   :  { %1814 = vmatprep.subr.bf16.mxu1 %v3514_v42  ;;  %v3650_v58 = vcombine.high %v438_v54, %v442_v56  ;;  %v3649_v59 = vcombine.low %v438_v54, %v442_v56  ;;  %v334_v60 = vld [vmem:[%s5587_s3 + $0x3c0] sm:$0xff]  ;;  %v235_v54 = vld [vmem:[%s5587_s3 + $0xa8] sm:$0xff] }
  0x3d   :  { %v338_v61 = vld [vmem:[%s5587_s3 + $0x3e0] sm:$0xff]  ;;  %v3443_v6 = vcombine.low %v231_v53, %v235_v54 }
  0x3e   :  { %1859 = vmatprep.subr.bf16.mxu0 %v3650_v58  ;;  %v446_v62 = vld [vmem:[%s5587_s3 + $0x740] sm:$0xff]  ;;  %v3546_v63 = vcombine.high %v334_v60, %v338_v61  ;;  %v3545_v1 = vcombine.low %v334_v60, %v338_v61  ;;  %v3435_v60 = vcombine.low %v223_v43, %v227_v44 }
  0x3f   :  { %1815 = vmatpush1.bf16.msra.mxu1 %v3513_v45  ;;  %1860 = vmatpush1.bf16.msra.mxu0 %v3649_v59  ;;  %v450_v0 = vld [vmem:[%s5587_s3 + $0x760] sm:$0xff] }
  0x40   :  { %1816 = vmatprep.subr.bf16.mxu1 %v3522_v46  ;;  %v3658_v2 = vcombine.high %v446_v62, %v450_v0  ;;  %v3657_v3 = vcombine.low %v446_v62, %v450_v0  ;;  %v454_v4 = vld [vmem:[%s5587_s3 + $0x780] sm:$0xff]  ;;  %v3444_v62 = vcombine.high %v231_v53, %v235_v54  ;;  %v239_v0 = vld [vmem:[%s5587_s3 + $0xc8] sm:$0xff] }
  0x41   :  { %v458_v5 = vld [vmem:[%s5587_s3 + $0x7a0] sm:$0xff] }
  0x42   :  { %1861 = vmatprep.subr.bf16.mxu0 %v3658_v2  ;;  %v3666_v7 = vcombine.high %v454_v4, %v458_v5  ;;  %v3665_v11 = vcombine.low %v454_v4, %v458_v5  ;;  %v462_v12 = vld [vmem:[%s5587_s3 + $0x7c0] sm:$0xff]  ;;  %v228_v4 = vld [vmem:[%s5587_s3 + $0x70] sm:$0xff] }
  0x43   :  { %1817 = vmatpush1.bf16.msra.mxu1 %v3521_v49  ;;  %1862 = vmatpush1.bf16.msra.mxu0 %v3657_v3  ;;  %v466_v13 = vld [vmem:[%s5587_s3 + $0x7e0] sm:$0xff]  ;;  %v224_v3 = vld [vmem:[%s5587_s3 + $0x50] sm:$0xff] }
  0x44   :  { %1818 = vmatprep.subr.bf16.mxu1 %v3530_v50  ;;  %1863 = vmatprep.subr.bf16.mxu0 %v3666_v7  ;;  %v3674_v14 = vcombine.high %v462_v12, %v466_v13  ;;  %v3673_v15 = vcombine.low %v462_v12, %v466_v13  ;;  %v50_v23 = vld [vmem:[%s5588_s2] sm:$0xf]  ;;  %v3436_v50 = vcombine.high %v223_v43, %v227_v44  ;;  %v236_v12 = vld [vmem:[%s5587_s3 + $0xb0] sm:$0xff] }
  0x45   :  { %v55_v25 = vrot.slane %v50_v23, %v4479_v22  ;;  %v59_v26 = vrot.slane %v50_v23, %v4485_v24  ;;  %v63_v39 = vrot.slane %v50_v23, %v62_v30  ;;  %v67_v42 = vrot.slane %v50_v23, %v66_v33  ;;  %v259_v23 = vld [vmem:[%s5587_s3 + $0x168] sm:$0xff] }
  0x47   :  { %1819 = vmatpush1.bf16.msra.mxu1 %v3529_v51  ;;  %1864 = vmatpush1.bf16.msra.mxu0 %v3665_v11  ;;  %v232_v11 = vld [vmem:[%s5587_s3 + $0x90] sm:$0xff] }
  0x48   :  { %1820 = vmatprep.subr.bf16.mxu1 %v3538_v55  ;;  %1865 = vmatprep.subr.bf16.mxu0 %v3674_v14  ;;  %v3437_v14 = vcombine.low %v224_v3, %v228_v4 }
  0x4b   :  { %1821 = vmatpush1.bf16.msra.mxu1 %v3537_v57  ;;  %1866 = vmatpush1.bf16.msra.mxu0 %v3673_v15 }
  0x4c   :  { %1822 = vmatprep.subr.bf16.mxu1 %v3546_v63  ;;  %1964 = vmatprep.subr.bf16.mxu0 %v3430_v19  ;;  %v3446_v19 = vcombine.high %v232_v11, %v236_v12 }
  0x4f   :  { %1823 = vmatpush1.bf16.msra.mxu1 %v3545_v1  ;;  %v243_v1 = vld [vmem:[%s5587_s3 + $0xe8] sm:$0xff] }
  0x50   :  { %1878 = vmatprep.subr.bf16.mxu1 %v3428_v10  ;;  %v3452_v7 = vcombine.high %v239_v0, %v243_v1  ;;  %v251_v10 = vld [vmem:[%s5587_s3 + $0x128] sm:$0xff]  ;;  %v3451_v13 = vcombine.low %v239_v0, %v243_v1 }
  0x51   :  { %v3460_v15 = vcombine.high %v247_v8, %v251_v10  ;;  %v295_v0 = vld [vmem:[%s5587_s3 + $0x288] sm:$0xff] }
  0x52   :  { %v299_v1 = vld [vmem:[%s5587_s3 + $0x2a8] sm:$0xff] }
  0xdd   :  { %v150_v27 = vpop.f32.mrb[0].mxu1 }
  0xde   :  { %v151_v28 = vadd.f32 %v150_v27, %v55_v25  ;;  %v152_v29 = vpop.f32.mrb[1].mxu1  ;;  %v3454_v27 = vcombine.high %v240_v16, %v244_v17 }
  0xdf   :  { %v153_v31 = vadd.f32 %v152_v29, %v59_v26  ;;  %v154_v32 = vpop.f32.mrb[2].mxu1  ;;  %v267_v29 = vld [vmem:[%s5587_s3 + $0x1a8] sm:$0xff] }
  0xe0   :  { %v155_v34 = vadd.f32 %v154_v32, %v55_v25  ;;  %v156_v35 = vpop.f32.mrb[3].mxu1  ;;  %v202_v37 = vmax.f32 %v151_v28, 0.0  ;;  %v3445_v25 = vcombine.low %v232_v11, %v236_v12  ;;  %v263_v28 = vld [vmem:[%s5587_s3 + $0x188] sm:$0xff]  ;;  %v252_v32 = vld [vmem:[%s5587_s3 + $0x130] sm:$0xff] }
  0xe1   :  { %v157_v36 = vadd.f32 %v156_v35, %v59_v26  ;;  %v203_v40 = vmax.f32 %v153_v31, 0.0  ;;  %v3468_v26 = vcombine.high %v255_v20, %v259_v23  ;;  %v248_v31 = vld [vmem:[%s5587_s3 + $0x110] sm:$0xff]  ;;  %v3453_v35 = vcombine.low %v240_v16, %v244_v17  ;;  %v307_v11 = vld [vmem:[%s5587_s3 + $0x2e8] sm:$0xff] }
  0xe2   :  { %v206_v38 = vmax.f32 %v155_v34, 0.0  ;;  %v3467_v34 = vcombine.low %v255_v20, %v259_v23  ;;  %v3461_v43 = vcombine.low %v248_v31, %v252_v32  ;;  %v288_v12 = vld [vmem:[%s5587_s3 + $0x250] sm:$0xff]  ;;  %v315_v20 = vld [vmem:[%s5587_s3 + $0x328] sm:$0xff] }
  0xe3   :  { %v207_v41 = vmax.f32 %v157_v36, 0.0  ;;  %v3476_v36 = vcombine.high %v263_v28, %v267_v29  ;;  %v296_v17 = vld [vmem:[%s5587_s3 + $0x290] sm:$0xff] }
  0xe4   :  { %v4501_v45 = vpack.c.bf16 %v206_v38, %v202_v37  ;;  %v3462_v37 = vcombine.high %v248_v31, %v252_v32  ;;  %v271_v38 = vld [vmem:[%s5587_s3 + $0x1c8] sm:$0xff] }
  0xe5   :  { %v4503_v46 = vpack.c.bf16 %v207_v41, %v203_v40  ;;  %v193_v47 = vpop.f32.mrb[4].mxu1  ;;  %v256_v40 = vld [vmem:[%s5587_s3 + $0x150] sm:$0xff] }
  0xe6   :  { %v194_v48 = vadd.f32 %v193_v47, %v63_v39  ;;  %v195_v49 = vpop.f32.mrb[5].mxu1  ;;  %v260_v41 = vld [vmem:[%s5587_s3 + $0x170] sm:$0xff] }
  0xe7   :  { %v196_v51 = vadd.f32 %v195_v49, %v67_v42  ;;  %v197_v52 = vpop.f32.mrb[6].mxu1  ;;  %1824 = vmatprep.mubr.bf16.mxu1 %v4503_v46  ;;  %v3470_v47 = vcombine.high %v256_v40, %v260_v41  ;;  %v283_v49 = vld [vmem:[%s5587_s3 + $0x228] sm:$0xff]  ;;  %v3469_v53 = vcombine.low %v256_v40, %v260_v41 }
  0xe8   :  { %v204_v55 = vmax.f32 %v194_v48, 0.0  ;;  %v198_v56 = vadd.f32 %v197_v52, %v63_v39  ;;  %v199_v57 = vpop.f32.mrb[7].mxu1  ;;  %1825 = vmatmul.mubr.bf16.vlgmr.msra.gmra.mrb[8].mxu1 %v4501_v45  ;;  %v275_v39 = vld [vmem:[%s5587_s3 + $0x1e8] sm:$0xff] }
  0xe9   :  { %v205_v58 = vmax.f32 %v196_v51, 0.0  ;;  %v200_v59 = vadd.f32 %v199_v57, %v67_v42  ;;  %1879 = vmatpush1.bf16.msra.mxu1 %v3427_v9  ;;  %1910 = vmatprep.mubr.bf16.mxu1 %v4503_v46  ;;  %v3438_v9 = vcombine.high %v224_v3, %v228_v4  ;;  %v3475_v42 = vcombine.low %v263_v28, %v267_v29  ;;  %v279_v48 = vld [vmem:[%s5587_s3 + $0x208] sm:$0xff]  ;;  %v268_v51 = vld [vmem:[%s5587_s3 + $0x1b0] sm:$0xff] }
  0xea   :  { %v208_v61 = vmax.f32 %v198_v56, 0.0  ;;  %1880 = vmatprep.subr.bf16.mxu1 %v3436_v50  ;;  %v3484_v44 = vcombine.high %v271_v38, %v275_v39  ;;  %v264_v50 = vld [vmem:[%s5587_s3 + $0x190] sm:$0xff]  ;;  %v3483_v52 = vcombine.low %v271_v38, %v275_v39  ;;  %v3492_v54 = vcombine.high %v279_v48, %v283_v49  ;;  %v287_v56 = vld [vmem:[%s5587_s3 + $0x248] sm:$0xff] }
  0xeb   :  { %v209_v63 = vmax.f32 %v200_v59, 0.0  ;;  %v291_v57 = vld [vmem:[%s5587_s3 + $0x268] sm:$0xff]  ;;  %v276_v59 = vld [vmem:[%s5587_s3 + $0x1f0] sm:$0xff] }
  0xec   :  { %v4520_v2 = vpack.c.bf16 %v208_v61, %v204_v55  ;;  %v3478_v55 = vcombine.high %v264_v50, %v268_v51  ;;  %v3477_v61 = vcombine.low %v264_v50, %v268_v51  ;;  %v280_v3 = vld [vmem:[%s5587_s3 + $0x210] sm:$0xff]  ;;  %v323_v28 = vld [vmem:[%s5587_s3 + $0x368] sm:$0xff] }
  0xed   :  { %v4528_v5 = vpack.c.bf16 %v209_v63, %v205_v58  ;;  %1881 = vmatpush1.bf16.msra.mxu1 %v3435_v60  ;;  %v272_v58 = vld [vmem:[%s5587_s3 + $0x1d0] sm:$0xff]  ;;  %v3491_v60 = vcombine.low %v279_v48, %v283_v49  ;;  %v331_v38 = vld [vmem:[%s5587_s3 + $0x3a8] sm:$0xff] }
  0xee   :  { %1882 = vmatprep.subr.bf16.mxu1 %v3444_v62  ;;  %v3500_v62 = vcombine.high %v287_v56, %v291_v57  ;;  %v3486_v63 = vcombine.high %v272_v58, %v276_v59  ;;  %v284_v4 = vld [vmem:[%s5587_s3 + $0x230] sm:$0xff]  ;;  %v339_v48 = vld [vmem:[%s5587_s3 + $0x3e8] sm:$0xff] }
  0xef   :  { %1867 = vmatprep.mubr.bf16.mxu0 %v4528_v5  ;;  %v304_v29 = vld [vmem:[%s5587_s3 + $0x2d0] sm:$0xff] }
  0xf0   :  { %1868 = vmatmul.mubr.bf16.vlgmr.msra.gmra.mrb[0].mxu0 %v4520_v2  ;;  %v312_v39 = vld [vmem:[%s5587_s3 + $0x310] sm:$0xff] }
  0xf1   :  { %1883 = vmatpush1.bf16.msra.mxu1 %v3443_v6  ;;  %1965 = vmatpush1.bf16.msra.mxu0 %v3429_v18  ;;  %v3459_v18 = vcombine.low %v247_v8, %v251_v10  ;;  %v3499_v6 = vcombine.low %v287_v56, %v291_v57  ;;  %v3508_v8 = vcombine.high %v295_v0, %v299_v1  ;;  %v303_v10 = vld [vmem:[%s5587_s3 + $0x2c8] sm:$0xff]  ;;  %v320_v49 = vld [vmem:[%s5587_s3 + $0x350] sm:$0xff] }
  0xf2   :  { %1996 = vmatprep.mubr.bf16.mxu0 %v4503_v46  ;;  %1884 = vmatprep.subr.bf16.mxu1 %v3452_v7  ;;  %v3485_v7 = vcombine.low %v272_v58, %v276_v59  ;;  %v3516_v23 = vcombine.high %v303_v10, %v307_v11  ;;  %v347_v56 = vld [vmem:[%s5587_s3 + $0x428] sm:$0xff]  ;;  %v328_v57 = vld [vmem:[%s5587_s3 + $0x390] sm:$0xff] }
  0xf3   :  { %1966 = vmatprep.subr.bf16.mxu0 %v3438_v9  ;;  %v3494_v9 = vcombine.high %v280_v3, %v284_v4 }
  0xf5   :  { %1885 = vmatpush1.bf16.msra.mxu1 %v3451_v13  ;;  %1967 = vmatpush1.bf16.msra.mxu0 %v3437_v14  ;;  %v292_v13 = vld [vmem:[%s5587_s3 + $0x270] sm:$0xff]  ;;  %v3507_v14 = vcombine.low %v295_v0, %v299_v1  ;;  %v355_v0 = vld [vmem:[%s5587_s3 + $0x468] sm:$0xff] }
  0xf6   :  { %1886 = vmatprep.subr.bf16.mxu1 %v3460_v15  ;;  %1968 = vmatprep.subr.bf16.mxu0 %v3446_v19  ;;  %v3493_v15 = vcombine.low %v280_v3, %v284_v4  ;;  %v311_v19 = vld [vmem:[%s5587_s3 + $0x308] sm:$0xff]  ;;  %v3502_v16 = vcombine.high %v288_v12, %v292_v13  ;;  %v336_v4 = vld [vmem:[%s5587_s3 + $0x3d0] sm:$0xff] }
  0xf7   :  { %v3524_v31 = vcombine.high %v311_v19, %v315_v20 }
  0xf9   :  { %1887 = vmatpush1.bf16.msra.mxu1 %v3459_v18  ;;  %1969 = vmatpush1.bf16.msra.mxu0 %v3445_v25  ;;  %v300_v18 = vld [vmem:[%s5587_s3 + $0x2b0] sm:$0xff]  ;;  %v3515_v25 = vcombine.low %v303_v10, %v307_v11 }
  0xfa   :  { %1888 = vmatprep.subr.bf16.mxu1 %v3468_v26  ;;  %1970 = vmatprep.subr.bf16.mxu0 %v3454_v27  ;;  %v3501_v26 = vcombine.low %v288_v12, %v292_v13  ;;  %v319_v27 = vld [vmem:[%s5587_s3 + $0x348] sm:$0xff]  ;;  %v3510_v32 = vcombine.high %v296_v17, %v300_v18  ;;  %v344_v12 = vld [vmem:[%s5587_s3 + $0x410] sm:$0xff] }
  0xfb   :  { %v3532_v40 = vcombine.high %v319_v27, %v323_v28  ;;  %v348_v13 = vld [vmem:[%s5587_s3 + $0x430] sm:$0xff] }
  0xfd   :  { %1889 = vmatpush1.bf16.msra.mxu1 %v3467_v34  ;;  %1971 = vmatpush1.bf16.msra.mxu0 %v3453_v35  ;;  %v308_v34 = vld [vmem:[%s5587_s3 + $0x2f0] sm:$0xff]  ;;  %v3523_v35 = vcombine.low %v311_v19, %v315_v20 }
  0xfe   :  { %1890 = vmatprep.subr.bf16.mxu1 %v3476_v36  ;;  %1972 = vmatprep.subr.bf16.mxu0 %v3462_v37  ;;  %v3509_v36 = vcombine.low %v296_v17, %v300_v18  ;;  %v327_v37 = vld [vmem:[%s5587_s3 + $0x388] sm:$0xff]  ;;  %v3518_v41 = vcombine.high %v304_v29, %v308_v34  ;;  %v352_v17 = vld [vmem:[%s5587_s3 + $0x450] sm:$0xff] }
  0xff   :  { %v3540_v50 = vcombine.high %v327_v37, %v331_v38  ;;  %v356_v18 = vld [vmem:[%s5587_s3 + $0x470] sm:$0xff] }
 0x101   :  { %1891 = vmatpush1.bf16.msra.mxu1 %v3475_v42  ;;  %1973 = vmatpush1.bf16.msra.mxu0 %v3461_v43  ;;  %v316_v42 = vld [vmem:[%s5587_s3 + $0x330] sm:$0xff]  ;;  %v3531_v43 = vcombine.low %v319_v27, %v323_v28  ;;  %v375_v27 = vld [vmem:[%s5587_s3 + $0x508] sm:$0xff] }
 0x102   :  { %1892 = vmatprep.subr.bf16.mxu1 %v3484_v44  ;;  %1974 = vmatprep.subr.bf16.mxu0 %v3470_v47  ;;  %v3517_v44 = vcombine.low %v304_v29, %v308_v34  ;;  %v335_v47 = vld [vmem:[%s5587_s3 + $0x3c8] sm:$0xff]  ;;  %v3526_v51 = vcombine.high %v312_v39, %v316_v42  ;;  %v3557_v29 = vcombine.low %v344_v12, %v348_v13 }
 0x103   :  { %v3548_v58 = vcombine.high %v335_v47, %v339_v48  ;;  %v379_v28 = vld [vmem:[%s5587_s3 + $0x528] sm:$0xff] }
 0x105   :  { %1893 = vmatpush1.bf16.msra.mxu1 %v3483_v52  ;;  %1975 = vmatpush1.bf16.msra.mxu0 %v3469_v53  ;;  %v324_v52 = vld [vmem:[%s5587_s3 + $0x370] sm:$0xff]  ;;  %v3539_v53 = vcombine.low %v327_v37, %v331_v38  ;;  %v383_v37 = vld [vmem:[%s5587_s3 + $0x548] sm:$0xff] }
 0x106   :  { %1894 = vmatprep.subr.bf16.mxu1 %v3492_v54  ;;  %1976 = vmatprep.subr.bf16.mxu0 %v3478_v55  ;;  %v3525_v54 = vcombine.low %v312_v39, %v316_v42  ;;  %v343_v55 = vld [vmem:[%s5587_s3 + $0x408] sm:$0xff]  ;;  %v3534_v59 = vcombine.high %v320_v49, %v324_v52  ;;  %v3565_v39 = vcombine.low %v352_v17, %v356_v18  ;;  %v372_v42 = vld [vmem:[%s5587_s3 + $0x4f0] sm:$0xff] }
 0x107   :  { %v3556_v1 = vcombine.high %v343_v55, %v347_v56  ;;  %v387_v38 = vld [vmem:[%s5587_s3 + $0x568] sm:$0xff] }
 0x109   :  { %1895 = vmatpush1.bf16.msra.mxu1 %v3491_v60  ;;  %1977 = vmatpush1.bf16.msra.mxu0 %v3477_v61  ;;  %v332_v60 = vld [vmem:[%s5587_s3 + $0x3b0] sm:$0xff]  ;;  %v3547_v61 = vcombine.low %v335_v47, %v339_v48  ;;  %v391_v47 = vld [vmem:[%s5587_s3 + $0x588] sm:$0xff] }
 0x10a   :  { %1896 = vmatprep.subr.bf16.mxu1 %v3500_v62  ;;  %1978 = vmatprep.subr.bf16.mxu0 %v3486_v63  ;;  %v3533_v62 = vcombine.low %v320_v49, %v324_v52  ;;  %v351_v63 = vld [vmem:[%s5587_s3 + $0x448] sm:$0xff]  ;;  %v3542_v3 = vcombine.high %v328_v57, %v332_v60  ;;  %v3541_v10 = vcombine.low %v328_v57, %v332_v60  ;;  %v380_v52 = vld [vmem:[%s5587_s3 + $0x530] sm:$0xff] }
 0x10b   :  { %v3564_v11 = vcombine.high %v351_v63, %v355_v0  ;;  %v395_v48 = vld [vmem:[%s5587_s3 + $0x5a8] sm:$0xff]  ;;  %v388_v60 = vld [vmem:[%s5587_s3 + $0x570] sm:$0xff] }
 0x10c   :  { %v3604_v57 = vcombine.high %v391_v47, %v395_v48 }
 0x10d   :  { %1897 = vmatpush1.bf16.msra.mxu1 %v3499_v6  ;;  %1979 = vmatpush1.bf16.msra.mxu0 %v3485_v7  ;;  %v340_v6 = vld [vmem:[%s5587_s3 + $0x3f0] sm:$0xff]  ;;  %v3555_v7 = vcombine.low %v343_v55, %v347_v56  ;;  %v399_v55 = vld [vmem:[%s5587_s3 + $0x5c8] sm:$0xff] }
 0x10e   :  { %1898 = vmatprep.subr.bf16.mxu1 %v3508_v8  ;;  %1980 = vmatprep.subr.bf16.mxu0 %v3494_v9  ;;  %v359_v8 = vld [vmem:[%s5587_s3 + $0x488] sm:$0xff]  ;;  %v3549_v19 = vcombine.low %v336_v4, %v340_v6 }
 0x10f   :  { %v363_v9 = vld [vmem:[%s5587_s3 + $0x4a8] sm:$0xff] }
 0x110   :  { %v3572_v20 = vcombine.high %v359_v8, %v363_v9 }
 0x111   :  { %1899 = vmatpush1.bf16.msra.mxu1 %v3507_v14  ;;  %1981 = vmatpush1.bf16.msra.mxu0 %v3493_v15  ;;  %v3550_v14 = vcombine.high %v336_v4, %v340_v6  ;;  %v3563_v15 = vcombine.low %v351_v63, %v355_v0  ;;  %v392_v4 = vld [vmem:[%s5587_s3 + $0x590] sm:$0xff] }
 0x112   :  { %1900 = vmatprep.subr.bf16.mxu1 %v3516_v23  ;;  %1982 = vmatprep.subr.bf16.mxu0 %v3502_v16  ;;  %v367_v23 = vld [vmem:[%s5587_s3 + $0x4c8] sm:$0xff] }
 0x113   :  { %v371_v16 = vld [vmem:[%s5587_s3 + $0x4e8] sm:$0xff] }
 0x114   :  { %v3580_v34 = vcombine.high %v367_v23, %v371_v16 }
 0x115   :  { %1901 = vmatpush1.bf16.msra.mxu1 %v3515_v25  ;;  %1983 = vmatpush1.bf16.msra.mxu0 %v3501_v26  ;;  %v3558_v25 = vcombine.high %v344_v12, %v348_v13  ;;  %v3571_v26 = vcombine.low %v359_v8, %v363_v9  ;;  %v415_v9 = vld [vmem:[%s5587_s3 + $0x648] sm:$0xff]  ;;  %v400_v13 = vld [vmem:[%s5587_s3 + $0x5d0] sm:$0xff] }
 0x116   :  { %1902 = vmatprep.subr.bf16.mxu1 %v3524_v31  ;;  %1984 = vmatprep.subr.bf16.mxu0 %v3510_v32  ;;  %v360_v31 = vld [vmem:[%s5587_s3 + $0x490] sm:$0xff] }
 0x117   :  { %v364_v32 = vld [vmem:[%s5587_s3 + $0x4b0] sm:$0xff] }
 0x118   :  { %v3573_v49 = vcombine.low %v360_v31, %v364_v32 }
 0x119   :  { %1903 = vmatpush1.bf16.msra.mxu1 %v3523_v35  ;;  %1985 = vmatpush1.bf16.msra.mxu0 %v3509_v36  ;;  %v3566_v35 = vcombine.high %v352_v17, %v356_v18  ;;  %v3579_v36 = vcombine.low %v367_v23, %v371_v16  ;;  %v423_v16 = vld [vmem:[%s5587_s3 + $0x688] sm:$0xff]  ;;  %v408_v18 = vld [vmem:[%s5587_s3 + $0x610] sm:$0xff] }
 0x11a   :  { %1904 = vmatprep.subr.bf16.mxu1 %v3532_v40  ;;  %1986 = vmatprep.subr.bf16.mxu0 %v3518_v41  ;;  %v3588_v40 = vcombine.high %v375_v27, %v379_v28  ;;  %v368_v41 = vld [vmem:[%s5587_s3 + $0x4d0] sm:$0xff]  ;;  %v427_v17 = vld [vmem:[%s5587_s3 + $0x6a8] sm:$0xff] }
 0x11b   :  { %v3581_v56 = vcombine.low %v368_v41, %v372_v42 }
 0x11d   :  { %1905 = vmatpush1.bf16.msra.mxu1 %v3531_v43  ;;  %1987 = vmatpush1.bf16.msra.mxu0 %v3517_v44  ;;  %v3574_v43 = vcombine.high %v360_v31, %v364_v32  ;;  %v3587_v44 = vcombine.low %v375_v27, %v379_v28  ;;  %v431_v31 = vld [vmem:[%s5587_s3 + $0x6c8] sm:$0xff] }
 0x11e   :  { %1906 = vmatprep.subr.bf16.mxu1 %v3540_v50  ;;  %1988 = vmatprep.subr.bf16.mxu0 %v3526_v51  ;;  %v3596_v50 = vcombine.high %v383_v37, %v387_v38  ;;  %v376_v51 = vld [vmem:[%s5587_s3 + $0x510] sm:$0xff]  ;;  %v435_v32 = vld [vmem:[%s5587_s3 + $0x6e8] sm:$0xff] }
 0x11f   :  { %v3589_v63 = vcombine.low %v376_v51, %v380_v52 }
 0x121   :  { %1907 = vmatpush1.bf16.msra.mxu1 %v3539_v53  ;;  %1989 = vmatpush1.bf16.msra.mxu0 %v3525_v54  ;;  %v3582_v53 = vcombine.high %v368_v41, %v372_v42  ;;  %v3595_v54 = vcombine.low %v383_v37, %v387_v38  ;;  %v3635_v37 = vcombine.low %v423_v16, %v427_v17  ;;  %v439_v41 = vld [vmem:[%s5587_s3 + $0x708] sm:$0xff] }
 0x122   :  { %1908 = vmatprep.subr.bf16.mxu1 %v3548_v58  ;;  %1990 = vmatprep.subr.bf16.mxu0 %v3534_v59  ;;  %v403_v58 = vld [vmem:[%s5587_s3 + $0x5e8] sm:$0xff]  ;;  %v384_v59 = vld [vmem:[%s5587_s3 + $0x550] sm:$0xff] }
 0x123   :  { %v3612_v0 = vcombine.high %v399_v55, %v403_v58  ;;  %v3598_v6 = vcombine.high %v384_v59, %v388_v60  ;;  %v3611_v8 = vcombine.low %v399_v55, %v403_v58  ;;  %v443_v42 = vld [vmem:[%s5587_s3 + $0x728] sm:$0xff] }
 0x124   :  { %v3651_v55 = vcombine.low %v439_v41, %v443_v42 }
 0x125   :  { %1909 = vmatpush1.bf16.msra.mxu1 %v3547_v61  ;;  %1991 = vmatpush1.bf16.msra.mxu0 %v3533_v62  ;;  %v3590_v61 = vcombine.high %v376_v51, %v380_v52  ;;  %v3603_v62 = vcombine.low %v391_v47, %v395_v48  ;;  %v3643_v47 = vcombine.low %v431_v31, %v435_v32  ;;  %v447_v51 = vld [vmem:[%s5587_s3 + $0x748] sm:$0xff] }
 0x126   :  { %1921 = vmatprep.subr.bf16.mxu1 %v3556_v1  ;;  %1992 = vmatprep.subr.bf16.mxu0 %v3542_v3  ;;  %v407_v1 = vld [vmem:[%s5587_s3 + $0x608] sm:$0xff] }
 0x127   :  { %v411_v3 = vld [vmem:[%s5587_s3 + $0x628] sm:$0xff] }
 0x128   :  { %1911 = vmatmul.mubr.bf16.vlgmr.msra.gmra.mrb[12].mxu1 %v4501_v45  ;;  %v3620_v12 = vcombine.high %v407_v1, %v411_v3  ;;  %v451_v52 = vld [vmem:[%s5587_s3 + $0x768] sm:$0xff] }
 0x129   :  { %1922 = vmatpush1.bf16.msra.mxu1 %v3555_v7  ;;  %1953 = vmatprep.mubr.bf16.mxu1 %v4528_v5  ;;  %v396_v7 = vld [vmem:[%s5587_s3 + $0x5b0] sm:$0xff] }
 0x12a   :  { %1993 = vmatpush1.bf16.msra.mxu0 %v3541_v10  ;;  %1923 = vmatprep.subr.bf16.mxu1 %v3564_v11  ;;  %v419_v10 = vld [vmem:[%s5587_s3 + $0x668] sm:$0xff]  ;;  %v3597_v11 = vcombine.low %v384_v59, %v388_v60 }
 0x12b   :  { %1994 = vmatprep.subr.bf16.mxu0 %v3550_v14  ;;  %v404_v14 = vld [vmem:[%s5587_s3 + $0x5f0] sm:$0xff]  ;;  %v3628_v23 = vcombine.high %v415_v9, %v419_v10  ;;  %v3627_v27 = vcombine.low %v415_v9, %v419_v10  ;;  %v455_v59 = vld [vmem:[%s5587_s3 + $0x788] sm:$0xff] }
 0x12c   :  { %v3613_v28 = vcombine.low %v400_v13, %v404_v14  ;;  %v459_v60 = vld [vmem:[%s5587_s3 + $0x7a8] sm:$0xff] }
 0x12d   :  { %1924 = vmatpush1.bf16.msra.mxu1 %v3563_v15  ;;  %v3606_v15 = vcombine.high %v392_v4, %v396_v7  ;;  %v3667_v9 = vcombine.low %v455_v59, %v459_v60 }
 0x12e   :  { %1995 = vmatpush1.bf16.msra.mxu0 %v3549_v19  ;;  %1925 = vmatprep.subr.bf16.mxu1 %v3572_v20  ;;  %v3619_v19 = vcombine.low %v407_v1, %v411_v3  ;;  %v3605_v20 = vcombine.low %v392_v4, %v396_v7  ;;  %v3668_v1 = vcombine.high %v455_v59, %v459_v60  ;;  %v463_v4 = vld [vmem:[%s5587_s3 + $0x7c8] sm:$0xff]  ;;  %v448_v7 = vld [vmem:[%s5587_s3 + $0x750] sm:$0xff]  ;;  %v269_v59 = vld [vmem:[%s5587_s3 + $0x1b8] sm:$0xff] }
 0x12f   :  { %2007 = vmatprep.subr.bf16.mxu0 %v3558_v25  ;;  %v3614_v25 = vcombine.high %v400_v13, %v404_v14  ;;  %v217_v13 = vld [vmem:[%s5587_s3 + $0x18] sm:$0xff] }
 0x130   :  { %v221_v14 = vld [vmem:[%s5587_s3 + $0x38] sm:$0xff] }
 0x131   :  { %1997 = vmatmul.mubr.bf16.vlgmr.msra.gmra.mrb[4].mxu0 %v4501_v45  ;;  %1926 = vmatpush1.bf16.msra.mxu1 %v3571_v26  ;;  %v412_v26 = vld [vmem:[%s5587_s3 + $0x630] sm:$0xff] }
 0x132   :  { %2008 = vmatpush1.bf16.msra.mxu0 %v3557_v29  ;;  %2039 = vmatprep.mubr.bf16.mxu0 %v4528_v5  ;;  %v3636_v29 = vcombine.high %v423_v16, %v427_v17  ;;  %v3621_v38 = vcombine.low %v408_v18, %v412_v26  ;;  %v3432_v16 = vcombine.high %v217_v13, %v221_v14  ;;  %v3960_v60 = vld [vmem:[%s5589_s5 + $0x34] ss:$8 sps:$4 sm:$0xff]  }
 0x133   :  { %1927 = vmatprep.subr.bf16.mxu1 %v3580_v34  ;;  %2009 = vmatprep.subr.bf16.mxu0 %v3566_v35  ;;  %v416_v34 = vld [vmem:[%s5587_s3 + $0x650] sm:$0xff]  ;;  %v3622_v35 = vcombine.high %v408_v18, %v412_v26  ;;  %v225_v18 = vld [vmem:[%s5587_s3 + $0x58] sm:$0xff] }
 0x134   :  { %v464_v26 = vld [vmem:[%s5587_s3 + $0x7d0] sm:$0xff] }
 0x135   :  { %1928 = vmatpush1.bf16.msra.mxu1 %v3579_v36  ;;  %v420_v36 = vld [vmem:[%s5587_s3 + $0x670] sm:$0xff] }
 0x136   :  { %2010 = vmatpush1.bf16.msra.mxu0 %v3565_v39  ;;  %1929 = vmatprep.subr.bf16.mxu1 %v3588_v40  ;;  %v3644_v39 = vcombine.high %v431_v31, %v435_v32  ;;  %v3630_v40 = vcombine.high %v416_v34, %v420_v36  ;;  %v3629_v48 = vcombine.low %v416_v34, %v420_v36  ;;  %v233_v34 = vld [vmem:[%s5587_s3 + $0x98] sm:$0xff] }
 0x137   :  { %2011 = vmatprep.subr.bf16.mxu0 %v3574_v43  ;;  %v424_v43 = vld [vmem:[%s5587_s3 + $0x690] sm:$0xff] }
 0x139   :  { %1930 = vmatpush1.bf16.msra.mxu1 %v3587_v44  ;;  %v428_v44 = vld [vmem:[%s5587_s3 + $0x6b0] sm:$0xff] }
 0x13a   :  { %2012 = vmatpush1.bf16.msra.mxu0 %v3573_v49  ;;  %1931 = vmatprep.subr.bf16.mxu1 %v3596_v50  ;;  %v3652_v49 = vcombine.high %v439_v41, %v443_v42  ;;  %v3638_v50 = vcombine.high %v424_v43, %v428_v44  ;;  %v3951_v41 = vld [vmem:[%s5589_s5 + $0x4] ss:$8 sps:$4 sm:$0xff]  }
 0x13b   :  { %2013 = vmatprep.subr.bf16.mxu0 %v3582_v53  ;;  %v432_v53 = vld [vmem:[%s5587_s3 + $0x6d0] sm:$0xff] }
 0x13d   :  { %1932 = vmatpush1.bf16.msra.mxu1 %v3595_v54  ;;  %v436_v54 = vld [vmem:[%s5587_s3 + $0x6f0] sm:$0xff] }
 0x13e   :  { %2014 = vmatpush1.bf16.msra.mxu0 %v3581_v56  ;;  %1933 = vmatprep.subr.bf16.mxu1 %v3604_v57  ;;  %v3637_v56 = vcombine.low %v424_v43, %v428_v44  ;;  %v3660_v57 = vcombine.high %v447_v51, %v451_v52  ;;  %v3646_v58 = vcombine.high %v432_v53, %v436_v54  ;;  %v3949_v43 = vld [vmem:[%s5589_s5] ss:$8 sps:$4 sm:$0xff]   ;;  %v249_v44 = vld [vmem:[%s5587_s3 + $0x118] sm:$0xff] }
 0x13f   :  { %2015 = vmatprep.subr.bf16.mxu0 %v3590_v61  ;;  %v440_v61 = vld [vmem:[%s5587_s3 + $0x710] sm:$0xff] }
 0x141   :  { %1934 = vmatpush1.bf16.msra.mxu1 %v3603_v62  ;;  %v444_v62 = vld [vmem:[%s5587_s3 + $0x730] sm:$0xff] }
 0x142   :  { %2016 = vmatpush1.bf16.msra.mxu0 %v3589_v63  ;;  %1935 = vmatprep.subr.bf16.mxu1 %v3612_v0  ;;  %v3659_v63 = vcombine.low %v447_v51, %v451_v52  ;;  %v3645_v0 = vcombine.low %v432_v53, %v436_v54  ;;  %v3654_v3 = vcombine.high %v440_v61, %v444_v62  ;;  %v3952_v51 = vld [vmem:[%s5589_s5 + $0x10] ss:$8 sps:$4 sm:$0xff]   ;;  %v3957_v54 = vld [vmem:[%s5589_s5 + $0x24] ss:$8 sps:$4 sm:$0xff]  }
 0x143   :  { %2017 = vmatprep.subr.bf16.mxu0 %v3598_v6  ;;  %v467_v6 = vld [vmem:[%s5587_s3 + $0x7e8] sm:$0xff]  ;;  %v3653_v10 = vcombine.low %v440_v61, %v444_v62  ;;  %v257_v52 = vld [vmem:[%s5587_s3 + $0x158] sm:$0xff] }
 0x144   :  { %v261_v53 = vld [vmem:[%s5587_s3 + $0x178] sm:$0xff] }
 0x145   :  { %1936 = vmatpush1.bf16.msra.mxu1 %v3611_v8  ;;  %v452_v8 = vld [vmem:[%s5587_s3 + $0x770] sm:$0xff]  ;;  %v3471_v61 = vcombine.low %v257_v52, %v261_v53 }
 0x146   :  { %2018 = vmatpush1.bf16.msra.mxu0 %v3597_v11  ;;  %1937 = vmatprep.subr.bf16.mxu1 %v3620_v12  ;;  %v3676_v11 = vcombine.high %v463_v4, %v467_v6  ;;  %v3662_v12 = vcombine.high %v448_v7, %v452_v8 }
 0x147   :  { %2019 = vmatprep.subr.bf16.mxu0 %v3606_v15  ;;  %v456_v15 = vld [vmem:[%s5587_s3 + $0x790] sm:$0xff] }
 0x149   :  { %1938 = vmatpush1.bf16.msra.mxu1 %v3619_v19  ;;  %v460_v19 = vld [vmem:[%s5587_s3 + $0x7b0] sm:$0xff] }
 0x14a   :  { %2020 = vmatpush1.bf16.msra.mxu0 %v3605_v20  ;;  %1939 = vmatprep.subr.bf16.mxu1 %v3628_v23  ;;  %v3675_v20 = vcombine.low %v463_v4, %v467_v6  ;;  %v3661_v23 = vcombine.low %v448_v7, %v452_v8  ;;  %v3670_v17 = vcombine.high %v456_v15, %v460_v19  ;;  %v3961_v7 = vld [vmem:[%s5589_s5 + $0x40] ss:$8 sps:$4 sm:$0xff]   ;;  %v281_v8 = vld [vmem:[%s5587_s3 + $0x218] sm:$0xff] }
 0x14b   :  { %2021 = vmatprep.subr.bf16.mxu0 %v3614_v25  ;;  %v229_v25 = vld [vmem:[%s5587_s3 + $0x78] sm:$0xff] }
 0x14c   :  { %v3440_v31 = vcombine.high %v225_v18, %v229_v25  ;;  %v3439_v36 = vcombine.low %v225_v18, %v229_v25  ;;  %v301_v18 = vld [vmem:[%s5587_s3 + $0x2b8] sm:$0xff] }
 0x14d   :  { %1940 = vmatpush1.bf16.msra.mxu1 %v3627_v27  ;;  %v468_v27 = vld [vmem:[%s5587_s3 + $0x7f0] sm:$0xff] }
 0x14e   :  { %2022 = vmatpush1.bf16.msra.mxu0 %v3613_v28  ;;  %1941 = vmatprep.subr.bf16.mxu1 %v3636_v29  ;;  %v3431_v28 = vcombine.low %v217_v13, %v221_v14  ;;  %v3669_v29 = vcombine.low %v456_v15, %v460_v19  ;;  %v3678_v32 = vcombine.high %v464_v26, %v468_v27  ;;  %v3964_v13 = vld [vmem:[%s5589_s5 + $0x50] ss:$8 sps:$4 sm:$0xff]   ;;  %v3969_v19 = vld [vmem:[%s5589_s5 + $0x64] ss:$8 sps:$4 sm:$0xff]   ;;  %v3972_v25 = vld [vmem:[%s5589_s5 + $0x74] ss:$8 sps:$4 sm:$0xff]  }
 0x14f   :  { %2023 = vmatprep.subr.bf16.mxu0 %v3622_v35  ;;  %v237_v35 = vld [vmem:[%s5587_s3 + $0xb8] sm:$0xff] }
 0x150   :  { %v289_v14 = vld [vmem:[%s5587_s3 + $0x258] sm:$0xff] }
 0x151   :  { %1942 = vmatpush1.bf16.msra.mxu1 %v3635_v37  ;;  %v3677_v37 = vcombine.low %v464_v26, %v468_v27  ;;  %v293_v15 = vld [vmem:[%s5587_s3 + $0x278] sm:$0xff] }
 0x152   :  { %2024 = vmatpush1.bf16.msra.mxu0 %v3621_v38  ;;  %1943 = vmatprep.subr.bf16.mxu1 %v3644_v39  ;;  %v3448_v38 = vcombine.high %v233_v34, %v237_v35  ;;  %v241_v39 = vld [vmem:[%s5587_s3 + $0xd8] sm:$0xff]  ;;  %v3503_v26 = vcombine.low %v289_v14, %v293_v15 }
 0x153   :  { %2025 = vmatprep.subr.bf16.mxu0 %v3630_v40  ;;  %v245_v40 = vld [vmem:[%s5587_s3 + $0xf8] sm:$0xff] }
 0x154   :  { %v3456_v42 = vcombine.high %v241_v39, %v245_v40 }
 0x155   :  { %1944 = vmatpush1.bf16.msra.mxu1 %v3643_v47  ;;  %v253_v47 = vld [vmem:[%s5587_s3 + $0x138] sm:$0xff] }
 0x156   :  { %2026 = vmatpush1.bf16.msra.mxu0 %v3629_v48  ;;  %1945 = vmatprep.subr.bf16.mxu1 %v3652_v49  ;;  %v3954_v48 = vld [vmem:[%s5589_s5 + $0x14] ss:$8 sps:$4 sm:$0xff]   ;;  %v3455_v49 = vcombine.low %v241_v39, %v245_v40 }
 0x157   :  { %2027 = vmatprep.subr.bf16.mxu0 %v3638_v50  ;;  %v3464_v50 = vcombine.high %v249_v44, %v253_v47  ;;  %v3978_v39 = vld [vmem:[%s5589_s5 + $0x94] ss:$8 sps:$4 sm:$0xff]  }
 0x159   :  { %1946 = vmatpush1.bf16.msra.mxu1 %v3651_v55  ;;  %v3463_v55 = vcombine.low %v249_v44, %v253_v47  ;;  %v3981_v44 = vld [vmem:[%s5589_s5 + $0xa4] ss:$8 sps:$4 sm:$0xff]  }
 0x15a   :  { %2028 = vmatpush1.bf16.msra.mxu0 %v3637_v56  ;;  %1947 = vmatprep.subr.bf16.mxu1 %v3660_v57  ;;  %v3472_v56 = vcombine.high %v257_v52, %v261_v53  ;;  %v3955_v57 = vld [vmem:[%s5589_s5 + $0x20] ss:$8 sps:$4 sm:$0xff]   ;;  %v3984_v52 = vld [vmem:[%s5589_s5 + $0xb4] ss:$8 sps:$4 sm:$0xff]  }
 0x15b   :  { %2029 = vmatprep.subr.bf16.mxu0 %v3646_v58  ;;  %v265_v58 = vld [vmem:[%s5587_s3 + $0x198] sm:$0xff] }
 0x15c   :  { %v3480_v62 = vcombine.high %v265_v58, %v269_v59  ;;  %v3479_v4 = vcombine.low %v265_v58, %v269_v59  ;;  %v3987_v58 = vld [vmem:[%s5589_s5 + $0xc4] ss:$8 sps:$4 sm:$0xff]  }
 0x15d   :  { %1948 = vmatpush1.bf16.msra.mxu1 %v3659_v63  ;;  %v3958_v63 = vld [vmem:[%s5589_s5 + $0x30] ss:$8 sps:$4 sm:$0xff]  }
 0x15e   :  { %2030 = vmatpush1.bf16.msra.mxu0 %v3645_v0  ;;  %1949 = vmatprep.subr.bf16.mxu1 %v3668_v1  ;;  %v273_v0 = vld [vmem:[%s5587_s3 + $0x1d8] sm:$0xff] }
 0x15f   :  { %2031 = vmatprep.subr.bf16.mxu0 %v3654_v3  ;;  %v277_v1 = vld [vmem:[%s5587_s3 + $0x1f8] sm:$0xff]  ;;  %v3963_v3 = vld [vmem:[%s5589_s5 + $0x44] ss:$8 sps:$4 sm:$0xff]  }
 0x160   :  { %v3488_v6 = vcombine.high %v273_v0, %v277_v1 }
 0x161   :  { %1950 = vmatpush1.bf16.msra.mxu1 %v3667_v9  ;;  %v285_v9 = vld [vmem:[%s5587_s3 + $0x238] sm:$0xff] }
 0x162   :  { %2032 = vmatpush1.bf16.msra.mxu0 %v3653_v10  ;;  %1951 = vmatprep.subr.bf16.mxu1 %v3676_v11  ;;  %v3966_v10 = vld [vmem:[%s5589_s5 + $0x54] ss:$8 sps:$4 sm:$0xff]   ;;  %v3487_v11 = vcombine.low %v273_v0, %v277_v1 }
 0x163   :  { %2033 = vmatprep.subr.bf16.mxu0 %v3662_v12  ;;  %v3496_v12 = vcombine.high %v281_v8, %v285_v9  ;;  %v3990_v0 = vld [vmem:[%s5589_s5 + $0xd4] ss:$8 sps:$4 sm:$0xff]  }
 0x165   :  { %1952 = vmatpush1.bf16.msra.mxu1 %v3675_v20  ;;  %v3495_v20 = vcombine.low %v281_v8, %v285_v9  ;;  %v3993_v8 = vld [vmem:[%s5589_s5 + $0xe4] ss:$8 sps:$4 sm:$0xff]  }
 0x166   :  { %2034 = vmatpush1.bf16.msra.mxu0 %v3661_v23  ;;  %2050 = vmatprep.subr.bf16.mxu1 %v3432_v16  ;;  %v3504_v23 = vcombine.high %v289_v14, %v293_v15  ;;  %v3967_v16 = vld [vmem:[%s5589_s5 + $0x60] ss:$8 sps:$4 sm:$0xff]   ;;  %v3996_v14 = vld [vmem:[%s5589_s5 + $0xf4] ss:$8 sps:$4 sm:$0xff]  }
 0x167   :  { %2035 = vmatprep.subr.bf16.mxu0 %v3670_v17  ;;  %v297_v17 = vld [vmem:[%s5587_s3 + $0x298] sm:$0xff] }
 0x168   :  { %1954 = vmatmul.mubr.bf16.vlgmr.msra.gmra.mrb[12].mxu1 %v4520_v2  ;;  %v3512_v27 = vcombine.high %v297_v17, %v301_v18 }
 0x169   :  { %2051 = vmatpush1.bf16.msra.mxu1 %v3431_v28  ;;  %2082 = vmatprep.mubr.bf16.mxu1 %v4503_v46  ;;  %v3447_v46 = vcombine.low %v233_v34, %v237_v35  ;;  %v3970_v28 = vld [vmem:[%s5589_s5 + $0x70] ss:$8 sps:$4 sm:$0xff]   ;;  %v3511_v34 = vcombine.low %v297_v17, %v301_v18 }
 0x16a   :  { %2036 = vmatpush1.bf16.msra.mxu0 %v3669_v29  ;;  %2052 = vmatprep.subr.bf16.mxu1 %v3440_v31  ;;  %v305_v29 = vld [vmem:[%s5587_s3 + $0x2d8] sm:$0xff] }
 0x16b   :  { %2037 = vmatprep.subr.bf16.mxu0 %v3678_v32  ;;  %v309_v31 = vld [vmem:[%s5587_s3 + $0x2f8] sm:$0xff]  ;;  %v3975_v32 = vld [vmem:[%s5589_s5 + $0x84] ss:$8 sps:$4 sm:$0xff]  }
 0x16c   :  { %v3520_v35 = vcombine.high %v305_v29, %v309_v31  ;;  %v3519_v40 = vcombine.low %v305_v29, %v309_v31  ;;  %v377_v18 = vld [vmem:[%s5587_s3 + $0x518] sm:$0xff] }
 0x16d   :  { %2053 = vmatpush1.bf16.msra.mxu1 %v3439_v36  ;;  %v3973_v36 = vld [vmem:[%s5589_s5 + $0x80] ss:$8 sps:$4 sm:$0xff]   ;;  %v389_v29 = vld [vmem:[%s5587_s3 + $0x578] sm:$0xff] }
 0x16e   :  { %2038 = vmatpush1.bf16.msra.mxu0 %v3677_v37  ;;  %2054 = vmatprep.subr.bf16.mxu1 %v3448_v38  ;;  %v313_v37 = vld [vmem:[%s5587_s3 + $0x318] sm:$0xff] }
 0x16f   :  { %2940 = vmatprep.subr.bf16.mxu0 %v3951_v41  ;;  %v317_v38 = vld [vmem:[%s5587_s3 + $0x338] sm:$0xff] }
 0x170   :  { %v3528_v41 = vcombine.high %v313_v37, %v317_v38  ;;  %v3527_v47 = vcombine.low %v313_v37, %v317_v38  ;;  %v5133_v38 = vld [vmem:[%s5590_s4] sm:$0xff] }
 0x171   :  { %2040 = vmatmul.mubr.bf16.vlgmr.msra.gmra.mrb[4].mxu0 %v4520_v2  ;;  %2055 = vmatpush1.bf16.msra.mxu1 %v3447_v46  ;;  %v3976_v46 = vld [vmem:[%s5589_s5 + $0x90] ss:$8 sps:$4 sm:$0xff]  }
 0x172   :  { %2056 = vmatprep.subr.bf16.mxu1 %v3456_v42  ;;  %2941 = vmatpush1.bf16.msra.mxu0 %v3949_v43  ;;  %v321_v42 = vld [vmem:[%s5587_s3 + $0x358] sm:$0xff] }
 0x173   :  { %2942 = vmatprep.subr.bf16.mxu0 %v3954_v48  ;;  %v325_v43 = vld [vmem:[%s5587_s3 + $0x378] sm:$0xff] }
 0x174   :  { %v3536_v48 = vcombine.high %v321_v42, %v325_v43  ;;  %v3535_v53 = vcombine.low %v321_v42, %v325_v43 }
 0x175   :  { %2057 = vmatpush1.bf16.msra.mxu1 %v3455_v49  ;;  %v3979_v49 = vld [vmem:[%s5589_s5 + $0xa0] ss:$8 sps:$4 sm:$0xff]  }
 0x176   :  { %2058 = vmatprep.subr.bf16.mxu1 %v3464_v50  ;;  %2943 = vmatpush1.bf16.msra.mxu0 %v3952_v51  ;;  %v329_v50 = vld [vmem:[%s5587_s3 + $0x398] sm:$0xff] }
 0x177   :  { %2944 = vmatprep.subr.bf16.mxu0 %v3957_v54  ;;  %v333_v51 = vld [vmem:[%s5587_s3 + $0x3b8] sm:$0xff] }
 0x178   :  { %v3544_v54 = vcombine.high %v329_v50, %v333_v51  ;;  %v3543_v59 = vcombine.low %v329_v50, %v333_v51  ;;  %v409_v50 = vld [vmem:[%s5587_s3 + $0x618] sm:$0xff] }
 0x179   :  { %2059 = vmatpush1.bf16.msra.mxu1 %v3463_v55  ;;  %v3982_v55 = vld [vmem:[%s5589_s5 + $0xb0] ss:$8 sps:$4 sm:$0xff]  }
 0x17a   :  { %2060 = vmatprep.subr.bf16.mxu1 %v3472_v56  ;;  %2945 = vmatpush1.bf16.msra.mxu0 %v3955_v57  ;;  %v337_v56 = vld [vmem:[%s5587_s3 + $0x3d8] sm:$0xff] }
 0x17b   :  { %2946 = vmatprep.subr.bf16.mxu0 %v3960_v60  ;;  %v341_v57 = vld [vmem:[%s5587_s3 + $0x3f8] sm:$0xff] }
 0x17c   :  { %v3552_v60 = vcombine.high %v337_v56, %v341_v57  ;;  %v3551_v1 = vcombine.low %v337_v56, %v341_v57  ;;  %v413_v51 = vld [vmem:[%s5587_s3 + $0x638] sm:$0xff] }
 0x17d   :  { %2061 = vmatpush1.bf16.msra.mxu1 %v3471_v61  ;;  %v3985_v61 = vld [vmem:[%s5589_s5 + $0xc0] ss:$8 sps:$4 sm:$0xff]   ;;  %v417_v57 = vld [vmem:[%s5587_s3 + $0x658] sm:$0xff] }
 0x17e   :  { %2062 = vmatprep.subr.bf16.mxu1 %v3480_v62  ;;  %2947 = vmatpush1.bf16.msra.mxu0 %v3958_v63  ;;  %v345_v62 = vld [vmem:[%s5587_s3 + $0x418] sm:$0xff] }
 0x17f   :  { %2948 = vmatprep.subr.bf16.mxu0 %v3963_v3  ;;  %v349_v63 = vld [vmem:[%s5587_s3 + $0x438] sm:$0xff] }
 0x180   :  { %v3560_v3 = vcombine.high %v345_v62, %v349_v63  ;;  %v3559_v9 = vcombine.low %v345_v62, %v349_v63 }
 0x181   :  { %2063 = vmatpush1.bf16.msra.mxu1 %v3479_v4  ;;  %v3988_v4 = vld [vmem:[%s5589_s5 + $0xd0] ss:$8 sps:$4 sm:$0xff]  }
 0x182   :  { %2064 = vmatprep.subr.bf16.mxu1 %v3488_v6  ;;  %2949 = vmatpush1.bf16.msra.mxu0 %v3961_v7  ;;  %v353_v6 = vld [vmem:[%s5587_s3 + $0x458] sm:$0xff] }
 0x183   :  { %2950 = vmatprep.subr.bf16.mxu0 %v3966_v10  ;;  %v357_v7 = vld [vmem:[%s5587_s3 + $0x478] sm:$0xff] }
 0x184   :  { %v3568_v10 = vcombine.high %v353_v6, %v357_v7  ;;  %v3567_v15 = vcombine.low %v353_v6, %v357_v7 }
 0x185   :  { %2065 = vmatpush1.bf16.msra.mxu1 %v3487_v11  ;;  %v3991_v11 = vld [vmem:[%s5589_s5 + $0xe0] ss:$8 sps:$4 sm:$0xff]  }
 0x186   :  { %2066 = vmatprep.subr.bf16.mxu1 %v3496_v12  ;;  %2951 = vmatpush1.bf16.msra.mxu0 %v3964_v13  ;;  %v361_v12 = vld [vmem:[%s5587_s3 + $0x498] sm:$0xff] }
 0x187   :  { %2952 = vmatprep.subr.bf16.mxu0 %v3969_v19  ;;  %v365_v13 = vld [vmem:[%s5587_s3 + $0x4b8] sm:$0xff] }
 0x188   :  { %v3576_v19 = vcombine.high %v361_v12, %v365_v13 }
 0x189   :  { %2067 = vmatpush1.bf16.msra.mxu1 %v3495_v20  ;;  %v3994_v20 = vld [vmem:[%s5589_s5 + $0xf0] ss:$8 sps:$4 sm:$0xff]  }
 0x18a   :  { %2068 = vmatprep.subr.bf16.mxu1 %v3504_v23  ;;  %2953 = vmatpush1.bf16.msra.mxu0 %v3967_v16  ;;  %v369_v23 = vld [vmem:[%s5587_s3 + $0x4d8] sm:$0xff] }
 0x18b   :  { %2954 = vmatprep.subr.bf16.mxu0 %v3972_v25  ;;  %v373_v16 = vld [vmem:[%s5587_s3 + $0x4f8] sm:$0xff] }
 0x18c   :  { %v3584_v17 = vcombine.high %v369_v23, %v373_v16  ;;  %v381_v25 = vld [vmem:[%s5587_s3 + $0x538] sm:$0xff] }
 0x18d   :  { %2069 = vmatpush1.bf16.msra.mxu1 %v3503_v26  ;;  %v3583_v26 = vcombine.low %v369_v23, %v373_v16  ;;  %v3591_v31 = vcombine.low %v377_v18, %v381_v25  ;;  %v433_v23 = vld [vmem:[%s5587_s3 + $0x6d8] sm:$0xff] }
 0x18e   :  { %2070 = vmatprep.subr.bf16.mxu1 %v3512_v27  ;;  %2955 = vmatpush1.bf16.msra.mxu0 %v3970_v28  ;;  %v3592_v27 = vcombine.high %v377_v18, %v381_v25  ;;  %v385_v28 = vld [vmem:[%s5587_s3 + $0x558] sm:$0xff] }
 0x18f   :  { %2956 = vmatprep.subr.bf16.mxu0 %v3975_v32  ;;  %v3600_v32 = vcombine.high %v385_v28, %v389_v29  ;;  %v437_v16 = vld [vmem:[%s5587_s3 + $0x6f8] sm:$0xff] }
 0x190   :  { %v3648_v18 = vcombine.high %v433_v23, %v437_v16  ;;  %v441_v25 = vld [vmem:[%s5587_s3 + $0x718] sm:$0xff] }
 0x191   :  { %2071 = vmatpush1.bf16.msra.mxu1 %v3511_v34  ;;  %v393_v34 = vld [vmem:[%s5587_s3 + $0x598] sm:$0xff] }
 0x192   :  { %2072 = vmatprep.subr.bf16.mxu1 %v3520_v35  ;;  %2957 = vmatpush1.bf16.msra.mxu0 %v3973_v36  ;;  %v397_v35 = vld [vmem:[%s5587_s3 + $0x5b8] sm:$0xff]  ;;  %v3599_v36 = vcombine.low %v385_v28, %v389_v29  ;;  %v4005_v28 = vld [vmem:[%s5589_s5 + $0x124] ss:$8 sps:$4 sm:$0xff]   ;;  %v3647_v29 = vcombine.low %v433_v23, %v437_v16 }
 0x193   :  { %2958 = vmatprep.subr.bf16.mxu0 %v3978_v39  ;;  %v3608_v37 = vcombine.high %v393_v34, %v397_v35  ;;  %v3607_v43 = vcombine.low %v393_v34, %v397_v35  ;;  %v453_v34 = vld [vmem:[%s5587_s3 + $0x778] sm:$0xff]  ;;  %v4003_v35 = vld [vmem:[%s5589_s5 + $0x120] ss:$8 sps:$4 sm:$0xff]  }
 0x195   :  { %2073 = vmatpush1.bf16.msra.mxu1 %v3519_v40  ;;  %v401_v40 = vld [vmem:[%s5587_s3 + $0x5d8] sm:$0xff] }
 0x196   :  { %2074 = vmatprep.subr.bf16.mxu1 %v3528_v41  ;;  %2959 = vmatpush1.bf16.msra.mxu0 %v3976_v46  ;;  %v405_v41 = vld [vmem:[%s5587_s3 + $0x5f8] sm:$0xff] }
 0x197   :  { %2960 = vmatprep.subr.bf16.mxu0 %v3981_v44  ;;  %v475_v44 = vrot.slane %v5133_v38, %v4479_v22 }
 0x199   :  { %2075 = vmatpush1.bf16.msra.mxu1 %v3527_v47 }
 0x19a   :  { %2076 = vmatprep.subr.bf16.mxu1 %v3536_v48  ;;  %2961 = vmatpush1.bf16.msra.mxu0 %v3979_v49  ;;  %v3616_v48 = vcombine.high %v401_v40, %v405_v41  ;;  %v479_v49 = vrot.slane %v5133_v38, %v4485_v24 }
 0x19b   :  { %2962 = vmatprep.subr.bf16.mxu0 %v3984_v52  ;;  %v3615_v52 = vcombine.low %v401_v40, %v405_v41  ;;  %v457_v40 = vld [vmem:[%s5587_s3 + $0x798] sm:$0xff] }
 0x19c   :  { %v461_v41 = vld [vmem:[%s5587_s3 + $0x7b8] sm:$0xff] }
 0x19d   :  { %2077 = vmatpush1.bf16.msra.mxu1 %v3535_v53 }
 0x19e   :  { %2078 = vmatprep.subr.bf16.mxu1 %v3544_v54  ;;  %2963 = vmatpush1.bf16.msra.mxu0 %v3982_v55  ;;  %v3624_v54 = vcombine.high %v409_v50, %v413_v51 }
 0x19f   :  { %2964 = vmatprep.subr.bf16.mxu0 %v3987_v58  ;;  %v421_v58 = vld [vmem:[%s5587_s3 + $0x678] sm:$0xff] }
 0x1a0   :  { %v3632_v6 = vcombine.high %v417_v57, %v421_v58 }
 0x1a1   :  { %2079 = vmatpush1.bf16.msra.mxu1 %v3543_v59 }
 0x1a2   :  { %2080 = vmatprep.subr.bf16.mxu1 %v3552_v60  ;;  %2965 = vmatpush1.bf16.msra.mxu0 %v3985_v61 }
 0x1a3   :  { %2966 = vmatprep.subr.bf16.mxu0 %v3990_v0 }
 0x1a5   :  { %2081 = vmatpush1.bf16.msra.mxu1 %v3551_v1  ;;  %v3623_v1 = vcombine.low %v409_v50, %v413_v51  ;;  %v4014_v50 = vld [vmem:[%s5589_s5 + $0x154] ss:$8 sps:$4 sm:$0xff]   ;;  %v3671_v51 = vcombine.low %v457_v40, %v461_v41 }
 0x1a6   :  { %2093 = vmatprep.subr.bf16.mxu1 %v3560_v3  ;;  %2967 = vmatpush1.bf16.msra.mxu0 %v3988_v4 }
 0x1a7   :  { %2968 = vmatprep.subr.bf16.mxu0 %v3993_v8  ;;  %v425_v8 = vld [vmem:[%s5587_s3 + $0x698] sm:$0xff] }
 0x1a8   :  { %2083 = vmatmul.mubr.bf16.vlgmr.msra.gmra.mrb[16].mxu1 %v4501_v45  ;;  %v3999_v45 = vld [vmem:[%s5589_s5 + $0x104] ss:$8 sps:$4 sm:$0xff]  }
 0x1a9   :  { %2094 = vmatpush1.bf16.msra.mxu1 %v3559_v9  ;;  %2125 = vmatprep.mubr.bf16.mxu1 %v4528_v5  ;;  %v3575_v5 = vcombine.low %v361_v12, %v365_v13  ;;  %v429_v9 = vld [vmem:[%s5587_s3 + $0x6b8] sm:$0xff] }
 0x1aa   :  { %2095 = vmatprep.subr.bf16.mxu1 %v3568_v10  ;;  %2969 = vmatpush1.bf16.msra.mxu0 %v3991_v11 }
 0x1ab   :  { %2970 = vmatprep.subr.bf16.mxu0 %v3996_v14  ;;  %v3631_v14 = vcombine.low %v417_v57, %v421_v58  ;;  %v4020_v57 = vld [vmem:[%s5589_s5 + $0x174] ss:$8 sps:$4 sm:$0xff]   ;;  %v4018_v58 = vld [vmem:[%s5589_s5 + $0x170] ss:$8 sps:$4 sm:$0xff]  }
 0x1ad   :  { %2096 = vmatpush1.bf16.msra.mxu1 %v3567_v15 }
 0x1ae   :  { %2097 = vmatprep.subr.bf16.mxu1 %v3576_v19  ;;  %2971 = vmatpush1.bf16.msra.mxu0 %v3994_v20  ;;  %v3640_v19 = vcombine.high %v425_v8, %v429_v9 }
 0x1af   :  { %2983 = vmatprep.subr.bf16.mxu0 %v3999_v45  ;;  %v3997_v45 = vld [vmem:[%s5589_s5 + $0x100] ss:$8 sps:$4 sm:$0xff]  }
 0x1b1   :  { %2098 = vmatpush1.bf16.msra.mxu1 %v3575_v5  ;;  %v4002_v5 = vld [vmem:[%s5589_s5 + $0x114] ss:$8 sps:$4 sm:$0xff]  }
 0x1b2   :  { %2099 = vmatprep.subr.bf16.mxu1 %v3584_v17  ;;  %v3639_v17 = vcombine.low %v425_v8, %v429_v9  ;;  %v4041_v8 = vld [vmem:[%s5589_s5 + $0x1e4] ss:$8 sps:$4 sm:$0xff]   ;;  %v4039_v9 = vld [vmem:[%s5589_s5 + $0x1e0] ss:$8 sps:$4 sm:$0xff]  }
 0x1b5   :  { %2100 = vmatpush1.bf16.msra.mxu1 %v3583_v26  ;;  %v445_v26 = vld [vmem:[%s5587_s3 + $0x738] sm:$0xff] }
 0x1b6   :  { %2101 = vmatprep.subr.bf16.mxu1 %v3592_v27  ;;  %v4000_v27 = vld [vmem:[%s5589_s5 + $0x110] ss:$8 sps:$4 sm:$0xff]  }
 0x1b9   :  { %2102 = vmatpush1.bf16.msra.mxu1 %v3591_v31  ;;  %v3656_v31 = vcombine.high %v441_v25, %v445_v26 }
 0x1ba   :  { %2103 = vmatprep.subr.bf16.mxu1 %v3600_v32  ;;  %v449_v32 = vld [vmem:[%s5587_s3 + $0x758] sm:$0xff] }
 0x1bb   :  { %v1826_v39 = vpop.f32.mrb[8].mxu1 }
 0x1bc   :  { %v1828_v46 = vpop.f32.mrb[9].mxu1  ;;  %v1827_v53 = vadd.f32 %v1826_v39, %v475_v44  ;;  %v3664_v39 = vcombine.high %v449_v32, %v453_v34 }
 0x1bd   :  { %2104 = vmatpush1.bf16.msra.mxu1 %v3599_v36  ;;  %v1830_v42 = vpop.f32.mrb[10].mxu1  ;;  %v1829_v55 = vadd.f32 %v1828_v46, %v479_v49  ;;  %v4008_v36 = vld [vmem:[%s5589_s5 + $0x134] ss:$8 sps:$4 sm:$0xff]   ;;  %v4006_v46 = vld [vmem:[%s5589_s5 + $0x130] ss:$8 sps:$4 sm:$0xff]  }
 0x1be   :  { %v1832_v47 = vpop.f32.mrb[11].mxu1  ;;  %2105 = vmatprep.subr.bf16.mxu1 %v3608_v37  ;;  %v1831_v59 = vadd.f32 %v1830_v42, %v475_v44  ;;  %v3655_v37 = vcombine.low %v441_v25, %v445_v26  ;;  %v4011_v42 = vld [vmem:[%s5589_s5 + $0x144] ss:$8 sps:$4 sm:$0xff]   ;;  %v3672_v44 = vcombine.high %v457_v40, %v461_v41 }
 0x1bf   :  { %v1833_v62 = vadd.f32 %v1832_v47, %v479_v49  ;;  %v465_v47 = vld [vmem:[%s5587_s3 + $0x7d8] sm:$0xff]  ;;  %v4009_v49 = vld [vmem:[%s5589_s5 + $0x140] ss:$8 sps:$4 sm:$0xff]  }
 0x1c1   :  { %2106 = vmatpush1.bf16.msra.mxu1 %v3607_v43  ;;  %v3663_v43 = vcombine.low %v449_v32, %v453_v34  ;;  %v4045_v34 = vld [vmem:[%s5589_s5 + $0x200] ss:$8 sps:$4 sm:$0xff]  }
 0x1c2   :  { %2107 = vmatprep.subr.bf16.mxu1 %v3616_v48  ;;  %v469_v48 = vld [vmem:[%s5587_s3 + $0x7f8] sm:$0xff] }
 0x1c3   :  { %v1869_v56 = vpop.f32.mrb[0].mxu0 }
 0x1c4   :  { %v1870_v60 = vadd.f32 %v1869_v56, %v1827_v53  ;;  %v1871_v61 = vpop.f32.mrb[1].mxu0  ;;  %v4012_v53 = vld [vmem:[%s5589_s5 + $0x150] ss:$8 sps:$4 sm:$0xff]   ;;  %v4015_v56 = vld [vmem:[%s5589_s5 + $0x160] ss:$8 sps:$4 sm:$0xff]  }
 0x1c5   :  { %v1872_v63 = vadd.f32 %v1871_v61, %v1829_v55  ;;  %2108 = vmatpush1.bf16.msra.mxu1 %v3615_v52  ;;  %v1873_v0 = vpop.f32.mrb[2].mxu0  ;;  %v3680_v52 = vcombine.high %v465_v47, %v469_v48  ;;  %v3679_v55 = vcombine.low %v465_v47, %v469_v48  ;;  %v4026_v61 = vld [vmem:[%s5589_s5 + $0x194] ss:$8 sps:$4 sm:$0xff]  }
 0x1c6   :  { %v1874_v3 = vadd.f32 %v1873_v0, %v1831_v59  ;;  %v1875_v4 = vpop.f32.mrb[3].mxu0  ;;  %2109 = vmatprep.subr.bf16.mxu1 %v3624_v54  ;;  %v2136_v10 = vmax.f32 %v1870_v60, 0.0  ;;  %v4017_v54 = vld [vmem:[%s5589_s5 + $0x164] ss:$8 sps:$4 sm:$0xff]   ;;  %v4021_v60 = vld [vmem:[%s5589_s5 + $0x180] ss:$8 sps:$4 sm:$0xff]  }
 0x1c7   :  { %v1876_v7 = vadd.f32 %v1875_v4, %v1833_v62  ;;  %v2137_v12 = vmax.f32 %v1872_v63, 0.0  ;;  %v4023_v59 = vld [vmem:[%s5589_s5 + $0x184] ss:$8 sps:$4 sm:$0xff]   ;;  %v4027_v63 = vld [vmem:[%s5589_s5 + $0x1a0] ss:$8 sps:$4 sm:$0xff]  }
 0x1c8   :  { %v2144_v11 = vmax.f32 %v1874_v3, 0.0  ;;  %v4029_v62 = vld [vmem:[%s5589_s5 + $0x1a4] ss:$8 sps:$4 sm:$0xff]   ;;  %v4032_v0 = vld [vmem:[%s5589_s5 + $0x1b4] ss:$8 sps:$4 sm:$0xff]  }
 0x1c9   :  { %v2145_v13 = vmax.f32 %v1876_v7, 0.0  ;;  %2110 = vmatpush1.bf16.msra.mxu1 %v3623_v1  ;;  %v4030_v1 = vld [vmem:[%s5589_s5 + $0x1b0] ss:$8 sps:$4 sm:$0xff]   ;;  %v4035_v3 = vld [vmem:[%s5589_s5 + $0x1c4] ss:$8 sps:$4 sm:$0xff]  }
 0x1ca   :  { %v2152_v15 = vpack.c.bf16 %v2144_v11, %v2136_v10  ;;  %2111 = vmatprep.subr.bf16.mxu1 %v3632_v6  ;;  %v4033_v4 = vld [vmem:[%s5589_s5 + $0x1c0] ss:$8 sps:$4 sm:$0xff]   ;;  %v4038_v6 = vld [vmem:[%s5589_s5 + $0x1d4] ss:$8 sps:$4 sm:$0xff]   ;;  %v4036_v7 = vld [vmem:[%s5589_s5 + $0x1d0] ss:$8 sps:$4 sm:$0xff]  }
 0x1cb   :  { %v2153_v20 = vpack.c.bf16 %v2145_v13, %v2137_v12  ;;  %v4044_v10 = vld [vmem:[%s5589_s5 + $0x1f4] ss:$8 sps:$4 sm:$0xff]   ;;  %v4042_v11 = vld [vmem:[%s5589_s5 + $0x1f0] ss:$8 sps:$4 sm:$0xff]   ;;  %v4047_v12 = vld [vmem:[%s5589_s5 + $0x204] ss:$8 sps:$4 sm:$0xff]   ;;  %v483_v13 = vrot.slane %v5133_v38, %v62_v30 }
 0x1cd   :  { %2112 = vmatpush1.bf16.msra.mxu1 %v3631_v14  ;;  %2972 = vmatprep.mubr.bf16.mxu0 %v2153_v20  ;;  %v487_v14 = vrot.slane %v5133_v38, %v66_v33 }
 0x1ce   :  { %2973 = vmatmul.mubr.bf16.vlgmr.msra.gmra.mrb[8].mxu0 %v2152_v15  ;;  %2113 = vmatprep.subr.bf16.mxu1 %v3640_v19 }
 0x1cf   :  { %2984 = vmatpush1.bf16.msra.mxu0 %v3997_v45  ;;  %v490_v45 = vsub.s32 4, %v4476_v21 }
 0x1d0   :  { %2985 = vmatprep.subr.bf16.mxu0 %v4002_v5 }
 0x1d1   :  { %2114 = vmatpush1.bf16.msra.mxu1 %v3639_v17 }
 0x1d2   :  { %2115 = vmatprep.subr.bf16.mxu1 %v3648_v18  ;;  %v494_v18 = vsub.s32 5, %v4476_v21 }
 0x1d3   :  { %2986 = vmatpush1.bf16.msra.mxu0 %v4000_v27 }
 0x1d4   :  { %2987 = vmatprep.subr.bf16.mxu0 %v4005_v28  ;;  %v495_v33 = vrot.slane %v5133_v38, %v494_v18  ;;  %v4086_v18 = vld [vmem:[%s5589_s5 + $0x2d4] ss:$8 sps:$4 sm:$0xff]  }
 0x1d5   :  { %2116 = vmatpush1.bf16.msra.mxu1 %v3647_v29  ;;  %v491_v29 = vrot.slane %v5133_v38, %v490_v45  ;;  %v4078_v45 = vld [vmem:[%s5589_s5 + $0x2b0] ss:$8 sps:$4 sm:$0xff]  }
 0x1d6   :  { %2117 = vmatprep.subr.bf16.mxu1 %v3656_v31 }
 0x1d7   :  { %2988 = vmatpush1.bf16.msra.mxu0 %v4003_v35 }
 0x1d8   :  { %2989 = vmatprep.subr.bf16.mxu0 %v4008_v36  ;;  %v4050_v36 = vld [vmem:[%s5589_s5 + $0x214] ss:$8 sps:$4 sm:$0xff]  }
 0x1d9   :  { %2118 = vmatpush1.bf16.msra.mxu1 %v3655_v37 }
 0x1da   :  { %2119 = vmatprep.subr.bf16.mxu1 %v3664_v39 }
 0x1db   :  { %2990 = vmatpush1.bf16.msra.mxu0 %v4006_v46  ;;  %v4048_v46 = vld [vmem:[%s5589_s5 + $0x210] ss:$8 sps:$4 sm:$0xff]  }
 0x1dc   :  { %2991 = vmatprep.subr.bf16.mxu0 %v4011_v42  ;;  %v4053_v42 = vld [vmem:[%s5589_s5 + $0x224] ss:$8 sps:$4 sm:$0xff]  }
 0x1dd   :  { %2120 = vmatpush1.bf16.msra.mxu1 %v3663_v43 }
 0x1de   :  { %2121 = vmatprep.subr.bf16.mxu1 %v3672_v44 }
 0x1df   :  { %2992 = vmatpush1.bf16.msra.mxu0 %v4009_v49 }
 0x1e0   :  { %2993 = vmatprep.subr.bf16.mxu0 %v4014_v50  ;;  %v4141_v50 = vld [vmem:[%s5591_s7 + $0x40] sm:$0xff]  }
 0x1e1   :  { %2122 = vmatpush1.bf16.msra.mxu1 %v3671_v51 }
 0x1e2   :  { %2123 = vmatprep.subr.bf16.mxu1 %v3680_v52  ;;  %v4051_v52 = vld [vmem:[%s5589_s5 + $0x220] ss:$8 sps:$4 sm:$0xff]  }
 0x1e3   :  { %2994 = vmatpush1.bf16.msra.mxu0 %v4012_v53  ;;  %v4142_v53 = vld [vmem:[%s5591_s7] sm:$0xff]  }
 0x1e4   :  { %2995 = vmatprep.subr.bf16.mxu0 %v4017_v54 }
 0x1e5   :  { %2124 = vmatpush1.bf16.msra.mxu1 %v3679_v55  ;;  %v4056_v55 = vld [vmem:[%s5589_s5 + $0x234] ss:$8 sps:$4 sm:$0xff]  }
 0x1e6   :  { %3835 = vmatprep.subr.bf16.mxu1 %v4141_v50  ;;  %v4122_v50 = vld [vmem:[%s5589_s5 + $0x394] ss:$8 sps:$4 sm:$0xff]  }
 0x1e7   :  { %2996 = vmatpush1.bf16.msra.mxu0 %v4015_v56  ;;  %v4143_v56 = vld [vmem:[%s5591_s7 + $0x48] sm:$0xff]  }
 0x1e8   :  { %2126 = vmatmul.mubr.bf16.vlgmr.msra.gmra.mrb[16].mxu1 %v4520_v2  ;;  %2997 = vmatprep.subr.bf16.mxu0 %v4020_v57  ;;  %v4024_v2 = vld [vmem:[%s5589_s5 + $0x190] ss:$8 sps:$4 sm:$0xff]  }
 0x1e9   :  { %3836 = vmatpush3.bf16.msra.mxu1 %v4142_v53  ;;  %v4123_v53 = vld [vmem:[%s5589_s5 + $0x3a0] ss:$8 sps:$4 sm:$0xff]  }
 0x1ea   :  { %3837 = vmatprep.subr.bf16.mxu1 %v4143_v56  ;;  %v4131_v56 = vld [vmem:[%s5589_s5 + $0x3c4] ss:$8 sps:$4 sm:$0xff]  }
 0x1eb   :  { %2998 = vmatpush1.bf16.msra.mxu0 %v4018_v58  ;;  %v4144_v58 = vld [vmem:[%s5591_s7 + $0x8] sm:$0xff]  }
 0x1ec   :  { %2999 = vmatprep.subr.bf16.mxu0 %v4023_v59 }
 0x1ed   :  { %3838 = vmatpush3.bf16.msra.mxu1 %v4144_v58  ;;  %v4134_v58 = vld [vmem:[%s5589_s5 + $0x3d4] ss:$8 sps:$4 sm:$0xff]  }
 0x1ef   :  { %3000 = vmatpush1.bf16.msra.mxu0 %v4021_v60  ;;  %v4145_v60 = vld [vmem:[%s5591_s7 + $0x50] sm:$0xff]  }
 0x1f0   :  { %3001 = vmatprep.subr.bf16.mxu0 %v4026_v61  ;;  %v4054_v61 = vld [vmem:[%s5589_s5 + $0x230] ss:$8 sps:$4 sm:$0xff]   ;;  %3839 = vmatprep.subr.bf16.mxu1 %v4145_v60  ;;  %v502_v60 = vsub.s32 7, %v4476_v21 }
 0x1f3   :  { %3002 = vmatpush1.bf16.msra.mxu0 %v4024_v2  ;;  %v4059_v2 = vld [vmem:[%s5589_s5 + $0x244] ss:$8 sps:$4 sm:$0xff]  }
 0x1f4   :  { %3003 = vmatprep.subr.bf16.mxu0 %v4029_v62  ;;  %v4146_v62 = vld [vmem:[%s5591_s7 + $0x10] sm:$0xff]  }
 0x1f5   :  { %3840 = vmatpush3.bf16.msra.mxu1 %v4146_v62  ;;  %v4137_v62 = vld [vmem:[%s5589_s5 + $0x3e4] ss:$8 sps:$4 sm:$0xff]  }
 0x1f7   :  { %3004 = vmatpush1.bf16.msra.mxu0 %v4027_v63  ;;  %v4147_v63 = vld [vmem:[%s5591_s7 + $0x58] sm:$0xff]  }
 0x1f8   :  { %3005 = vmatprep.subr.bf16.mxu0 %v4032_v0  ;;  %v4057_v0 = vld [vmem:[%s5589_s5 + $0x240] ss:$8 sps:$4 sm:$0xff]   ;;  %3841 = vmatprep.subr.bf16.mxu1 %v4147_v63  ;;  %v503_v63 = vrot.slane %v5133_v38, %v502_v60 }
 0x1fb   :  { %3006 = vmatpush1.bf16.msra.mxu0 %v4030_v1  ;;  %v4062_v1 = vld [vmem:[%s5589_s5 + $0x254] ss:$8 sps:$4 sm:$0xff]  }
 0x1fc   :  { %3007 = vmatprep.subr.bf16.mxu0 %v4035_v3  ;;  %v4148_v3 = vld [vmem:[%s5591_s7 + $0x18] sm:$0xff]  }
 0x1fd   :  { %3842 = vmatpush3.bf16.msra.mxu1 %v4148_v3 }
 0x1ff   :  { %3008 = vmatpush1.bf16.msra.mxu0 %v4033_v4  ;;  %v4149_v4 = vld [vmem:[%s5591_s7 + $0x60] sm:$0xff]  }
 0x200   :  { %3009 = vmatprep.subr.bf16.mxu0 %v4038_v6  ;;  %v4060_v6 = vld [vmem:[%s5589_s5 + $0x250] ss:$8 sps:$4 sm:$0xff]   ;;  %3843 = vmatprep.subr.bf16.mxu1 %v4149_v4  ;;  %v4140_v4 = vld [vmem:[%s5589_s5 + $0x3f4] ss:$8 sps:$4 sm:$0xff]  }
 0x203   :  { %3010 = vmatpush1.bf16.msra.mxu0 %v4036_v7  ;;  %v4150_v7 = vld [vmem:[%s5591_s7 + $0x20] sm:$0xff]  }
 0x204   :  { %3011 = vmatprep.subr.bf16.mxu0 %v4041_v8  ;;  %v4065_v8 = vld [vmem:[%s5589_s5 + $0x264] ss:$8 sps:$4 sm:$0xff]   ;;  %3844 = vmatpush3.bf16.msra.mxu1 %v4150_v7 }
 0x207   :  { %3012 = vmatpush1.bf16.msra.mxu0 %v4039_v9  ;;  %v4151_v9 = vld [vmem:[%s5591_s7 + $0x68] sm:$0xff]  }
 0x208   :  { %3013 = vmatprep.subr.bf16.mxu0 %v4044_v10  ;;  %v4063_v10 = vld [vmem:[%s5589_s5 + $0x260] ss:$8 sps:$4 sm:$0xff]   ;;  %3845 = vmatprep.subr.bf16.mxu1 %v4151_v9 }
 0x20b   :  { %3014 = vmatpush1.bf16.msra.mxu0 %v4042_v11  ;;  %v4068_v11 = vld [vmem:[%s5589_s5 + $0x274] ss:$8 sps:$4 sm:$0xff]  }
 0x20c   :  { %3026 = vmatprep.subr.bf16.mxu0 %v4047_v12  ;;  %v4066_v12 = vld [vmem:[%s5589_s5 + $0x270] ss:$8 sps:$4 sm:$0xff]  }
 0x23b   :  { %v1955_v15 = vpop.f32.mrb[12].mxu1 }
 0x23c   :  { %v3894_v19 = vadd.f32 %v1955_v15, %v483_v13  ;;  %v1957_v20 = vpop.f32.mrb[13].mxu1  ;;  %v4074_v15 = vld [vmem:[%s5589_s5 + $0x294] ss:$8 sps:$4 sm:$0xff]  }
 0x23d   :  { %v3895_v23 = vadd.f32 %v1957_v20, %v487_v14  ;;  %v1959_v16 = vpop.f32.mrb[14].mxu1  ;;  %v4077_v20 = vld [vmem:[%s5589_s5 + $0x2a4] ss:$8 sps:$4 sm:$0xff]  }
 0x23e   :  { %v3896_v5 = vadd.f32 %v1959_v16, %v483_v13  ;;  %v1961_v17 = vpop.f32.mrb[15].mxu1  ;;  %v2138_v26 = vmax.f32 %v3894_v19, 0.0  ;;  %v4071_v13 = vld [vmem:[%s5589_s5 + $0x284] ss:$8 sps:$4 sm:$0xff]   ;;  %v4072_v19 = vld [vmem:[%s5589_s5 + $0x290] ss:$8 sps:$4 sm:$0xff]  }
 0x23f   :  { %v3897_v25 = vadd.f32 %v1961_v17, %v487_v14  ;;  %v2139_v28 = vmax.f32 %v3895_v23, 0.0  ;;  %v4069_v14 = vld [vmem:[%s5589_s5 + $0x280] ss:$8 sps:$4 sm:$0xff]   ;;  %v4080_v16 = vld [vmem:[%s5589_s5 + $0x2b4] ss:$8 sps:$4 sm:$0xff]  }
 0x240   :  { %v2146_v27 = vmax.f32 %v3896_v5, 0.0  ;;  %v4075_v23 = vld [vmem:[%s5589_s5 + $0x2a0] ss:$8 sps:$4 sm:$0xff]   ;;  %v4083_v5 = vld [vmem:[%s5589_s5 + $0x2c4] ss:$8 sps:$4 sm:$0xff]  }
 0x241   :  { %v2147_v30 = vmax.f32 %v3897_v25, 0.0  ;;  %v4081_v17 = vld [vmem:[%s5589_s5 + $0x2c0] ss:$8 sps:$4 sm:$0xff]   ;;  %v4084_v25 = vld [vmem:[%s5589_s5 + $0x2d0] ss:$8 sps:$4 sm:$0xff]  }
 0x242   :  { %v2154_v31 = vpack.c.bf16 %v2146_v27, %v2138_v26  ;;  %v4089_v26 = vld [vmem:[%s5589_s5 + $0x2e4] ss:$8 sps:$4 sm:$0xff]   ;;  %v4087_v27 = vld [vmem:[%s5589_s5 + $0x2e0] ss:$8 sps:$4 sm:$0xff]  }
 0x243   :  { %v2155_v32 = vpack.c.bf16 %v2147_v30, %v2139_v28  ;;  %v4092_v28 = vld [vmem:[%s5589_s5 + $0x2f4] ss:$8 sps:$4 sm:$0xff]   ;;  %v4090_v30 = vld [vmem:[%s5589_s5 + $0x2f0] ss:$8 sps:$4 sm:$0xff]  }
 0x244   :  { %v2041_v35 = vpop.f32.mrb[4].mxu0 }
 0x245   :  { %v3898_v37 = vadd.f32 %v2041_v35, %v491_v29  ;;  %v2043_v39 = vpop.f32.mrb[5].mxu0  ;;  %3015 = vmatprep.mubr.bf16.mxu0 %v2155_v32  ;;  %v4096_v32 = vld [vmem:[%s5589_s5 + $0x310] ss:$8 sps:$4 sm:$0xff]   ;;  %v4099_v35 = vld [vmem:[%s5589_s5 + $0x320] ss:$8 sps:$4 sm:$0xff]  }
 0x246   :  { %v3899_v40 = vadd.f32 %v2043_v39, %v495_v33  ;;  %v2045_v41 = vpop.f32.mrb[6].mxu0  ;;  %3016 = vmatmul.mubr.bf16.vlgmr.msra.gmra.mrb[8].mxu0 %v2154_v31  ;;  %v4093_v31 = vld [vmem:[%s5589_s5 + $0x300] ss:$8 sps:$4 sm:$0xff]   ;;  %v4107_v39 = vld [vmem:[%s5589_s5 + $0x344] ss:$8 sps:$4 sm:$0xff]  }
 0x247   :  { %v2140_v43 = vmax.f32 %v3898_v37, 0.0  ;;  %v3900_v44 = vadd.f32 %v2045_v41, %v491_v29  ;;  %v2047_v47 = vpop.f32.mrb[7].mxu0  ;;  %3027 = vmatpush1.bf16.msra.mxu0 %v4045_v34  ;;  %v4095_v29 = vld [vmem:[%s5589_s5 + $0x304] ss:$8 sps:$4 sm:$0xff]   ;;  %v4102_v37 = vld [vmem:[%s5589_s5 + $0x330] ss:$8 sps:$4 sm:$0xff]  }
 0x248   :  { %v2141_v48 = vmax.f32 %v3899_v40, 0.0  ;;  %v3901_v49 = vadd.f32 %v2047_v47, %v495_v33  ;;  %3028 = vmatprep.subr.bf16.mxu0 %v4050_v36  ;;  %v4098_v33 = vld [vmem:[%s5589_s5 + $0x314] ss:$8 sps:$4 sm:$0xff]   ;;  %v4101_v34 = vld [vmem:[%s5589_s5 + $0x324] ss:$8 sps:$4 sm:$0xff]  }
 0x249   :  { %v2148_v51 = vmax.f32 %v3900_v44, 0.0  ;;  %v4104_v36 = vld [vmem:[%s5589_s5 + $0x334] ss:$8 sps:$4 sm:$0xff]   ;;  %v4105_v40 = vld [vmem:[%s5589_s5 + $0x340] ss:$8 sps:$4 sm:$0xff]  }
 0x24a   :  { %v2149_v54 = vmax.f32 %v3901_v49, 0.0  ;;  %v4110_v41 = vld [vmem:[%s5589_s5 + $0x354] ss:$8 sps:$4 sm:$0xff]   ;;  %v4114_v47 = vld [vmem:[%s5589_s5 + $0x370] ss:$8 sps:$4 sm:$0xff]  }
 0x24b   :  { %v5327_v57 = vpack.c.bf16 %v2148_v51, %v2140_v43  ;;  %3029 = vmatpush1.bf16.msra.mxu0 %v4048_v46  ;;  %v4108_v46 = vld [vmem:[%s5589_s5 + $0x350] ss:$8 sps:$4 sm:$0xff]   ;;  %v4111_v43 = vld [vmem:[%s5589_s5 + $0x360] ss:$8 sps:$4 sm:$0xff]   ;;  %v4116_v44 = vld [vmem:[%s5589_s5 + $0x374] ss:$8 sps:$4 sm:$0xff]  }
 0x24c   :  { %v2157_v59 = vpack.c.bf16 %v2149_v54, %v2141_v48  ;;  %3030 = vmatprep.subr.bf16.mxu0 %v4053_v42  ;;  %v4113_v42 = vld [vmem:[%s5589_s5 + $0x364] ss:$8 sps:$4 sm:$0xff]   ;;  %v4117_v49 = vld [vmem:[%s5589_s5 + $0x380] ss:$8 sps:$4 sm:$0xff]   ;;  %v4120_v51 = vld [vmem:[%s5589_s5 + $0x390] ss:$8 sps:$4 sm:$0xff]  }
 0x24d   :  { %v4119_v48 = vld [vmem:[%s5589_s5 + $0x384] ss:$8 sps:$4 sm:$0xff]   ;;  %v4128_v54 = vld [vmem:[%s5589_s5 + $0x3b4] ss:$8 sps:$4 sm:$0xff]  }
 0x24e   :  { %3058 = vmatprep.mubr.bf16.mxu0 %v2157_v59  ;;  %v498_v59 = vsub.s32 6, %v4476_v21  ;;  %v4135_v21 = vld [vmem:[%s5589_s5 + $0x3e0] ss:$8 sps:$4 sm:$0xff]  }
 0x24f   :  { %3031 = vmatpush1.bf16.msra.mxu0 %v4051_v52  ;;  %v4125_v52 = vld [vmem:[%s5589_s5 + $0x3a4] ss:$8 sps:$4 sm:$0xff]  }
 0x250   :  { %3032 = vmatprep.subr.bf16.mxu0 %v4056_v55  ;;  %v4126_v55 = vld [vmem:[%s5589_s5 + $0x3b0] ss:$8 sps:$4 sm:$0xff]  }
 0x253   :  { %3033 = vmatpush1.bf16.msra.mxu0 %v4054_v61  ;;  %v4132_v61 = vld [vmem:[%s5589_s5 + $0x3d0] ss:$8 sps:$4 sm:$0xff]  }
 0x254   :  { %3034 = vmatprep.subr.bf16.mxu0 %v4059_v2  ;;  %v499_v2 = vrot.slane %v5133_v38, %v498_v59  ;;  %v4138_v38 = vld [vmem:[%s5589_s5 + $0x3f0] ss:$8 sps:$4 sm:$0xff]  }
 0x257   :  { %3035 = vmatpush1.bf16.msra.mxu0 %v4057_v0 }
 0x258   :  { %3036 = vmatprep.subr.bf16.mxu0 %v4062_v1 }
 0x25b   :  { %3037 = vmatpush1.bf16.msra.mxu0 %v4060_v6 }
 0x25c   :  { %3038 = vmatprep.subr.bf16.mxu0 %v4065_v8 }
 0x25f   :  { %3039 = vmatpush1.bf16.msra.mxu0 %v4063_v10 }
 0x260   :  { %3040 = vmatprep.subr.bf16.mxu0 %v4068_v11 }
 0x263   :  { %3041 = vmatpush1.bf16.msra.mxu0 %v4066_v12 }
 0x264   :  { %3042 = vmatprep.subr.bf16.mxu0 %v4071_v13 }
 0x267   :  { %3043 = vmatpush1.bf16.msra.mxu0 %v4069_v14 }
 0x268   :  { %3044 = vmatprep.subr.bf16.mxu0 %v4074_v15 }
 0x26b   :  { %3045 = vmatpush1.bf16.msra.mxu0 %v4072_v19 }
 0x26c   :  { %3046 = vmatprep.subr.bf16.mxu0 %v4077_v20  ;;  %v4152_v20 = vld [vmem:[%s5591_s7 + $0x28] sm:$0xff]  }
 0x26d   :  { %3846 = vmatpush3.bf16.msra.mxu1 %v4152_v20 }
 0x26f   :  { %3047 = vmatpush1.bf16.msra.mxu0 %v4075_v23  ;;  %v4153_v23 = vld [vmem:[%s5591_s7 + $0x70] sm:$0xff]  }
 0x270   :  { %3048 = vmatprep.subr.bf16.mxu0 %v4080_v16  ;;  %v4154_v16 = vld [vmem:[%s5591_s7 + $0x30] sm:$0xff]   ;;  %3847 = vmatprep.subr.bf16.mxu1 %v4153_v23 }
 0x271   :  { %3848 = vmatpush3.bf16.msra.mxu1 %v4154_v16 }
 0x273   :  { %3049 = vmatpush1.bf16.msra.mxu0 %v4078_v45  ;;  %v4155_v45 = vld [vmem:[%s5591_s7 + $0x78] sm:$0xff]  }
 0x274   :  { %3050 = vmatprep.subr.bf16.mxu0 %v4083_v5  ;;  %v4156_v5 = vld [vmem:[%s5591_s7 + $0x38] sm:$0xff]   ;;  %3849 = vmatprep.subr.bf16.mxu1 %v4155_v45 }
 0x275   :  { %3850 = vmatpush3.bf16.msra.mxu1 %v4156_v5 }
 0x277   :  { %3051 = vmatpush1.bf16.msra.mxu0 %v4081_v17  ;;  %v4166_v17 = vmov 0.0  }
 0x278   :  { %3052 = vmatprep.subr.bf16.mxu0 %v4086_v18  ;;  %3866 = vmatprep.subr.bf16.mxu1 %v4166_v17  ;;  %v2288_v18 = vld [vmem:[%s5593_s6] sm:$0x3] }
 0x27b   :  { %3053 = vmatpush1.bf16.msra.mxu0 %v4084_v25  ;;  %v2293_v25 = vrot.slane %v2288_v18, %v4479_v22  ;;  %v4157_v22 = vld [vmem:[%s5592_s9] sm:$0xff]  }
 0x27c   :  { %3054 = vmatprep.subr.bf16.mxu0 %v4089_v26  ;;  %v2297_v26 = vrot.slane %v2288_v18, %v4485_v24  ;;  %v4158_v24 = vld [vmem:[%s5592_s9 + $0x8] sm:$0xff]  }
 0x27f   :  { %3055 = vmatpush1.bf16.msra.mxu0 %v4087_v27 }
 0x280   :  { %3056 = vmatprep.subr.bf16.mxu0 %v4092_v28 }
 0x283   :  { %3057 = vmatpush1.bf16.msra.mxu0 %v4090_v30 }
 0x284   :  { %3069 = vmatprep.subr.bf16.mxu0 %v4095_v29 }
 0x286   :  { %3059 = vmatmul.mubr.bf16.vlgmr.msra.gmra.mrb[8].mxu0 %v5327_v57  ;;  %v4129_v57 = vld [vmem:[%s5589_s5 + $0x3c0] ss:$8 sps:$4 sm:$0xff]  }
 0x287   :  { %3070 = vmatpush1.bf16.msra.mxu0 %v4093_v31 }
 0x288   :  { %3071 = vmatprep.subr.bf16.mxu0 %v4098_v33 }
 0x28b   :  { %3072 = vmatpush1.bf16.msra.mxu0 %v4096_v32 }
 0x28c   :  { %3073 = vmatprep.subr.bf16.mxu0 %v4101_v34 }
 0x28f   :  { %3074 = vmatpush1.bf16.msra.mxu0 %v4099_v35 }
 0x290   :  { %3075 = vmatprep.subr.bf16.mxu0 %v4104_v36 }
 0x293   :  { %3076 = vmatpush1.bf16.msra.mxu0 %v4102_v37 }
 0x294   :  { %3077 = vmatprep.subr.bf16.mxu0 %v4107_v39 }
 0x297   :  { %3078 = vmatpush1.bf16.msra.mxu0 %v4105_v40 }
 0x298   :  { %3079 = vmatprep.subr.bf16.mxu0 %v4110_v41 }
 0x29b   :  { %3080 = vmatpush1.bf16.msra.mxu0 %v4108_v46  ;;  %v4159_v46 = vld [vmem:[%s5592_s9 + $0x10] sm:$0xff]  }
 0x29c   :  { %3081 = vmatprep.subr.bf16.mxu0 %v4113_v42  ;;  %v4160_v42 = vld [vmem:[%s5592_s9 + $0x18] sm:$0xff]  }
 0x29f   :  { %3082 = vmatpush1.bf16.msra.mxu0 %v4111_v43  ;;  %v4161_v43 = vld [vmem:[%s5592_s9 + $0x20] sm:$0xff]  }
 0x2a0   :  { %3083 = vmatprep.subr.bf16.mxu0 %v4116_v44  ;;  %v4162_v44 = vld [vmem:[%s5592_s9 + $0x28] sm:$0xff]  }
 0x2a3   :  { %3084 = vmatpush1.bf16.msra.mxu0 %v4114_v47  ;;  %v4163_v47 = vld [vmem:[%s5592_s9 + $0x30] sm:$0xff]  }
 0x2a4   :  { %3085 = vmatprep.subr.bf16.mxu0 %v4119_v48  ;;  %v4164_v48 = vld [vmem:[%s5592_s9 + $0x38] sm:$0xff]  }
 0x2a7   :  { %3086 = vmatpush1.bf16.msra.mxu0 %v4117_v49 }
 0x2a8   :  { %3087 = vmatprep.subr.bf16.mxu0 %v4122_v50  ;;  %v3809_v50 = vld [vmem:[%s5594_s8] ss:$0 sm:$0xff] }
 0x2ab   :  { %3088 = vmatpush1.bf16.msra.mxu0 %v4120_v51 }
 0x2ac   :  { %3089 = vmatprep.subr.bf16.mxu0 %v4125_v52 }
 0x2af   :  { %3090 = vmatpush1.bf16.msra.mxu0 %v4123_v53 }
 0x2b0   :  { %3091 = vmatprep.subr.bf16.mxu0 %v4128_v54 }
 0x2b3   :  { %3092 = vmatpush1.bf16.msra.mxu0 %v4126_v55 }
 0x2b4   :  { %3093 = vmatprep.subr.bf16.mxu0 %v4131_v56 }
 0x2b7   :  { %3094 = vmatpush1.bf16.msra.mxu0 %v4129_v57 }
 0x2b8   :  { %3095 = vmatprep.subr.bf16.mxu0 %v4134_v58 }
 0x2bb   :  { %v2127_v0 = vpop.f32.mrb[16].mxu1  ;;  %3096 = vmatpush1.bf16.msra.mxu0 %v4132_v61  ;;  %v3826_v61 = vld [vmem:[%s5595_s10] ss:$0 sm:$0xff] }
 0x2bc   :  { %v3902_v1 = vadd.f32 %v2127_v0, %v499_v2  ;;  %v2129_v3 = vpop.f32.mrb[17].mxu1  ;;  %3097 = vmatprep.subr.bf16.mxu0 %v4137_v62 }
 0x2bd   :  { %v3903_v6 = vadd.f32 %v2129_v3, %v503_v63  ;;  %v2131_v7 = vpop.f32.mrb[18].mxu1 }
 0x2be   :  { %v3904_v8 = vadd.f32 %v2131_v7, %v499_v2  ;;  %v2133_v9 = vpop.f32.mrb[19].mxu1  ;;  %v2142_v11 = vmax.f32 %v3902_v1, 0.0 }
 0x2bf   :  { %v3905_v10 = vadd.f32 %v2133_v9, %v503_v63  ;;  %3098 = vmatpush1.bf16.msra.mxu0 %v4135_v21  ;;  %v2143_v13 = vmax.f32 %v3903_v6, 0.0 }
 0x2c0   :  { %v2150_v12 = vmax.f32 %v3904_v8, 0.0  ;;  %3099 = vmatprep.subr.bf16.mxu0 %v4140_v4 }
 0x2c1   :  { %v2151_v14 = vmax.f32 %v3905_v10, 0.0 }
 0x2c2   :  { %v2158_v15 = vpack.c.bf16 %v2150_v12, %v2142_v11 }
 0x2c3   :  { %v2159_v19 = vpack.c.bf16 %v2151_v14, %v2143_v13  ;;  %3100 = vmatpush1.bf16.msra.mxu0 %v4138_v38 }
 0x2c5   :  { %3101 = vmatprep.mubr.bf16.mxu0 %v2159_v19 }
 0x2c6   :  { %3102 = vmatmul.mubr.bf16.vlgmr.msra.gmra.mrb[8].mxu0 %v2158_v15 }
 0x399   :  { %v3103_v27 = vpop.f32.mrb[8].mxu0 }
 0x39a   :  { %v3906_v28 = vadd.f32 %v3103_v27, %v2293_v25  ;;  %v3105_v30 = vpop.f32.mrb[9].mxu0 }
 0x39b   :  { %v3907_v29 = vadd.f32 %v3105_v30, %v2297_v26  ;;  %v3107_v31 = vpop.f32.mrb[10].mxu0 }
 0x39c   :  { %v3908_v33 = vadd.f32 %v3107_v31, %v2293_v25  ;;  %v3109_v32 = vpop.f32.mrb[11].mxu0  ;;  %v3112_v35 = vmax.f32 %v3906_v28, 0.0 }
 0x39d   :  { %v3909_v34 = vadd.f32 %v3109_v32, %v2297_v26  ;;  %v3113_v37 = vmax.f32 %v3907_v29, 0.0 }
 0x39e   :  { %v3114_v36 = vmax.f32 %v3908_v33, 0.0 }
 0x39f   :  { %v3115_v39 = vmax.f32 %v3909_v34, 0.0 }
 0x3a0   :  { %v3116_v40 = vpack.c.bf16 %v3114_v36, %v3112_v35 }
 0x3a1   :  { %v3117_v41 = vpack.c.bf16 %v3115_v39, %v3113_v37 }
 0x3a3   :  { %3285 = vmatprep.mubr.bf16.mxu1 %v3117_v41 }
 0x3a4   :  { %3286 = vmatmul.mubr.bf16.vlgmr.msra.gmra.mrb[20].mxu1 %v3116_v40 }
 0x3a5   :  { %3867 = vmatpush3.bf16.msra.mxu1 %v4157_v22  ;;  %3882 = vmatprep.mubr.msk.bf16.mxu1 %vm4167_vm1, %v4166_v17 }
 0x3a6   :  { %3868 = vmatprep.subr.bf16.mxu1 %v4166_v17 }
 0x3a9   :  { %3869 = vmatpush3.bf16.msra.mxu1 %v4158_v24 }
 0x3aa   :  { %3870 = vmatprep.subr.bf16.mxu1 %v4166_v17 }
 0x3ad   :  { %3871 = vmatpush3.bf16.msra.mxu1 %v4159_v46 }
 0x3ae   :  { %3872 = vmatprep.subr.bf16.mxu1 %v4166_v17 }
 0x3b1   :  { %3873 = vmatpush3.bf16.msra.mxu1 %v4160_v42 }
 0x3b2   :  { %3874 = vmatprep.subr.bf16.mxu1 %v4166_v17 }
 0x3b5   :  { %3875 = vmatpush3.bf16.msra.mxu1 %v4161_v43 }
 0x3b6   :  { %3876 = vmatprep.subr.bf16.mxu1 %v4166_v17 }
 0x3b9   :  { %3877 = vmatpush3.bf16.msra.mxu1 %v4162_v44 }
 0x3ba   :  { %3878 = vmatprep.subr.bf16.mxu1 %v4166_v17 }
 0x3bd   :  { %3879 = vmatpush3.bf16.msra.mxu1 %v4163_v47 }
 0x3be   :  { %3880 = vmatprep.subr.bf16.mxu1 %v4166_v17 }
 0x3c1   :  { %3881 = vmatpush3.bf16.msra.mxu1 %v4164_v48 }
 0x477   :  { %v3851_v49 = vpop.f32.mrb[20].mxu1 }
 0x478   :  { %v3852_v51 = vpop.f32.mrb[21].mxu1 }
 0x479   :  { %v3853_v52 = vadd.f32 %v3852_v51, %v3851_v49  ;;  %v3854_v53 = vpop.f32.mrb[22].mxu1 }
 0x47a   :  { %v3855_v54 = vpop.f32.mrb[23].mxu1 }
 0x47b   :  { %v3288_v55 = vadd.f32 %v3853_v52, %v3809_v50  ;;  %v3856_v56 = vadd.f32 %v3855_v54, %v3854_v53 }
 0x47d   :  { %v3291_v57 = vadd.f32 %v3856_v56, %v3809_v50  ;;  %v3294_v58 = vmax.f32 %v3288_v55, 0.0 }
 0x47f   :  { %v3295_v59 = vmax.f32 %v3291_v57, 0.0 }
 0x481   :  { %v3296_v60 = vpack.c.bf16 %v3295_v59, %v3294_v58 }
 0x483   :  { %3883 = vmatmul.mubr.bf16.vlgmr.msra.gmra.mrb[24].mxu1 %v3296_v60 }
 0x556   :  { %v3402_v2 = vpop.f32.mrb[24].mxu1 }
 0x557   :  { %v3403_v62 = vadd.f32 %v3826_v61, %v3402_v2  ;;  %v3884_v63 = vpop.f32.mrb[25].mxu1 }
 0x558   :  { %v3405_v0 = vpop.f32.mrb[26].mxu1 }
 0x559   :  { %3409 = vst [vmem:[%s5596_s11] sm:$0xff] %v3403_v62  ;;  %v3406_v21 = vadd.f32 %v3826_v61, %v3405_v0  ;;  %v3885_v1 = vpop.f32.mrb[27].mxu1 }
 0x55b   :  { %3410 = vst [vmem:[%s5596_s11 + $0x8] sm:$0xff] %v3406_v21 }

// kernel: nn_forward.1
= control target key start
LH: loop header
LB: loop body
LE: loop exit
PB: predicated region body
PF: predicated region fallthrough
CT: control target
= control target key end

     0   :  { %v4165_v1 = vmov 0   ;;  %vm112_vm0 = vcmask 261120   ;;  %vm4167_vm1 = vmmov 0   ;;  %s5585_s1 = inlined_call_operand.vmem [shape: bf16[32,512], index: 1, kind: input, shape index: {}]   ;;  %s5586_s0 = inlined_call_operand.vmem [shape: f32[16,32], index: 0, kind: input, shape index: {}]   ;;  %s5587_s3 = inlined_call_operand.vmem [shape: bf16[512,1024], index: 3, kind: input, shape index: {}]   ;;  %s5588_s2 = inlined_call_operand.vmem [shape: f32[1,512], index: 2, kind: input, shape index: {}]   ;;  %s5589_s5 = inlined_call_operand.vmem [shape: bf16[1024,256], index: 5, kind: input, shape index: {}]   ;;  %s5590_s4 = inlined_call_operand.vmem [shape: f32[1,1024], index: 4, kind: input, shape index: {}]   ;;  %s5591_s7 = inlined_call_operand.vmem [shape: bf16[256,128], index: 7, kind: input, shape index: {}]   ;;  %s5592_s9 = inlined_call_operand.vmem [shape: bf16[128,128], index: 9, kind: input, shape index: {}]   ;;  %s5593_s6 = inlined_call_operand.vmem [shape: f32[1,256], index: 6, kind: input, shape index: {}]   ;;  %s5594_s8 = inlined_call_operand.vmem [shape: f32[1,128], index: 8, kind: input, shape index: {}]   ;;  %s5595_s10 = inlined_call_operand.vmem [shape: f32[1,128], index: 10, kind: input, shape index: {}]   ;;  %s5596_s11 = inlined_call_operand.vmem [shape: f32[16,128], index: 11, kind: output, shape index: {}]  }
   0x1   :  { %v3937_v0 = vld [vmem:[%s5585_s1 + $0x4] ss:$16 sps:$4 sm:$0xff]   ;;  %148 = vmatprep.mubr.bf16.mxu1 %v4165_v1  ;;  %v3939_v2 = vld [vmem:[%s5585_s1] ss:$16 sps:$4 sm:$0xff]   ;;  %v40_v6 = vld [vmem:[%s5586_s0 + $0x8] sm:$0xff] }
   0x2   :  { %116 = vmatprep.subr.bf16.mxu1 %v3937_v0  ;;  %v3940_v3 = vld [vmem:[%s5585_s1 + $0x24] ss:$16 sps:$4 sm:$0xff]   ;;  %v3942_v4 = vld [vmem:[%s5585_s1 + $0x20] ss:$16 sps:$4 sm:$0xff]   ;;  %v3945_v7 = vld [vmem:[%s5585_s1 + $0xc] ss:$16 sps:$4 sm:$0xff]  }
   0x3   :  { %v39_v5 = vld [vmem:[%s5586_s0] sm:$0xff]  ;;  %117 = vmatpush1.bf16.msra.mxu1 %v3939_v2  ;;  %v3943_v9 = vld [vmem:[%s5585_s1 + $0x8] ss:$16 sps:$4 sm:$0xff]   ;;  %v3948_v10 = vld [vmem:[%s5585_s1 + $0x2c] ss:$16 sps:$4 sm:$0xff]  }
   0x4   :  { %118 = vmatprep.subr.bf16.mxu1 %v3940_v3  ;;  %v41_v8 = vpack.c.bf16 %v40_v6, %v39_v5  ;;  %v214_v11 = vld [vmem:[%s5587_s3] sm:$0xff]  ;;  %v3946_v20 = vld [vmem:[%s5585_s1 + $0x28] ss:$16 sps:$4 sm:$0xff]  }
   0x5   :  { %v342_v12 = vld [vmem:[%s5587_s3 + $0x400] sm:$0xff] }
   0x6   :  { %v346_v13 = vld [vmem:[%s5587_s3 + $0x420] sm:$0xff] }
   0x7   :  { %119 = vmatpush1.bf16.msra.mxu1 %v3942_v4  ;;  %v218_v14 = vld [vmem:[%s5587_s3 + $0x20] sm:$0xff]  ;;  %v3554_v15 = vcombine.high %v342_v12, %v346_v13  ;;  %v3553_v16 = vcombine.low %v342_v12, %v346_v13 }
   0x8   :  { %159 = vmatprep.subr.bf16.mxu1 %v3945_v7  ;;  %v350_v17 = vld [vmem:[%s5587_s3 + $0x440] sm:$0xff]  ;;  %v3426_v23 = vcombine.high %v214_v11, %v218_v14  ;;  %v3425_v28 = vcombine.low %v214_v11, %v218_v14 }
   0x9   :  { %v354_v18 = vld [vmem:[%s5587_s3 + $0x460] sm:$0xff]  ;;  %1835 = vmatprep.subr.bf16.mxu0 %v3554_v15 }
   0xa   :  { %3423 = vmatmul.mubr.msk.bf16.vlgmr.msra.gmra.mrb[0].mxu1 %vm112_vm0, %v41_v8  ;;  %v3562_v19 = vcombine.high %v350_v17, %v354_v18  ;;  %v358_v21 = vld [vmem:[%s5587_s3 + $0x480] sm:$0xff]  ;;  %1836 = vmatpush1.bf16.msra.mxu0 %v3553_v16  ;;  %v3561_v26 = vcombine.low %v350_v17, %v354_v18 }
   0xb   :  { %160 = vmatpush1.bf16.msra.mxu1 %v3943_v9  ;;  %191 = vmatprep.mubr.bf16.mxu1 %v4165_v1  ;;  %v362_v22 = vld [vmem:[%s5587_s3 + $0x4a0] sm:$0xff] }
   0xc   :  { %161 = vmatprep.subr.bf16.mxu1 %v3948_v10  ;;  %v222_v24 = vld [vmem:[%s5587_s3 + $0x40] sm:$0xff]  ;;  %1837 = vmatprep.subr.bf16.mxu0 %v3562_v19  ;;  %v3570_v27 = vcombine.high %v358_v21, %v362_v22  ;;  %v3569_v34 = vcombine.low %v358_v21, %v362_v22 }
   0xd   :  { %v226_v25 = vld [vmem:[%s5587_s3 + $0x60] sm:$0xff] }
   0xe   :  { %v366_v29 = vld [vmem:[%s5587_s3 + $0x4c0] sm:$0xff]  ;;  %v3434_v31 = vcombine.high %v222_v24, %v226_v25  ;;  %1838 = vmatpush1.bf16.msra.mxu0 %v3561_v26  ;;  %v3433_v36 = vcombine.low %v222_v24, %v226_v25 }
   0xf   :  { %162 = vmatpush1.bf16.msra.mxu1 %v3946_v20  ;;  %v370_v30 = vld [vmem:[%s5587_s3 + $0x4e0] sm:$0xff]  ;;  %1839 = vmatprep.subr.bf16.mxu0 %v3570_v27 }
  0x10   :  { %1792 = vmatprep.subr.bf16.mxu1 %v3426_v23  ;;  %v230_v32 = vld [vmem:[%s5587_s3 + $0x80] sm:$0xff]  ;;  %v3578_v35 = vcombine.high %v366_v29, %v370_v30  ;;  %v3577_v42 = vcombine.low %v366_v29, %v370_v30 }
  0x11   :  { %v234_v33 = vld [vmem:[%s5587_s3 + $0xa0] sm:$0xff] }
  0x12   :  { %3424 = vmatmul.mubr.msk.bf16.vlgmr.msra.gmra.mrb[4].mxu1 %vm112_vm0, %v41_v8  ;;  %v374_v37 = vld [vmem:[%s5587_s3 + $0x500] sm:$0xff]  ;;  %v3442_v39 = vcombine.high %v230_v32, %v234_v33  ;;  %1840 = vmatpush1.bf16.msra.mxu0 %v3569_v34  ;;  %v3441_v44 = vcombine.low %v230_v32, %v234_v33 }
  0x13   :  { %1793 = vmatpush1.bf16.msra.mxu1 %v3425_v28  ;;  %v378_v38 = vld [vmem:[%s5587_s3 + $0x520] sm:$0xff]  ;;  %1841 = vmatprep.subr.bf16.mxu0 %v3578_v35 }
  0x14   :  { %1794 = vmatprep.subr.bf16.mxu1 %v3434_v31  ;;  %v238_v40 = vld [vmem:[%s5587_s3 + $0xc0] sm:$0xff]  ;;  %v3586_v43 = vcombine.high %v374_v37, %v378_v38  ;;  %v3585_v50 = vcombine.low %v374_v37, %v378_v38 }
  0x15   :  { %v242_v41 = vld [vmem:[%s5587_s3 + $0xe0] sm:$0xff] }
  0x16   :  { %v382_v45 = vld [vmem:[%s5587_s3 + $0x540] sm:$0xff]  ;;  %v3450_v47 = vcombine.high %v238_v40, %v242_v41  ;;  %1842 = vmatpush1.bf16.msra.mxu0 %v3577_v42  ;;  %v3449_v52 = vcombine.low %v238_v40, %v242_v41 }
  0x17   :  { %1795 = vmatpush1.bf16.msra.mxu1 %v3433_v36  ;;  %v386_v46 = vld [vmem:[%s5587_s3 + $0x560] sm:$0xff]  ;;  %1843 = vmatprep.subr.bf16.mxu0 %v3586_v43 }
  0x18   :  { %1796 = vmatprep.subr.bf16.mxu1 %v3442_v39  ;;  %v246_v48 = vld [vmem:[%s5587_s3 + $0x100] sm:$0xff]  ;;  %v3594_v51 = vcombine.high %v382_v45, %v386_v46  ;;  %v3593_v58 = vcombine.low %v382_v45, %v386_v46 }
  0x19   :  { %v250_v49 = vld [vmem:[%s5587_s3 + $0x120] sm:$0xff] }
  0x1a   :  { %v390_v53 = vld [vmem:[%s5587_s3 + $0x580] sm:$0xff]  ;;  %v3458_v55 = vcombine.high %v246_v48, %v250_v49  ;;  %1844 = vmatpush1.bf16.msra.mxu0 %v3585_v50  ;;  %v3457_v60 = vcombine.low %v246_v48, %v250_v49 }
  0x1b   :  { %1797 = vmatpush1.bf16.msra.mxu1 %v3441_v44  ;;  %v394_v54 = vld [vmem:[%s5587_s3 + $0x5a0] sm:$0xff]  ;;  %1845 = vmatprep.subr.bf16.mxu0 %v3594_v51 }
  0x1c   :  { %1798 = vmatprep.subr.bf16.mxu1 %v3450_v47  ;;  %v254_v56 = vld [vmem:[%s5587_s3 + $0x140] sm:$0xff]  ;;  %v3602_v59 = vcombine.high %v390_v53, %v394_v54  ;;  %v3601_v2 = vcombine.low %v390_v53, %v394_v54 }
  0x1d   :  { %v258_v57 = vld [vmem:[%s5587_s3 + $0x160] sm:$0xff] }
  0x1e   :  { %v398_v61 = vld [vmem:[%s5587_s3 + $0x5c0] sm:$0xff]  ;;  %v3466_v63 = vcombine.high %v254_v56, %v258_v57  ;;  %1846 = vmatpush1.bf16.msra.mxu0 %v3593_v58  ;;  %v3465_v4 = vcombine.low %v254_v56, %v258_v57 }
  0x1f   :  { %1799 = vmatpush1.bf16.msra.mxu1 %v3449_v52  ;;  %v402_v62 = vld [vmem:[%s5587_s3 + $0x5e0] sm:$0xff]  ;;  %1847 = vmatprep.subr.bf16.mxu0 %v3602_v59 }
  0x20   :  { %1800 = vmatprep.subr.bf16.mxu1 %v3458_v55  ;;  %v262_v0 = vld [vmem:[%s5587_s3 + $0x180] sm:$0xff]  ;;  %v3610_v3 = vcombine.high %v398_v61, %v402_v62  ;;  %v3609_v10 = vcombine.low %v398_v61, %v402_v62 }
  0x21   :  { %v266_v1 = vld [vmem:[%s5587_s3 + $0x1a0] sm:$0xff] }
  0x22   :  { %v406_v5 = vld [vmem:[%s5587_s3 + $0x600] sm:$0xff]  ;;  %v3474_v7 = vcombine.high %v262_v0, %v266_v1  ;;  %1848 = vmatpush1.bf16.msra.mxu0 %v3601_v2  ;;  %v3473_v12 = vcombine.low %v262_v0, %v266_v1 }
  0x23   :  { %1801 = vmatpush1.bf16.msra.mxu1 %v3457_v60  ;;  %v410_v6 = vld [vmem:[%s5587_s3 + $0x620] sm:$0xff]  ;;  %1849 = vmatprep.subr.bf16.mxu0 %v3610_v3 }
  0x24   :  { %1802 = vmatprep.subr.bf16.mxu1 %v3466_v63  ;;  %v270_v8 = vld [vmem:[%s5587_s3 + $0x1c0] sm:$0xff]  ;;  %v3618_v11 = vcombine.high %v406_v5, %v410_v6  ;;  %v3617_v18 = vcombine.low %v406_v5, %v410_v6  ;;  %v4449_v6 = vld [vmem:[%s5587_s3 + $0x8] sm:$0xff] }
  0x25   :  { %v274_v9 = vld [vmem:[%s5587_s3 + $0x1e0] sm:$0xff] }
  0x26   :  { %v414_v13 = vld [vmem:[%s5587_s3 + $0x640] sm:$0xff]  ;;  %v3482_v15 = vcombine.high %v270_v8, %v274_v9  ;;  %1850 = vmatpush1.bf16.msra.mxu0 %v3609_v10  ;;  %v3481_v20 = vcombine.low %v270_v8, %v274_v9  ;;  %v219_v8 = vld [vmem:[%s5587_s3 + $0x28] sm:$0xff] }
  0x27   :  { %1803 = vmatpush1.bf16.msra.mxu1 %v3465_v4  ;;  %v418_v14 = vld [vmem:[%s5587_s3 + $0x660] sm:$0xff]  ;;  %1851 = vmatprep.subr.bf16.mxu0 %v3618_v11  ;;  %v3427_v9 = vcombine.low %v4449_v6, %v219_v8  ;;  %v3428_v10 = vcombine.high %v4449_v6, %v219_v8  ;;  %v247_v8 = vld [vmem:[%s5587_s3 + $0x108] sm:$0xff] }
  0x28   :  { %1804 = vmatprep.subr.bf16.mxu1 %v3474_v7  ;;  %v278_v16 = vld [vmem:[%s5587_s3 + $0x200] sm:$0xff]  ;;  %v3626_v19 = vcombine.high %v414_v13, %v418_v14  ;;  %v3625_v26 = vcombine.low %v414_v13, %v418_v14 }
  0x29   :  { %v282_v17 = vld [vmem:[%s5587_s3 + $0x220] sm:$0xff] }
  0x2a   :  { %v422_v21 = vld [vmem:[%s5587_s3 + $0x680] sm:$0xff]  ;;  %v3490_v23 = vcombine.high %v278_v16, %v282_v17  ;;  %1852 = vmatpush1.bf16.msra.mxu0 %v3617_v18  ;;  %v3489_v28 = vcombine.low %v278_v16, %v282_v17  ;;  %v4465_v16 = vld [vmem:[%s5587_s3 + $0x10] sm:$0xff] }
  0x2b   :  { %1805 = vmatpush1.bf16.msra.mxu1 %v3473_v12  ;;  %v426_v22 = vld [vmem:[%s5587_s3 + $0x6a0] sm:$0xff]  ;;  %1853 = vmatprep.subr.bf16.mxu0 %v3626_v19  ;;  %v4470_v17 = vld [vmem:[%s5587_s3 + $0x30] sm:$0xff] }
  0x2c   :  { %1806 = vmatprep.subr.bf16.mxu1 %v3482_v15  ;;  %v286_v24 = vld [vmem:[%s5587_s3 + $0x240] sm:$0xff]  ;;  %v3634_v27 = vcombine.high %v422_v21, %v426_v22  ;;  %v3633_v34 = vcombine.low %v422_v21, %v426_v22  ;;  %v3429_v18 = vcombine.low %v4465_v16, %v4470_v17  ;;  %v3430_v19 = vcombine.high %v4465_v16, %v4470_v17  ;;  %v240_v16 = vld [vmem:[%s5587_s3 + $0xd0] sm:$0xff] }
  0x2d   :  { %v290_v25 = vld [vmem:[%s5587_s3 + $0x260] sm:$0xff]  ;;  %v244_v17 = vld [vmem:[%s5587_s3 + $0xf0] sm:$0xff] }
  0x2e   :  { %v430_v29 = vld [vmem:[%s5587_s3 + $0x6c0] sm:$0xff]  ;;  %v3498_v31 = vcombine.high %v286_v24, %v290_v25  ;;  %1854 = vmatpush1.bf16.msra.mxu0 %v3625_v26  ;;  %v3497_v36 = vcombine.low %v286_v24, %v290_v25 }
  0x2f   :  { %1807 = vmatpush1.bf16.msra.mxu1 %v3481_v20  ;;  %v434_v30 = vld [vmem:[%s5587_s3 + $0x6e0] sm:$0xff]  ;;  %1855 = vmatprep.subr.bf16.mxu0 %v3634_v27  ;;  %v52_v20 = vlaneseq }
  0x30   :  { %1808 = vmatprep.subr.bf16.mxu1 %v3490_v23  ;;  %v294_v32 = vld [vmem:[%s5587_s3 + $0x280] sm:$0xff]  ;;  %v3642_v35 = vcombine.high %v430_v29, %v434_v30  ;;  %v3641_v40 = vcombine.low %v430_v29, %v434_v30 }
  0x31   :  { %v298_v33 = vld [vmem:[%s5587_s3 + $0x2a0] sm:$0xff]  ;;  %v4476_v21 = vshrl.u32 %v52_v20, 7  ;;  %v255_v20 = vld [vmem:[%s5587_s3 + $0x148] sm:$0xff] }
  0x32   :  { %v3506_v37 = vcombine.high %v294_v32, %v298_v33  ;;  %v302_v38 = vld [vmem:[%s5587_s3 + $0x2c0] sm:$0xff]  ;;  %1856 = vmatpush1.bf16.msra.mxu0 %v3633_v34  ;;  %v3505_v41 = vcombine.low %v294_v32, %v298_v33 }
  0x33   :  { %1809 = vmatpush1.bf16.msra.mxu1 %v3489_v28  ;;  %v306_v39 = vld [vmem:[%s5587_s3 + $0x2e0] sm:$0xff]  ;;  %1857 = vmatprep.subr.bf16.mxu0 %v3642_v35  ;;  %v4479_v22 = vsub.s32 0, %v4476_v21  ;;  %v4485_v24 = vsub.s32 1, %v4476_v21  ;;  %v62_v30 = vsub.s32 2, %v4476_v21  ;;  %v66_v33 = vsub.s32 3, %v4476_v21 }
  0x34   :  { %1810 = vmatprep.subr.bf16.mxu1 %v3498_v31  ;;  %v3514_v42 = vcombine.high %v302_v38, %v306_v39  ;;  %v310_v43 = vld [vmem:[%s5587_s3 + $0x300] sm:$0xff]  ;;  %v3513_v45 = vcombine.low %v302_v38, %v306_v39 }
  0x35   :  { %v314_v44 = vld [vmem:[%s5587_s3 + $0x320] sm:$0xff] }
  0x36   :  { %1858 = vmatpush1.bf16.msra.mxu0 %v3641_v40  ;;  %v3522_v46 = vcombine.high %v310_v43, %v314_v44  ;;  %v318_v47 = vld [vmem:[%s5587_s3 + $0x340] sm:$0xff]  ;;  %v3521_v49 = vcombine.low %v310_v43, %v314_v44  ;;  %v223_v43 = vld [vmem:[%s5587_s3 + $0x48] sm:$0xff] }
  0x37   :  { %1811 = vmatpush1.bf16.msra.mxu1 %v3497_v36  ;;  %v322_v48 = vld [vmem:[%s5587_s3 + $0x360] sm:$0xff]  ;;  %v227_v44 = vld [vmem:[%s5587_s3 + $0x68] sm:$0xff] }
  0x38   :  { %1812 = vmatprep.subr.bf16.mxu1 %v3506_v37  ;;  %v3530_v50 = vcombine.high %v318_v47, %v322_v48  ;;  %v3529_v51 = vcombine.low %v318_v47, %v322_v48  ;;  %v326_v52 = vld [vmem:[%s5587_s3 + $0x380] sm:$0xff] }
  0x39   :  { %v330_v53 = vld [vmem:[%s5587_s3 + $0x3a0] sm:$0xff] }
  0x3a   :  { %v438_v54 = vld [vmem:[%s5587_s3 + $0x700] sm:$0xff]  ;;  %v3538_v55 = vcombine.high %v326_v52, %v330_v53  ;;  %v3537_v57 = vcombine.low %v326_v52, %v330_v53  ;;  %v231_v53 = vld [vmem:[%s5587_s3 + $0x88] sm:$0xff] }
  0x3b   :  { %1813 = vmatpush1.bf16.msra.mxu1 %v3505_v41  ;;  %v442_v56 = vld [vmem:[%s5587_s3 + $0x720] sm:$0xff] }
  0x3c   :  { %1814 = vmatprep.subr.bf16.mxu1 %v3514_v42  ;;  %v3650_v58 = vcombine.high %v438_v54, %v442_v56  ;;  %v3649_v59 = vcombine.low %v438_v54, %v442_v56  ;;  %v334_v60 = vld [vmem:[%s5587_s3 + $0x3c0] sm:$0xff]  ;;  %v235_v54 = vld [vmem:[%s5587_s3 + $0xa8] sm:$0xff] }
  0x3d   :  { %v338_v61 = vld [vmem:[%s5587_s3 + $0x3e0] sm:$0xff]  ;;  %v3443_v6 = vcombine.low %v231_v53, %v235_v54 }
  0x3e   :  { %1859 = vmatprep.subr.bf16.mxu0 %v3650_v58  ;;  %v446_v62 = vld [vmem:[%s5587_s3 + $0x740] sm:$0xff]  ;;  %v3546_v63 = vcombine.high %v334_v60, %v338_v61  ;;  %v3545_v1 = vcombine.low %v334_v60, %v338_v61  ;;  %v3435_v60 = vcombine.low %v223_v43, %v227_v44 }
  0x3f   :  { %1815 = vmatpush1.bf16.msra.mxu1 %v3513_v45  ;;  %1860 = vmatpush1.bf16.msra.mxu0 %v3649_v59  ;;  %v450_v0 = vld [vmem:[%s5587_s3 + $0x760] sm:$0xff] }
  0x40   :  { %1816 = vmatprep.subr.bf16.mxu1 %v3522_v46  ;;  %v3658_v2 = vcombine.high %v446_v62, %v450_v0  ;;  %v3657_v3 = vcombine.low %v446_v62, %v450_v0  ;;  %v454_v4 = vld [vmem:[%s5587_s3 + $0x780] sm:$0xff]  ;;  %v3444_v62 = vcombine.high %v231_v53, %v235_v54  ;;  %v239_v0 = vld [vmem:[%s5587_s3 + $0xc8] sm:$0xff] }
  0x41   :  { %v458_v5 = vld [vmem:[%s5587_s3 + $0x7a0] sm:$0xff] }
  0x42   :  { %1861 = vmatprep.subr.bf16.mxu0 %v3658_v2  ;;  %v3666_v7 = vcombine.high %v454_v4, %v458_v5  ;;  %v3665_v11 = vcombine.low %v454_v4, %v458_v5  ;;  %v462_v12 = vld [vmem:[%s5587_s3 + $0x7c0] sm:$0xff]  ;;  %v228_v4 = vld [vmem:[%s5587_s3 + $0x70] sm:$0xff] }
  0x43   :  { %1817 = vmatpush1.bf16.msra.mxu1 %v3521_v49  ;;  %1862 = vmatpush1.bf16.msra.mxu0 %v3657_v3  ;;  %v466_v13 = vld [vmem:[%s5587_s3 + $0x7e0] sm:$0xff]  ;;  %v224_v3 = vld [vmem:[%s5587_s3 + $0x50] sm:$0xff] }
  0x44   :  { %1818 = vmatprep.subr.bf16.mxu1 %v3530_v50  ;;  %1863 = vmatprep.subr.bf16.mxu0 %v3666_v7  ;;  %v3674_v14 = vcombine.high %v462_v12, %v466_v13  ;;  %v3673_v15 = vcombine.low %v462_v12, %v466_v13  ;;  %v50_v23 = vld [vmem:[%s5588_s2] sm:$0xf]  ;;  %v3436_v50 = vcombine.high %v223_v43, %v227_v44  ;;  %v236_v12 = vld [vmem:[%s5587_s3 + $0xb0] sm:$0xff] }
  0x45   :  { %v55_v25 = vrot.slane %v50_v23, %v4479_v22  ;;  %v59_v26 = vrot.slane %v50_v23, %v4485_v24  ;;  %v63_v39 = vrot.slane %v50_v23, %v62_v30  ;;  %v67_v42 = vrot.slane %v50_v23, %v66_v33  ;;  %v259_v23 = vld [vmem:[%s5587_s3 + $0x168] sm:$0xff] }
  0x47   :  { %1819 = vmatpush1.bf16.msra.mxu1 %v3529_v51  ;;  %1864 = vmatpush1.bf16.msra.mxu0 %v3665_v11  ;;  %v232_v11 = vld [vmem:[%s5587_s3 + $0x90] sm:$0xff] }
  0x48   :  { %1820 = vmatprep.subr.bf16.mxu1 %v3538_v55  ;;  %1865 = vmatprep.subr.bf16.mxu0 %v3674_v14  ;;  %v3437_v14 = vcombine.low %v224_v3, %v228_v4 }
  0x4b   :  { %1821 = vmatpush1.bf16.msra.mxu1 %v3537_v57  ;;  %1866 = vmatpush1.bf16.msra.mxu0 %v3673_v15 }
  0x4c   :  { %1822 = vmatprep.subr.bf16.mxu1 %v3546_v63  ;;  %1964 = vmatprep.subr.bf16.mxu0 %v3430_v19  ;;  %v3446_v19 = vcombine.high %v232_v11, %v236_v12 }
  0x4f   :  { %1823 = vmatpush1.bf16.msra.mxu1 %v3545_v1  ;;  %v243_v1 = vld [vmem:[%s5587_s3 + $0xe8] sm:$0xff] }
  0x50   :  { %1878 = vmatprep.subr.bf16.mxu1 %v3428_v10  ;;  %v3452_v7 = vcombine.high %v239_v0, %v243_v1  ;;  %v251_v10 = vld [vmem:[%s5587_s3 + $0x128] sm:$0xff]  ;;  %v3451_v13 = vcombine.low %v239_v0, %v243_v1 }
  0x51   :  { %v3460_v15 = vcombine.high %v247_v8, %v251_v10  ;;  %v295_v0 = vld [vmem:[%s5587_s3 + $0x288] sm:$0xff] }
  0x52   :  { %v299_v1 = vld [vmem:[%s5587_s3 + $0x2a8] sm:$0xff] }
  0xdd   :  { %v150_v27 = vpop.f32.mrb[0].mxu1 }
  0xde   :  { %v151_v28 = vadd.f32 %v150_v27, %v55_v25  ;;  %v152_v29 = vpop.f32.mrb[1].mxu1  ;;  %v3454_v27 = vcombine.high %v240_v16, %v244_v17 }
  0xdf   :  { %v153_v31 = vadd.f32 %v152_v29, %v59_v26  ;;  %v154_v32 = vpop.f32.mrb[2].mxu1  ;;  %v267_v29 = vld [vmem:[%s5587_s3 + $0x1a8] sm:$0xff] }
  0xe0   :  { %v155_v34 = vadd.f32 %v154_v32, %v55_v25  ;;  %v156_v35 = vpop.f32.mrb[3].mxu1  ;;  %v202_v37 = vmax.f32 %v151_v28, 0.0  ;;  %v3445_v25 = vcombine.low %v232_v11, %v236_v12  ;;  %v263_v28 = vld [vmem:[%s5587_s3 + $0x188] sm:$0xff]  ;;  %v252_v32 = vld [vmem:[%s5587_s3 + $0x130] sm:$0xff] }
  0xe1   :  { %v157_v36 = vadd.f32 %v156_v35, %v59_v26  ;;  %v203_v40 = vmax.f32 %v153_v31, 0.0  ;;  %v3468_v26 = vcombine.high %v255_v20, %v259_v23  ;;  %v248_v31 = vld [vmem:[%s5587_s3 + $0x110] sm:$0xff]  ;;  %v3453_v35 = vcombine.low %v240_v16, %v244_v17  ;;  %v307_v11 = vld [vmem:[%s5587_s3 + $0x2e8] sm:$0xff] }
  0xe2   :  { %v206_v38 = vmax.f32 %v155_v34, 0.0  ;;  %v3467_v34 = vcombine.low %v255_v20, %v259_v23  ;;  %v3461_v43 = vcombine.low %v248_v31, %v252_v32  ;;  %v288_v12 = vld [vmem:[%s5587_s3 + $0x250] sm:$0xff]  ;;  %v315_v20 = vld [vmem:[%s5587_s3 + $0x328] sm:$0xff] }
  0xe3   :  { %v207_v41 = vmax.f32 %v157_v36, 0.0  ;;  %v3476_v36 = vcombine.high %v263_v28, %v267_v29  ;;  %v296_v17 = vld [vmem:[%s5587_s3 + $0x290] sm:$0xff] }
  0xe4   :  { %v4501_v45 = vpack.c.bf16 %v206_v38, %v202_v37  ;;  %v3462_v37 = vcombine.high %v248_v31, %v252_v32  ;;  %v271_v38 = vld [vmem:[%s5587_s3 + $0x1c8] sm:$0xff] }
  0xe5   :  { %v4503_v46 = vpack.c.bf16 %v207_v41, %v203_v40  ;;  %v193_v47 = vpop.f32.mrb[4].mxu1  ;;  %v256_v40 = vld [vmem:[%s5587_s3 + $0x150] sm:$0xff] }
  0xe6   :  { %v194_v48 = vadd.f32 %v193_v47, %v63_v39  ;;  %v195_v49 = vpop.f32.mrb[5].mxu1  ;;  %v260_v41 = vld [vmem:[%s5587_s3 + $0x170] sm:$0xff] }
  0xe7   :  { %v196_v51 = vadd.f32 %v195_v49, %v67_v42  ;;  %v197_v52 = vpop.f32.mrb[6].mxu1  ;;  %1824 = vmatprep.mubr.bf16.mxu1 %v4503_v46  ;;  %v3470_v47 = vcombine.high %v256_v40, %v260_v41  ;;  %v283_v49 = vld [vmem:[%s5587_s3 + $0x228] sm:$0xff]  ;;  %v3469_v53 = vcombine.low %v256_v40, %v260_v41 }
  0xe8   :  { %v204_v55 = vmax.f32 %v194_v48, 0.0  ;;  %v198_v56 = vadd.f32 %v197_v52, %v63_v39  ;;  %v199_v57 = vpop.f32.mrb[7].mxu1  ;;  %1825 = vmatmul.mubr.bf16.vlgmr.msra.gmra.mrb[8].mxu1 %v4501_v45  ;;  %v275_v39 = vld [vmem:[%s5587_s3 + $0x1e8] sm:$0xff] }
  0xe9   :  { %v205_v58 = vmax.f32 %v196_v51, 0.0  ;;  %v200_v59 = vadd.f32 %v199_v57, %v67_v42  ;;  %1879 = vmatpush1.bf16.msra.mxu1 %v3427_v9  ;;  %1910 = vmatprep.mubr.bf16.mxu1 %v4503_v46  ;;  %v3438_v9 = vcombine.high %v224_v3, %v228_v4  ;;  %v3475_v42 = vcombine.low %v263_v28, %v267_v29  ;;  %v279_v48 = vld [vmem:[%s5587_s3 + $0x208] sm:$0xff]  ;;  %v268_v51 = vld [vmem:[%s5587_s3 + $0x1b0] sm:$0xff] }
  0xea   :  { %v208_v61 = vmax.f32 %v198_v56, 0.0  ;;  %1880 = vmatprep.subr.bf16.mxu1 %v3436_v50  ;;  %v3484_v44 = vcombine.high %v271_v38, %v275_v39  ;;  %v264_v50 = vld [vmem:[%s5587_s3 + $0x190] sm:$0xff]  ;;  %v3483_v52 = vcombine.low %v271_v38, %v275_v39  ;;  %v3492_v54 = vcombine.high %v279_v48, %v283_v49  ;;  %v287_v56 = vld [vmem:[%s5587_s3 + $0x248] sm:$0xff] }
  0xeb   :  { %v209_v63 = vmax.f32 %v200_v59, 0.0  ;;  %v291_v57 = vld [vmem:[%s5587_s3 + $0x268] sm:$0xff]  ;;  %v276_v59 = vld [vmem:[%s5587_s3 + $0x1f0] sm:$0xff] }
  0xec   :  { %v4520_v2 = vpack.c.bf16 %v208_v61, %v204_v55  ;;  %v3478_v55 = vcombine.high %v264_v50, %v268_v51  ;;  %v3477_v61 = vcombine.low %v264_v50, %v268_v51  ;;  %v280_v3 = vld [vmem:[%s5587_s3 + $0x210] sm:$0xff]  ;;  %v323_v28 = vld [vmem:[%s5587_s3 + $0x368] sm:$0xff] }
  0xed   :  { %v4528_v5 = vpack.c.bf16 %v209_v63, %v205_v58  ;;  %1881 = vmatpush1.bf16.msra.mxu1 %v3435_v60  ;;  %v272_v58 = vld [vmem:[%s5587_s3 + $0x1d0] sm:$0xff]  ;;  %v3491_v60 = vcombine.low %v279_v48, %v283_v49  ;;  %v331_v38 = vld [vmem:[%s5587_s3 + $0x3a8] sm:$0xff] }
  0xee   :  { %1882 = vmatprep.subr.bf16.mxu1 %v3444_v62  ;;  %v3500_v62 = vcombine.high %v287_v56, %v291_v57  ;;  %v3486_v63 = vcombine.high %v272_v58, %v276_v59  ;;  %v284_v4 = vld [vmem:[%s5587_s3 + $0x230] sm:$0xff]  ;;  %v339_v48 = vld [vmem:[%s5587_s3 + $0x3e8] sm:$0xff] }
  0xef   :  { %1867 = vmatprep.mubr.bf16.mxu0 %v4528_v5  ;;  %v304_v29 = vld [vmem:[%s5587_s3 + $0x2d0] sm:$0xff] }
  0xf0   :  { %1868 = vmatmul.mubr.bf16.vlgmr.msra.gmra.mrb[0].mxu0 %v4520_v2  ;;  %v312_v39 = vld [vmem:[%s5587_s3 + $0x310] sm:$0xff] }
  0xf1   :  { %1883 = vmatpush1.bf16.msra.mxu1 %v3443_v6  ;;  %1965 = vmatpush1.bf16.msra.mxu0 %v3429_v18  ;;  %v3459_v18 = vcombine.low %v247_v8, %v251_v10  ;;  %v3499_v6 = vcombine.low %v287_v56, %v291_v57  ;;  %v3508_v8 = vcombine.high %v295_v0, %v299_v1  ;;  %v303_v10 = vld [vmem:[%s5587_s3 + $0x2c8] sm:$0xff]  ;;  %v320_v49 = vld [vmem:[%s5587_s3 + $0x350] sm:$0xff] }
  0xf2   :  { %1996 = vmatprep.mubr.bf16.mxu0 %v4503_v46  ;;  %1884 = vmatprep.subr.bf16.mxu1 %v3452_v7  ;;  %v3485_v7 = vcombine.low %v272_v58, %v276_v59  ;;  %v3516_v23 = vcombine.high %v303_v10, %v307_v11  ;;  %v347_v56 = vld [vmem:[%s5587_s3 + $0x428] sm:$0xff]  ;;  %v328_v57 = vld [vmem:[%s5587_s3 + $0x390] sm:$0xff] }
  0xf3   :  { %1966 = vmatprep.subr.bf16.mxu0 %v3438_v9  ;;  %v3494_v9 = vcombine.high %v280_v3, %v284_v4 }
  0xf5   :  { %1885 = vmatpush1.bf16.msra.mxu1 %v3451_v13  ;;  %1967 = vmatpush1.bf16.msra.mxu0 %v3437_v14  ;;  %v292_v13 = vld [vmem:[%s5587_s3 + $0x270] sm:$0xff]  ;;  %v3507_v14 = vcombine.low %v295_v0, %v299_v1  ;;  %v355_v0 = vld [vmem:[%s5587_s3 + $0x468] sm:$0xff] }
  0xf6   :  { %1886 = vmatprep.subr.bf16.mxu1 %v3460_v15  ;;  %1968 = vmatprep.subr.bf16.mxu0 %v3446_v19  ;;  %v3493_v15 = vcombine.low %v280_v3, %v284_v4  ;;  %v311_v19 = vld [vmem:[%s5587_s3 + $0x308] sm:$0xff]  ;;  %v3502_v16 = vcombine.high %v288_v12, %v292_v13  ;;  %v336_v4 = vld [vmem:[%s5587_s3 + $0x3d0] sm:$0xff] }
  0xf7   :  { %v3524_v31 = vcombine.high %v311_v19, %v315_v20 }
  0xf9   :  { %1887 = vmatpush1.bf16.msra.mxu1 %v3459_v18  ;;  %1969 = vmatpush1.bf16.msra.mxu0 %v3445_v25  ;;  %v300_v18 = vld [vmem:[%s5587_s3 + $0x2b0] sm:$0xff]  ;;  %v3515_v25 = vcombine.low %v303_v10, %v307_v11 }
  0xfa   :  { %1888 = vmatprep.subr.bf16.mxu1 %v3468_v26  ;;  %1970 = vmatprep.subr.bf16.mxu0 %v3454_v27  ;;  %v3501_v26 = vcombine.low %v288_v12, %v292_v13  ;;  %v319_v27 = vld [vmem:[%s5587_s3 + $0x348] sm:$0xff]  ;;  %v3510_v32 = vcombine.high %v296_v17, %v300_v18  ;;  %v344_v12 = vld [vmem:[%s5587_s3 + $0x410] sm:$0xff] }
  0xfb   :  { %v3532_v40 = vcombine.high %v319_v27, %v323_v28  ;;  %v348_v13 = vld [vmem:[%s5587_s3 + $0x430] sm:$0xff] }
  0xfd   :  { %1889 = vmatpush1.bf16.msra.mxu1 %v3467_v34  ;;  %1971 = vmatpush1.bf16.msra.mxu0 %v3453_v35  ;;  %v308_v34 = vld [vmem:[%s5587_s3 + $0x2f0] sm:$0xff]  ;;  %v3523_v35 = vcombine.low %v311_v19, %v315_v20 }
  0xfe   :  { %1890 = vmatprep.subr.bf16.mxu1 %v3476_v36  ;;  %1972 = vmatprep.subr.bf16.mxu0 %v3462_v37  ;;  %v3509_v36 = vcombine.low %v296_v17, %v300_v18  ;;  %v327_v37 = vld [vmem:[%s5587_s3 + $0x388] sm:$0xff]  ;;  %v3518_v41 = vcombine.high %v304_v29, %v308_v34  ;;  %v352_v17 = vld [vmem:[%s5587_s3 + $0x450] sm:$0xff] }
  0xff   :  { %v3540_v50 = vcombine.high %v327_v37, %v331_v38  ;;  %v356_v18 = vld [vmem:[%s5587_s3 + $0x470] sm:$0xff] }
 0x101   :  { %1891 = vmatpush1.bf16.msra.mxu1 %v3475_v42  ;;  %1973 = vmatpush1.bf16.msra.mxu0 %v3461_v43  ;;  %v316_v42 = vld [vmem:[%s5587_s3 + $0x330] sm:$0xff]  ;;  %v3531_v43 = vcombine.low %v319_v27, %v323_v28  ;;  %v375_v27 = vld [vmem:[%s5587_s3 + $0x508] sm:$0xff] }
 0x102   :  { %1892 = vmatprep.subr.bf16.mxu1 %v3484_v44  ;;  %1974 = vmatprep.subr.bf16.mxu0 %v3470_v47  ;;  %v3517_v44 = vcombine.low %v304_v29, %v308_v34  ;;  %v335_v47 = vld [vmem:[%s5587_s3 + $0x3c8] sm:$0xff]  ;;  %v3526_v51 = vcombine.high %v312_v39, %v316_v42  ;;  %v3557_v29 = vcombine.low %v344_v12, %v348_v13 }
 0x103   :  { %v3548_v58 = vcombine.high %v335_v47, %v339_v48  ;;  %v379_v28 = vld [vmem:[%s5587_s3 + $0x528] sm:$0xff] }
 0x105   :  { %1893 = vmatpush1.bf16.msra.mxu1 %v3483_v52  ;;  %1975 = vmatpush1.bf16.msra.mxu0 %v3469_v53  ;;  %v324_v52 = vld [vmem:[%s5587_s3 + $0x370] sm:$0xff]  ;;  %v3539_v53 = vcombine.low %v327_v37, %v331_v38  ;;  %v383_v37 = vld [vmem:[%s5587_s3 + $0x548] sm:$0xff] }
 0x106   :  { %1894 = vmatprep.subr.bf16.mxu1 %v3492_v54  ;;  %1976 = vmatprep.subr.bf16.mxu0 %v3478_v55  ;;  %v3525_v54 = vcombine.low %v312_v39, %v316_v42  ;;  %v343_v55 = vld [vmem:[%s5587_s3 + $0x408] sm:$0xff]  ;;  %v3534_v59 = vcombine.high %v320_v49, %v324_v52  ;;  %v3565_v39 = vcombine.low %v352_v17, %v356_v18  ;;  %v372_v42 = vld [vmem:[%s5587_s3 + $0x4f0] sm:$0xff] }
 0x107   :  { %v3556_v1 = vcombine.high %v343_v55, %v347_v56  ;;  %v387_v38 = vld [vmem:[%s5587_s3 + $0x568] sm:$0xff] }
 0x109   :  { %1895 = vmatpush1.bf16.msra.mxu1 %v3491_v60  ;;  %1977 = vmatpush1.bf16.msra.mxu0 %v3477_v61  ;;  %v332_v60 = vld [vmem:[%s5587_s3 + $0x3b0] sm:$0xff]  ;;  %v3547_v61 = vcombine.low %v335_v47, %v339_v48  ;;  %v391_v47 = vld [vmem:[%s5587_s3 + $0x588] sm:$0xff] }
 0x10a   :  { %1896 = vmatprep.subr.bf16.mxu1 %v3500_v62  ;;  %1978 = vmatprep.subr.bf16.mxu0 %v3486_v63  ;;  %v3533_v62 = vcombine.low %v320_v49, %v324_v52  ;;  %v351_v63 = vld [vmem:[%s5587_s3 + $0x448] sm:$0xff]  ;;  %v3542_v3 = vcombine.high %v328_v57, %v332_v60  ;;  %v3541_v10 = vcombine.low %v328_v57, %v332_v60  ;;  %v380_v52 = vld [vmem:[%s5587_s3 + $0x530] sm:$0xff] }
 0x10b   :  { %v3564_v11 = vcombine.high %v351_v63, %v355_v0  ;;  %v395_v48 = vld [vmem:[%s5587_s3 + $0x5a8] sm:$0xff]  ;;  %v388_v60 = vld [vmem:[%s5587_s3 + $0x570] sm:$0xff] }
 0x10c   :  { %v3604_v57 = vcombine.high %v391_v47, %v395_v48 }
 0x10d   :  { %1897 = vmatpush1.bf16.msra.mxu1 %v3499_v6  ;;  %1979 = vmatpush1.bf16.msra.mxu0 %v3485_v7  ;;  %v340_v6 = vld [vmem:[%s5587_s3 + $0x3f0] sm:$0xff]  ;;  %v3555_v7 = vcombine.low %v343_v55, %v347_v56  ;;  %v399_v55 = vld [vmem:[%s5587_s3 + $0x5c8] sm:$0xff] }
 0x10e   :  { %1898 = vmatprep.subr.bf16.mxu1 %v3508_v8  ;;  %1980 = vmatprep.subr.bf16.mxu0 %v3494_v9  ;;  %v359_v8 = vld [vmem:[%s5587_s3 + $0x488] sm:$0xff]  ;;  %v3549_v19 = vcombine.low %v336_v4, %v340_v6 }
 0x10f   :  { %v363_v9 = vld [vmem:[%s5587_s3 + $0x4a8] sm:$0xff] }
 0x110   :  { %v3572_v20 = vcombine.high %v359_v8, %v363_v9 }
 0x111   :  { %1899 = vmatpush1.bf16.msra.mxu1 %v3507_v14  ;;  %1981 = vmatpush1.bf16.msra.mxu0 %v3493_v15  ;;  %v3550_v14 = vcombine.high %v336_v4, %v340_v6  ;;  %v3563_v15 = vcombine.low %v351_v63, %v355_v0  ;;  %v392_v4 = vld [vmem:[%s5587_s3 + $0x590] sm:$0xff] }
 0x112   :  { %1900 = vmatprep.subr.bf16.mxu1 %v3516_v23  ;;  %1982 = vmatprep.subr.bf16.mxu0 %v3502_v16  ;;  %v367_v23 = vld [vmem:[%s5587_s3 + $0x4c8] sm:$0xff] }
 0x113   :  { %v371_v16 = vld [vmem:[%s5587_s3 + $0x4e8] sm:$0xff] }
 0x114   :  { %v3580_v34 = vcombine.high %v367_v23, %v371_v16 }
 0x115   :  { %1901 = vmatpush1.bf16.msra.mxu1 %v3515_v25  ;;  %1983 = vmatpush1.bf16.msra.mxu0 %v3501_v26  ;;  %v3558_v25 = vcombine.high %v344_v12, %v348_v13  ;;  %v3571_v26 = vcombine.low %v359_v8, %v363_v9  ;;  %v415_v9 = vld [vmem:[%s5587_s3 + $0x648] sm:$0xff]  ;;  %v400_v13 = vld [vmem:[%s5587_s3 + $0x5d0] sm:$0xff] }
 0x116   :  { %1902 = vmatprep.subr.bf16.mxu1 %v3524_v31  ;;  %1984 = vmatprep.subr.bf16.mxu0 %v3510_v32  ;;  %v360_v31 = vld [vmem:[%s5587_s3 + $0x490] sm:$0xff] }
 0x117   :  { %v364_v32 = vld [vmem:[%s5587_s3 + $0x4b0] sm:$0xff] }
 0x118   :  { %v3573_v49 = vcombine.low %v360_v31, %v364_v32 }
 0x119   :  { %1903 = vmatpush1.bf16.msra.mxu1 %v3523_v35  ;;  %1985 = vmatpush1.bf16.msra.mxu0 %v3509_v36  ;;  %v3566_v35 = vcombine.high %v352_v17, %v356_v18  ;;  %v3579_v36 = vcombine.low %v367_v23, %v371_v16  ;;  %v423_v16 = vld [vmem:[%s5587_s3 + $0x688] sm:$0xff]  ;;  %v408_v18 = vld [vmem:[%s5587_s3 + $0x610] sm:$0xff] }
 0x11a   :  { %1904 = vmatprep.subr.bf16.mxu1 %v3532_v40  ;;  %1986 = vmatprep.subr.bf16.mxu0 %v3518_v41  ;;  %v3588_v40 = vcombine.high %v375_v27, %v379_v28  ;;  %v368_v41 = vld [vmem:[%s5587_s3 + $0x4d0] sm:$0xff]  ;;  %v427_v17 = vld [vmem:[%s5587_s3 + $0x6a8] sm:$0xff] }
 0x11b   :  { %v3581_v56 = vcombine.low %v368_v41, %v372_v42 }
 0x11d   :  { %1905 = vmatpush1.bf16.msra.mxu1 %v3531_v43  ;;  %1987 = vmatpush1.bf16.msra.mxu0 %v3517_v44  ;;  %v3574_v43 = vcombine.high %v360_v31, %v364_v32  ;;  %v3587_v44 = vcombine.low %v375_v27, %v379_v28  ;;  %v431_v31 = vld [vmem:[%s5587_s3 + $0x6c8] sm:$0xff] }
 0x11e   :  { %1906 = vmatprep.subr.bf16.mxu1 %v3540_v50  ;;  %1988 = vmatprep.subr.bf16.mxu0 %v3526_v51  ;;  %v3596_v50 = vcombine.high %v383_v37, %v387_v38  ;;  %v376_v51 = vld [vmem:[%s5587_s3 + $0x510] sm:$0xff]  ;;  %v435_v32 = vld [vmem:[%s5587_s3 + $0x6e8] sm:$0xff] }
 0x11f   :  { %v3589_v63 = vcombine.low %v376_v51, %v380_v52 }
 0x121   :  { %1907 = vmatpush1.bf16.msra.mxu1 %v3539_v53  ;;  %1989 = vmatpush1.bf16.msra.mxu0 %v3525_v54  ;;  %v3582_v53 = vcombine.high %v368_v41, %v372_v42  ;;  %v3595_v54 = vcombine.low %v383_v37, %v387_v38  ;;  %v3635_v37 = vcombine.low %v423_v16, %v427_v17  ;;  %v439_v41 = vld [vmem:[%s5587_s3 + $0x708] sm:$0xff] }
 0x122   :  { %1908 = vmatprep.subr.bf16.mxu1 %v3548_v58  ;;  %1990 = vmatprep.subr.bf16.mxu0 %v3534_v59  ;;  %v403_v58 = vld [vmem:[%s5587_s3 + $0x5e8] sm:$0xff]  ;;  %v384_v59 = vld [vmem:[%s5587_s3 + $0x550] sm:$0xff] }
 0x123   :  { %v3612_v0 = vcombine.high %v399_v55, %v403_v58  ;;  %v3598_v6 = vcombine.high %v384_v59, %v388_v60  ;;  %v3611_v8 = vcombine.low %v399_v55, %v403_v58  ;;  %v443_v42 = vld [vmem:[%s5587_s3 + $0x728] sm:$0xff] }
 0x124   :  { %v3651_v55 = vcombine.low %v439_v41, %v443_v42 }
 0x125   :  { %1909 = vmatpush1.bf16.msra.mxu1 %v3547_v61  ;;  %1991 = vmatpush1.bf16.msra.mxu0 %v3533_v62  ;;  %v3590_v61 = vcombine.high %v376_v51, %v380_v52  ;;  %v3603_v62 = vcombine.low %v391_v47, %v395_v48  ;;  %v3643_v47 = vcombine.low %v431_v31, %v435_v32  ;;  %v447_v51 = vld [vmem:[%s5587_s3 + $0x748] sm:$0xff] }
 0x126   :  { %1921 = vmatprep.subr.bf16.mxu1 %v3556_v1  ;;  %1992 = vmatprep.subr.bf16.mxu0 %v3542_v3  ;;  %v407_v1 = vld [vmem:[%s5587_s3 + $0x608] sm:$0xff] }
 0x127   :  { %v411_v3 = vld [vmem:[%s5587_s3 + $0x628] sm:$0xff] }
 0x128   :  { %1911 = vmatmul.mubr.bf16.vlgmr.msra.gmra.mrb[12].mxu1 %v4501_v45  ;;  %v3620_v12 = vcombine.high %v407_v1, %v411_v3  ;;  %v451_v52 = vld [vmem:[%s5587_s3 + $0x768] sm:$0xff] }
 0x129   :  { %1922 = vmatpush1.bf16.msra.mxu1 %v3555_v7  ;;  %1953 = vmatprep.mubr.bf16.mxu1 %v4528_v5  ;;  %v396_v7 = vld [vmem:[%s5587_s3 + $0x5b0] sm:$0xff] }
 0x12a   :  { %1993 = vmatpush1.bf16.msra.mxu0 %v3541_v10  ;;  %1923 = vmatprep.subr.bf16.mxu1 %v3564_v11  ;;  %v419_v10 = vld [vmem:[%s5587_s3 + $0x668] sm:$0xff]  ;;  %v3597_v11 = vcombine.low %v384_v59, %v388_v60 }
 0x12b   :  { %1994 = vmatprep.subr.bf16.mxu0 %v3550_v14  ;;  %v404_v14 = vld [vmem:[%s5587_s3 + $0x5f0] sm:$0xff]  ;;  %v3628_v23 = vcombine.high %v415_v9, %v419_v10  ;;  %v3627_v27 = vcombine.low %v415_v9, %v419_v10  ;;  %v455_v59 = vld [vmem:[%s5587_s3 + $0x788] sm:$0xff] }
 0x12c   :  { %v3613_v28 = vcombine.low %v400_v13, %v404_v14  ;;  %v459_v60 = vld [vmem:[%s5587_s3 + $0x7a8] sm:$0xff] }
 0x12d   :  { %1924 = vmatpush1.bf16.msra.mxu1 %v3563_v15  ;;  %v3606_v15 = vcombine.high %v392_v4, %v396_v7  ;;  %v3667_v9 = vcombine.low %v455_v59, %v459_v60 }
 0x12e   :  { %1995 = vmatpush1.bf16.msra.mxu0 %v3549_v19  ;;  %1925 = vmatprep.subr.bf16.mxu1 %v3572_v20  ;;  %v3619_v19 = vcombine.low %v407_v1, %v411_v3  ;;  %v3605_v20 = vcombine.low %v392_v4, %v396_v7  ;;  %v3668_v1 = vcombine.high %v455_v59, %v459_v60  ;;  %v463_v4 = vld [vmem:[%s5587_s3 + $0x7c8] sm:$0xff]  ;;  %v448_v7 = vld [vmem:[%s5587_s3 + $0x750] sm:$0xff]  ;;  %v269_v59 = vld [vmem:[%s5587_s3 + $0x1b8] sm:$0xff] }
 0x12f   :  { %2007 = vmatprep.subr.bf16.mxu0 %v3558_v25  ;;  %v3614_v25 = vcombine.high %v400_v13, %v404_v14  ;;  %v217_v13 = vld [vmem:[%s5587_s3 + $0x18] sm:$0xff] }
 0x130   :  { %v221_v14 = vld [vmem:[%s5587_s3 + $0x38] sm:$0xff] }
 0x131   :  { %1997 = vmatmul.mubr.bf16.vlgmr.msra.gmra.mrb[4].mxu0 %v4501_v45  ;;  %1926 = vmatpush1.bf16.msra.mxu1 %v3571_v26  ;;  %v412_v26 = vld [vmem:[%s5587_s3 + $0x630] sm:$0xff] }
 0x132   :  { %2008 = vmatpush1.bf16.msra.mxu0 %v3557_v29  ;;  %2039 = vmatprep.mubr.bf16.mxu0 %v4528_v5  ;;  %v3636_v29 = vcombine.high %v423_v16, %v427_v17  ;;  %v3621_v38 = vcombine.low %v408_v18, %v412_v26  ;;  %v3432_v16 = vcombine.high %v217_v13, %v221_v14  ;;  %v3960_v60 = vld [vmem:[%s5589_s5 + $0x34] ss:$8 sps:$4 sm:$0xff]  }
 0x133   :  { %1927 = vmatprep.subr.bf16.mxu1 %v3580_v34  ;;  %2009 = vmatprep.subr.bf16.mxu0 %v3566_v35  ;;  %v416_v34 = vld [vmem:[%s5587_s3 + $0x650] sm:$0xff]  ;;  %v3622_v35 = vcombine.high %v408_v18, %v412_v26  ;;  %v225_v18 = vld [vmem:[%s5587_s3 + $0x58] sm:$0xff] }
 0x134   :  { %v464_v26 = vld [vmem:[%s5587_s3 + $0x7d0] sm:$0xff] }
 0x135   :  { %1928 = vmatpush1.bf16.msra.mxu1 %v3579_v36  ;;  %v420_v36 = vld [vmem:[%s5587_s3 + $0x670] sm:$0xff] }
 0x136   :  { %2010 = vmatpush1.bf16.msra.mxu0 %v3565_v39  ;;  %1929 = vmatprep.subr.bf16.mxu1 %v3588_v40  ;;  %v3644_v39 = vcombine.high %v431_v31, %v435_v32  ;;  %v3630_v40 = vcombine.high %v416_v34, %v420_v36  ;;  %v3629_v48 = vcombine.low %v416_v34, %v420_v36  ;;  %v233_v34 = vld [vmem:[%s5587_s3 + $0x98] sm:$0xff] }
 0x137   :  { %2011 = vmatprep.subr.bf16.mxu0 %v3574_v43  ;;  %v424_v43 = vld [vmem:[%s5587_s3 + $0x690] sm:$0xff] }
 0x139   :  { %1930 = vmatpush1.bf16.msra.mxu1 %v3587_v44  ;;  %v428_v44 = vld [vmem:[%s5587_s3 + $0x6b0] sm:$0xff] }
 0x13a   :  { %2012 = vmatpush1.bf16.msra.mxu0 %v3573_v49  ;;  %1931 = vmatprep.subr.bf16.mxu1 %v3596_v50  ;;  %v3652_v49 = vcombine.high %v439_v41, %v443_v42  ;;  %v3638_v50 = vcombine.high %v424_v43, %v428_v44  ;;  %v3951_v41 = vld [vmem:[%s5589_s5 + $0x4] ss:$8 sps:$4 sm:$0xff]  }
 0x13b   :  { %2013 = vmatprep.subr.bf16.mxu0 %v3582_v53  ;;  %v432_v53 = vld [vmem:[%s5587_s3 + $0x6d0] sm:$0xff] }
 0x13d   :  { %1932 = vmatpush1.bf16.msra.mxu1 %v3595_v54  ;;  %v436_v54 = vld [vmem:[%s5587_s3 + $0x6f0] sm:$0xff] }
 0x13e   :  { %2014 = vmatpush1.bf16.msra.mxu0 %v3581_v56  ;;  %1933 = vmatprep.subr.bf16.mxu1 %v3604_v57  ;;  %v3637_v56 = vcombine.low %v424_v43, %v428_v44  ;;  %v3660_v57 = vcombine.high %v447_v51, %v451_v52  ;;  %v3646_v58 = vcombine.high %v432_v53, %v436_v54  ;;  %v3949_v43 = vld [vmem:[%s5589_s5] ss:$8 sps:$4 sm:$0xff]   ;;  %v249_v44 = vld [vmem:[%s5587_s3 + $0x118] sm:$0xff] }
 0x13f   :  { %2015 = vmatprep.subr.bf16.mxu0 %v3590_v61  ;;  %v440_v61 = vld [vmem:[%s5587_s3 + $0x710] sm:$0xff] }
 0x141   :  { %1934 = vmatpush1.bf16.msra.mxu1 %v3603_v62  ;;  %v444_v62 = vld [vmem:[%s5587_s3 + $0x730] sm:$0xff] }
 0x142   :  { %2016 = vmatpush1.bf16.msra.mxu0 %v3589_v63  ;;  %1935 = vmatprep.subr.bf16.mxu1 %v3612_v0  ;;  %v3659_v63 = vcombine.low %v447_v51, %v451_v52  ;;  %v3645_v0 = vcombine.low %v432_v53, %v436_v54  ;;  %v3654_v3 = vcombine.high %v440_v61, %v444_v62  ;;  %v3952_v51 = vld [vmem:[%s5589_s5 + $0x10] ss:$8 sps:$4 sm:$0xff]   ;;  %v3957_v54 = vld [vmem:[%s5589_s5 + $0x24] ss:$8 sps:$4 sm:$0xff]  }
 0x143   :  { %2017 = vmatprep.subr.bf16.mxu0 %v3598_v6  ;;  %v467_v6 = vld [vmem:[%s5587_s3 + $0x7e8] sm:$0xff]  ;;  %v3653_v10 = vcombine.low %v440_v61, %v444_v62  ;;  %v257_v52 = vld [vmem:[%s5587_s3 + $0x158] sm:$0xff] }
 0x144   :  { %v261_v53 = vld [vmem:[%s5587_s3 + $0x178] sm:$0xff] }
 0x145   :  { %1936 = vmatpush1.bf16.msra.mxu1 %v3611_v8  ;;  %v452_v8 = vld [vmem:[%s5587_s3 + $0x770] sm:$0xff]  ;;  %v3471_v61 = vcombine.low %v257_v52, %v261_v53 }
 0x146   :  { %2018 = vmatpush1.bf16.msra.mxu0 %v3597_v11  ;;  %1937 = vmatprep.subr.bf16.mxu1 %v3620_v12  ;;  %v3676_v11 = vcombine.high %v463_v4, %v467_v6  ;;  %v3662_v12 = vcombine.high %v448_v7, %v452_v8 }
 0x147   :  { %2019 = vmatprep.subr.bf16.mxu0 %v3606_v15  ;;  %v456_v15 = vld [vmem:[%s5587_s3 + $0x790] sm:$0xff] }
 0x149   :  { %1938 = vmatpush1.bf16.msra.mxu1 %v3619_v19  ;;  %v460_v19 = vld [vmem:[%s5587_s3 + $0x7b0] sm:$0xff] }
 0x14a   :  { %2020 = vmatpush1.bf16.msra.mxu0 %v3605_v20  ;;  %1939 = vmatprep.subr.bf16.mxu1 %v3628_v23  ;;  %v3675_v20 = vcombine.low %v463_v4, %v467_v6  ;;  %v3661_v23 = vcombine.low %v448_v7, %v452_v8  ;;  %v3670_v17 = vcombine.high %v456_v15, %v460_v19  ;;  %v3961_v7 = vld [vmem:[%s5589_s5 + $0x40] ss:$8 sps:$4 sm:$0xff]   ;;  %v281_v8 = vld [vmem:[%s5587_s3 + $0x218] sm:$0xff] }
 0x14b   :  { %2021 = vmatprep.subr.bf16.mxu0 %v3614_v25  ;;  %v229_v25 = vld [vmem:[%s5587_s3 + $0x78] sm:$0xff] }
 0x14c   :  { %v3440_v31 = vcombine.high %v225_v18, %v229_v25  ;;  %v3439_v36 = vcombine.low %v225_v18, %v229_v25  ;;  %v301_v18 = vld [vmem:[%s5587_s3 + $0x2b8] sm:$0xff] }
 0x14d   :  { %1940 = vmatpush1.bf16.msra.mxu1 %v3627_v27  ;;  %v468_v27 = vld [vmem:[%s5587_s3 + $0x7f0] sm:$0xff] }
 0x14e   :  { %2022 = vmatpush1.bf16.msra.mxu0 %v3613_v28  ;;  %1941 = vmatprep.subr.bf16.mxu1 %v3636_v29  ;;  %v3431_v28 = vcombine.low %v217_v13, %v221_v14  ;;  %v3669_v29 = vcombine.low %v456_v15, %v460_v19  ;;  %v3678_v32 = vcombine.high %v464_v26, %v468_v27  ;;  %v3964_v13 = vld [vmem:[%s5589_s5 + $0x50] ss:$8 sps:$4 sm:$0xff]   ;;  %v3969_v19 = vld [vmem:[%s5589_s5 + $0x64] ss:$8 sps:$4 sm:$0xff]   ;;  %v3972_v25 = vld [vmem:[%s5589_s5 + $0x74] ss:$8 sps:$4 sm:$0xff]  }
 0x14f   :  { %2023 = vmatprep.subr.bf16.mxu0 %v3622_v35  ;;  %v237_v35 = vld [vmem:[%s5587_s3 + $0xb8] sm:$0xff] }
 0x150   :  { %v289_v14 = vld [vmem:[%s5587_s3 + $0x258] sm:$0xff] }
 0x151   :  { %1942 = vmatpush1.bf16.msra.mxu1 %v3635_v37  ;;  %v3677_v37 = vcombine.low %v464_v26, %v468_v27  ;;  %v293_v15 = vld [vmem:[%s5587_s3 + $0x278] sm:$0xff] }
 0x152   :  { %2024 = vmatpush1.bf16.msra.mxu0 %v3621_v38  ;;  %1943 = vmatprep.subr.bf16.mxu1 %v3644_v39  ;;  %v3448_v38 = vcombine.high %v233_v34, %v237_v35  ;;  %v241_v39 = vld [vmem:[%s5587_s3 + $0xd8] sm:$0xff]  ;;  %v3503_v26 = vcombine.low %v289_v14, %v293_v15 }
 0x153   :  { %2025 = vmatprep.subr.bf16.mxu0 %v3630_v40  ;;  %v245_v40 = vld [vmem:[%s5587_s3 + $0xf8] sm:$0xff] }
 0x154   :  { %v3456_v42 = vcombine.high %v241_v39, %v245_v40 }
 0x155   :  { %1944 = vmatpush1.bf16.msra.mxu1 %v3643_v47  ;;  %v253_v47 = vld [vmem:[%s5587_s3 + $0x138] sm:$0xff] }
 0x156   :  { %2026 = vmatpush1.bf16.msra.mxu0 %v3629_v48  ;;  %1945 = vmatprep.subr.bf16.mxu1 %v3652_v49  ;;  %v3954_v48 = vld [vmem:[%s5589_s5 + $0x14] ss:$8 sps:$4 sm:$0xff]   ;;  %v3455_v49 = vcombine.low %v241_v39, %v245_v40 }
 0x157   :  { %2027 = vmatprep.subr.bf16.mxu0 %v3638_v50  ;;  %v3464_v50 = vcombine.high %v249_v44, %v253_v47  ;;  %v3978_v39 = vld [vmem:[%s5589_s5 + $0x94] ss:$8 sps:$4 sm:$0xff]  }
 0x159   :  { %1946 = vmatpush1.bf16.msra.mxu1 %v3651_v55  ;;  %v3463_v55 = vcombine.low %v249_v44, %v253_v47  ;;  %v3981_v44 = vld [vmem:[%s5589_s5 + $0xa4] ss:$8 sps:$4 sm:$0xff]  }
 0x15a   :  { %2028 = vmatpush1.bf16.msra.mxu0 %v3637_v56  ;;  %1947 = vmatprep.subr.bf16.mxu1 %v3660_v57  ;;  %v3472_v56 = vcombine.high %v257_v52, %v261_v53  ;;  %v3955_v57 = vld [vmem:[%s5589_s5 + $0x20] ss:$8 sps:$4 sm:$0xff]   ;;  %v3984_v52 = vld [vmem:[%s5589_s5 + $0xb4] ss:$8 sps:$4 sm:$0xff]  }
 0x15b   :  { %2029 = vmatprep.subr.bf16.mxu0 %v3646_v58  ;;  %v265_v58 = vld [vmem:[%s5587_s3 + $0x198] sm:$0xff] }
 0x15c   :  { %v3480_v62 = vcombine.high %v265_v58, %v269_v59  ;;  %v3479_v4 = vcombine.low %v265_v58, %v269_v59  ;;  %v3987_v58 = vld [vmem:[%s5589_s5 + $0xc4] ss:$8 sps:$4 sm:$0xff]  }
 0x15d   :  { %1948 = vmatpush1.bf16.msra.mxu1 %v3659_v63  ;;  %v3958_v63 = vld [vmem:[%s5589_s5 + $0x30] ss:$8 sps:$4 sm:$0xff]  }
 0x15e   :  { %2030 = vmatpush1.bf16.msra.mxu0 %v3645_v0  ;;  %1949 = vmatprep.subr.bf16.mxu1 %v3668_v1  ;;  %v273_v0 = vld [vmem:[%s5587_s3 + $0x1d8] sm:$0xff] }
 0x15f   :  { %2031 = vmatprep.subr.bf16.mxu0 %v3654_v3  ;;  %v277_v1 = vld [vmem:[%s5587_s3 + $0x1f8] sm:$0xff]  ;;  %v3963_v3 = vld [vmem:[%s5589_s5 + $0x44] ss:$8 sps:$4 sm:$0xff]  }
 0x160   :  { %v3488_v6 = vcombine.high %v273_v0, %v277_v1 }
 0x161   :  { %1950 = vmatpush1.bf16.msra.mxu1 %v3667_v9  ;;  %v285_v9 = vld [vmem:[%s5587_s3 + $0x238] sm:$0xff] }
 0x162   :  { %2032 = vmatpush1.bf16.msra.mxu0 %v3653_v10  ;;  %1951 = vmatprep.subr.bf16.mxu1 %v3676_v11  ;;  %v3966_v10 = vld [vmem:[%s5589_s5 + $0x54] ss:$8 sps:$4 sm:$0xff]   ;;  %v3487_v11 = vcombine.low %v273_v0, %v277_v1 }
 0x163   :  { %2033 = vmatprep.subr.bf16.mxu0 %v3662_v12  ;;  %v3496_v12 = vcombine.high %v281_v8, %v285_v9  ;;  %v3990_v0 = vld [vmem:[%s5589_s5 + $0xd4] ss:$8 sps:$4 sm:$0xff]  }
 0x165   :  { %1952 = vmatpush1.bf16.msra.mxu1 %v3675_v20  ;;  %v3495_v20 = vcombine.low %v281_v8, %v285_v9  ;;  %v3993_v8 = vld [vmem:[%s5589_s5 + $0xe4] ss:$8 sps:$4 sm:$0xff]  }
 0x166   :  { %2034 = vmatpush1.bf16.msra.mxu0 %v3661_v23  ;;  %2050 = vmatprep.subr.bf16.mxu1 %v3432_v16  ;;  %v3504_v23 = vcombine.high %v289_v14, %v293_v15  ;;  %v3967_v16 = vld [vmem:[%s5589_s5 + $0x60] ss:$8 sps:$4 sm:$0xff]   ;;  %v3996_v14 = vld [vmem:[%s5589_s5 + $0xf4] ss:$8 sps:$4 sm:$0xff]  }
 0x167   :  { %2035 = vmatprep.subr.bf16.mxu0 %v3670_v17  ;;  %v297_v17 = vld [vmem:[%s5587_s3 + $0x298] sm:$0xff] }
 0x168   :  { %1954 = vmatmul.mubr.bf16.vlgmr.msra.gmra.mrb[12].mxu1 %v4520_v2  ;;  %v3512_v27 = vcombine.high %v297_v17, %v301_v18 }
 0x169   :  { %2051 = vmatpush1.bf16.msra.mxu1 %v3431_v28  ;;  %2082 = vmatprep.mubr.bf16.mxu1 %v4503_v46  ;;  %v3447_v46 = vcombine.low %v233_v34, %v237_v35  ;;  %v3970_v28 = vld [vmem:[%s5589_s5 + $0x70] ss:$8 sps:$4 sm:$0xff]   ;;  %v3511_v34 = vcombine.low %v297_v17, %v301_v18 }
 0x16a   :  { %2036 = vmatpush1.bf16.msra.mxu0 %v3669_v29  ;;  %2052 = vmatprep.subr.bf16.mxu1 %v3440_v31  ;;  %v305_v29 = vld [vmem:[%s5587_s3 + $0x2d8] sm:$0xff] }
 0x16b   :  { %2037 = vmatprep.subr.bf16.mxu0 %v3678_v32  ;;  %v309_v31 = vld [vmem:[%s5587_s3 + $0x2f8] sm:$0xff]  ;;  %v3975_v32 = vld [vmem:[%s5589_s5 + $0x84] ss:$8 sps:$4 sm:$0xff]  }
 0x16c   :  { %v3520_v35 = vcombine.high %v305_v29, %v309_v31  ;;  %v3519_v40 = vcombine.low %v305_v29, %v309_v31  ;;  %v377_v18 = vld [vmem:[%s5587_s3 + $0x518] sm:$0xff] }
 0x16d   :  { %2053 = vmatpush1.bf16.msra.mxu1 %v3439_v36  ;;  %v3973_v36 = vld [vmem:[%s5589_s5 + $0x80] ss:$8 sps:$4 sm:$0xff]   ;;  %v389_v29 = vld [vmem:[%s5587_s3 + $0x578] sm:$0xff] }
 0x16e   :  { %2038 = vmatpush1.bf16.msra.mxu0 %v3677_v37  ;;  %2054 = vmatprep.subr.bf16.mxu1 %v3448_v38  ;;  %v313_v37 = vld [vmem:[%s5587_s3 + $0x318] sm:$0xff] }
 0x16f   :  { %2940 = vmatprep.subr.bf16.mxu0 %v3951_v41  ;;  %v317_v38 = vld [vmem:[%s5587_s3 + $0x338] sm:$0xff] }
 0x170   :  { %v3528_v41 = vcombine.high %v313_v37, %v317_v38  ;;  %v3527_v47 = vcombine.low %v313_v37, %v317_v38  ;;  %v5133_v38 = vld [vmem:[%s5590_s4] sm:$0xff] }
 0x171   :  { %2040 = vmatmul.mubr.bf16.vlgmr.msra.gmra.mrb[4].mxu0 %v4520_v2  ;;  %2055 = vmatpush1.bf16.msra.mxu1 %v3447_v46  ;;  %v3976_v46 = vld [vmem:[%s5589_s5 + $0x90] ss:$8 sps:$4 sm:$0xff]  }
 0x172   :  { %2056 = vmatprep.subr.bf16.mxu1 %v3456_v42  ;;  %2941 = vmatpush1.bf16.msra.mxu0 %v3949_v43  ;;  %v321_v42 = vld [vmem:[%s5587_s3 + $0x358] sm:$0xff] }
 0x173   :  { %2942 = vmatprep.subr.bf16.mxu0 %v3954_v48  ;;  %v325_v43 = vld [vmem:[%s5587_s3 + $0x378] sm:$0xff] }
 0x174   :  { %v3536_v48 = vcombine.high %v321_v42, %v325_v43  ;;  %v3535_v53 = vcombine.low %v321_v42, %v325_v43 }
 0x175   :  { %2057 = vmatpush1.bf16.msra.mxu1 %v3455_v49  ;;  %v3979_v49 = vld [vmem:[%s5589_s5 + $0xa0] ss:$8 sps:$4 sm:$0xff]  }
 0x176   :  { %2058 = vmatprep.subr.bf16.mxu1 %v3464_v50  ;;  %2943 = vmatpush1.bf16.msra.mxu0 %v3952_v51  ;;  %v329_v50 = vld [vmem:[%s5587_s3 + $0x398] sm:$0xff] }
 0x177   :  { %2944 = vmatprep.subr.bf16.mxu0 %v3957_v54  ;;  %v333_v51 = vld [vmem:[%s5587_s3 + $0x3b8] sm:$0xff] }
 0x178   :  { %v3544_v54 = vcombine.high %v329_v50, %v333_v51  ;;  %v3543_v59 = vcombine.low %v329_v50, %v333_v51  ;;  %v409_v50 = vld [vmem:[%s5587_s3 + $0x618] sm:$0xff] }
 0x179   :  { %2059 = vmatpush1.bf16.msra.mxu1 %v3463_v55  ;;  %v3982_v55 = vld [vmem:[%s5589_s5 + $0xb0] ss:$8 sps:$4 sm:$0xff]  }
 0x17a   :  { %2060 = vmatprep.subr.bf16.mxu1 %v3472_v56  ;;  %2945 = vmatpush1.bf16.msra.mxu0 %v3955_v57  ;;  %v337_v56 = vld [vmem:[%s5587_s3 + $0x3d8] sm:$0xff] }
 0x17b   :  { %2946 = vmatprep.subr.bf16.mxu0 %v3960_v60  ;;  %v341_v57 = vld [vmem:[%s5587_s3 + $0x3f8] sm:$0xff] }
 0x17c   :  { %v3552_v60 = vcombine.high %v337_v56, %v341_v57  ;;  %v3551_v1 = vcombine.low %v337_v56, %v341_v57  ;;  %v413_v51 = vld [vmem:[%s5587_s3 + $0x638] sm:$0xff] }
 0x17d   :  { %2061 = vmatpush1.bf16.msra.mxu1 %v3471_v61  ;;  %v3985_v61 = vld [vmem:[%s5589_s5 + $0xc0] ss:$8 sps:$4 sm:$0xff]   ;;  %v417_v57 = vld [vmem:[%s5587_s3 + $0x658] sm:$0xff] }
 0x17e   :  { %2062 = vmatprep.subr.bf16.mxu1 %v3480_v62  ;;  %2947 = vmatpush1.bf16.msra.mxu0 %v3958_v63  ;;  %v345_v62 = vld [vmem:[%s5587_s3 + $0x418] sm:$0xff] }
 0x17f   :  { %2948 = vmatprep.subr.bf16.mxu0 %v3963_v3  ;;  %v349_v63 = vld [vmem:[%s5587_s3 + $0x438] sm:$0xff] }
 0x180   :  { %v3560_v3 = vcombine.high %v345_v62, %v349_v63  ;;  %v3559_v9 = vcombine.low %v345_v62, %v349_v63 }
 0x181   :  { %2063 = vmatpush1.bf16.msra.mxu1 %v3479_v4  ;;  %v3988_v4 = vld [vmem:[%s5589_s5 + $0xd0] ss:$8 sps:$4 sm:$0xff]  }
 0x182   :  { %2064 = vmatprep.subr.bf16.mxu1 %v3488_v6  ;;  %2949 = vmatpush1.bf16.msra.mxu0 %v3961_v7  ;;  %v353_v6 = vld [vmem:[%s5587_s3 + $0x458] sm:$0xff] }
 0x183   :  { %2950 = vmatprep.subr.bf16.mxu0 %v3966_v10  ;;  %v357_v7 = vld [vmem:[%s5587_s3 + $0x478] sm:$0xff] }
 0x184   :  { %v3568_v10 = vcombine.high %v353_v6, %v357_v7  ;;  %v3567_v15 = vcombine.low %v353_v6, %v357_v7 }
 0x185   :  { %2065 = vmatpush1.bf16.msra.mxu1 %v3487_v11  ;;  %v3991_v11 = vld [vmem:[%s5589_s5 + $0xe0] ss:$8 sps:$4 sm:$0xff]  }
 0x186   :  { %2066 = vmatprep.subr.bf16.mxu1 %v3496_v12  ;;  %2951 = vmatpush1.bf16.msra.mxu0 %v3964_v13  ;;  %v361_v12 = vld [vmem:[%s5587_s3 + $0x498] sm:$0xff] }
 0x187   :  { %2952 = vmatprep.subr.bf16.mxu0 %v3969_v19  ;;  %v365_v13 = vld [vmem:[%s5587_s3 + $0x4b8] sm:$0xff] }
 0x188   :  { %v3576_v19 = vcombine.high %v361_v12, %v365_v13 }
 0x189   :  { %2067 = vmatpush1.bf16.msra.mxu1 %v3495_v20  ;;  %v3994_v20 = vld [vmem:[%s5589_s5 + $0xf0] ss:$8 sps:$4 sm:$0xff]  }
 0x18a   :  { %2068 = vmatprep.subr.bf16.mxu1 %v3504_v23  ;;  %2953 = vmatpush1.bf16.msra.mxu0 %v3967_v16  ;;  %v369_v23 = vld [vmem:[%s5587_s3 + $0x4d8] sm:$0xff] }
 0x18b   :  { %2954 = vmatprep.subr.bf16.mxu0 %v3972_v25  ;;  %v373_v16 = vld [vmem:[%s5587_s3 + $0x4f8] sm:$0xff] }
 0x18c   :  { %v3584_v17 = vcombine.high %v369_v23, %v373_v16  ;;  %v381_v25 = vld [vmem:[%s5587_s3 + $0x538] sm:$0xff] }
 0x18d   :  { %2069 = vmatpush1.bf16.msra.mxu1 %v3503_v26  ;;  %v3583_v26 = vcombine.low %v369_v23, %v373_v16  ;;  %v3591_v31 = vcombine.low %v377_v18, %v381_v25  ;;  %v433_v23 = vld [vmem:[%s5587_s3 + $0x6d8] sm:$0xff] }
 0x18e   :  { %2070 = vmatprep.subr.bf16.mxu1 %v3512_v27  ;;  %2955 = vmatpush1.bf16.msra.mxu0 %v3970_v28  ;;  %v3592_v27 = vcombine.high %v377_v18, %v381_v25  ;;  %v385_v28 = vld [vmem:[%s5587_s3 + $0x558] sm:$0xff] }
 0x18f   :  { %2956 = vmatprep.subr.bf16.mxu0 %v3975_v32  ;;  %v3600_v32 = vcombine.high %v385_v28, %v389_v29  ;;  %v437_v16 = vld [vmem:[%s5587_s3 + $0x6f8] sm:$0xff] }
 0x190   :  { %v3648_v18 = vcombine.high %v433_v23, %v437_v16  ;;  %v441_v25 = vld [vmem:[%s5587_s3 + $0x718] sm:$0xff] }
 0x191   :  { %2071 = vmatpush1.bf16.msra.mxu1 %v3511_v34  ;;  %v393_v34 = vld [vmem:[%s5587_s3 + $0x598] sm:$0xff] }
 0x192   :  { %2072 = vmatprep.subr.bf16.mxu1 %v3520_v35  ;;  %2957 = vmatpush1.bf16.msra.mxu0 %v3973_v36  ;;  %v397_v35 = vld [vmem:[%s5587_s3 + $0x5b8] sm:$0xff]  ;;  %v3599_v36 = vcombine.low %v385_v28, %v389_v29  ;;  %v4005_v28 = vld [vmem:[%s5589_s5 + $0x124] ss:$8 sps:$4 sm:$0xff]   ;;  %v3647_v29 = vcombine.low %v433_v23, %v437_v16 }
 0x193   :  { %2958 = vmatprep.subr.bf16.mxu0 %v3978_v39  ;;  %v3608_v37 = vcombine.high %v393_v34, %v397_v35  ;;  %v3607_v43 = vcombine.low %v393_v34, %v397_v35  ;;  %v453_v34 = vld [vmem:[%s5587_s3 + $0x778] sm:$0xff]  ;;  %v4003_v35 = vld [vmem:[%s5589_s5 + $0x120] ss:$8 sps:$4 sm:$0xff]  }
 0x195   :  { %2073 = vmatpush1.bf16.msra.mxu1 %v3519_v40  ;;  %v401_v40 = vld [vmem:[%s5587_s3 + $0x5d8] sm:$0xff] }
 0x196   :  { %2074 = vmatprep.subr.bf16.mxu1 %v3528_v41  ;;  %2959 = vmatpush1.bf16.msra.mxu0 %v3976_v46  ;;  %v405_v41 = vld [vmem:[%s5587_s3 + $0x5f8] sm:$0xff] }
 0x197   :  { %2960 = vmatprep.subr.bf16.mxu0 %v3981_v44  ;;  %v475_v44 = vrot.slane %v5133_v38, %v4479_v22 }
 0x199   :  { %2075 = vmatpush1.bf16.msra.mxu1 %v3527_v47 }
 0x19a   :  { %2076 = vmatprep.subr.bf16.mxu1 %v3536_v48  ;;  %2961 = vmatpush1.bf16.msra.mxu0 %v3979_v49  ;;  %v3616_v48 = vcombine.high %v401_v40, %v405_v41  ;;  %v479_v49 = vrot.slane %v5133_v38, %v4485_v24 }
 0x19b   :  { %2962 = vmatprep.subr.bf16.mxu0 %v3984_v52  ;;  %v3615_v52 = vcombine.low %v401_v40, %v405_v41  ;;  %v457_v40 = vld [vmem:[%s5587_s3 + $0x798] sm:$0xff] }
 0x19c   :  { %v461_v41 = vld [vmem:[%s5587_s3 + $0x7b8] sm:$0xff] }
 0x19d   :  { %2077 = vmatpush1.bf16.msra.mxu1 %v3535_v53 }
 0x19e   :  { %2078 = vmatprep.subr.bf16.mxu1 %v3544_v54  ;;  %2963 = vmatpush1.bf16.msra.mxu0 %v3982_v55  ;;  %v3624_v54 = vcombine.high %v409_v50, %v413_v51 }
 0x19f   :  { %2964 = vmatprep.subr.bf16.mxu0 %v3987_v58  ;;  %v421_v58 = vld [vmem:[%s5587_s3 + $0x678] sm:$0xff] }
 0x1a0   :  { %v3632_v6 = vcombine.high %v417_v57, %v421_v58 }
 0x1a1   :  { %2079 = vmatpush1.bf16.msra.mxu1 %v3543_v59 }
 0x1a2   :  { %2080 = vmatprep.subr.bf16.mxu1 %v3552_v60  ;;  %2965 = vmatpush1.bf16.msra.mxu0 %v3985_v61 }
 0x1a3   :  { %2966 = vmatprep.subr.bf16.mxu0 %v3990_v0 }
 0x1a5   :  { %2081 = vmatpush1.bf16.msra.mxu1 %v3551_v1  ;;  %v3623_v1 = vcombine.low %v409_v50, %v413_v51  ;;  %v4014_v50 = vld [vmem:[%s5589_s5 + $0x154] ss:$8 sps:$4 sm:$0xff]   ;;  %v3671_v51 = vcombine.low %v457_v40, %v461_v41 }
 0x1a6   :  { %2093 = vmatprep.subr.bf16.mxu1 %v3560_v3  ;;  %2967 = vmatpush1.bf16.msra.mxu0 %v3988_v4 }
 0x1a7   :  { %2968 = vmatprep.subr.bf16.mxu0 %v3993_v8  ;;  %v425_v8 = vld [vmem:[%s5587_s3 + $0x698] sm:$0xff] }
 0x1a8   :  { %2083 = vmatmul.mubr.bf16.vlgmr.msra.gmra.mrb[16].mxu1 %v4501_v45  ;;  %v3999_v45 = vld [vmem:[%s5589_s5 + $0x104] ss:$8 sps:$4 sm:$0xff]  }
 0x1a9   :  { %2094 = vmatpush1.bf16.msra.mxu1 %v3559_v9  ;;  %2125 = vmatprep.mubr.bf16.mxu1 %v4528_v5  ;;  %v3575_v5 = vcombine.low %v361_v12, %v365_v13  ;;  %v429_v9 = vld [vmem:[%s5587_s3 + $0x6b8] sm:$0xff] }
 0x1aa   :  { %2095 = vmatprep.subr.bf16.mxu1 %v3568_v10  ;;  %2969 = vmatpush1.bf16.msra.mxu0 %v3991_v11 }
 0x1ab   :  { %2970 = vmatprep.subr.bf16.mxu0 %v3996_v14  ;;  %v3631_v14 = vcombine.low %v417_v57, %v421_v58  ;;  %v4020_v57 = vld [vmem:[%s5589_s5 + $0x174] ss:$8 sps:$4 sm:$0xff]   ;;  %v4018_v58 = vld [vmem:[%s5589_s5 + $0x170] ss:$8 sps:$4 sm:$0xff]  }
 0x1ad   :  { %2096 = vmatpush1.bf16.msra.mxu1 %v3567_v15 }
 0x1ae   :  { %2097 = vmatprep.subr.bf16.mxu1 %v3576_v19  ;;  %2971 = vmatpush1.bf16.msra.mxu0 %v3994_v20  ;;  %v3640_v19 = vcombine.high %v425_v8, %v429_v9 }
 0x1af   :  { %2983 = vmatprep.subr.bf16.mxu0 %v3999_v45  ;;  %v3997_v45 = vld [vmem:[%s5589_s5 + $0x100] ss:$8 sps:$4 sm:$0xff]  }
 0x1b1   :  { %2098 = vmatpush1.bf16.msra.mxu1 %v3575_v5  ;;  %v4002_v5 = vld [vmem:[%s5589_s5 + $0x114] ss:$8 sps:$4 sm:$0xff]  }
 0x1b2   :  { %2099 = vmatprep.subr.bf16.mxu1 %v3584_v17  ;;  %v3639_v17 = vcombine.low %v425_v8, %v429_v9  ;;  %v4041_v8 = vld [vmem:[%s5589_s5 + $0x1e4] ss:$8 sps:$4 sm:$0xff]   ;;  %v4039_v9 = vld [vmem:[%s5589_s5 + $0x1e0] ss:$8 sps:$4 sm:$0xff]  }
 0x1b5   :  { %2100 = vmatpush1.bf16.msra.mxu1 %v3583_v26  ;;  %v445_v26 = vld [vmem:[%s5587_s3 + $0x738] sm:$0xff] }
 0x1b6   :  { %2101 = vmatprep.subr.bf16.mxu1 %v3592_v27  ;;  %v4000_v27 = vld [vmem:[%s5589_s5 + $0x110] ss:$8 sps:$4 sm:$0xff]  }
 0x1b9   :  { %2102 = vmatpush1.bf16.msra.mxu1 %v3591_v31  ;;  %v3656_v31 = vcombine.high %v441_v25, %v445_v26 }
 0x1ba   :  { %2103 = vmatprep.subr.bf16.mxu1 %v3600_v32  ;;  %v449_v32 = vld [vmem:[%s5587_s3 + $0x758] sm:$0xff] }
 0x1bb   :  { %v1826_v39 = vpop.f32.mrb[8].mxu1 }
 0x1bc   :  { %v1828_v46 = vpop.f32.mrb[9].mxu1  ;;  %v1827_v53 = vadd.f32 %v1826_v39, %v475_v44  ;;  %v3664_v39 = vcombine.high %v449_v32, %v453_v34 }
 0x1bd   :  { %2104 = vmatpush1.bf16.msra.mxu1 %v3599_v36  ;;  %v1830_v42 = vpop.f32.mrb[10].mxu1  ;;  %v1829_v55 = vadd.f32 %v1828_v46, %v479_v49  ;;  %v4008_v36 = vld [vmem:[%s5589_s5 + $0x134] ss:$8 sps:$4 sm:$0xff]   ;;  %v4006_v46 = vld [vmem:[%s5589_s5 + $0x130] ss:$8 sps:$4 sm:$0xff]  }
 0x1be   :  { %v1832_v47 = vpop.f32.mrb[11].mxu1  ;;  %2105 = vmatprep.subr.bf16.mxu1 %v3608_v37  ;;  %v1831_v59 = vadd.f32 %v1830_v42, %v475_v44  ;;  %v3655_v37 = vcombine.low %v441_v25, %v445_v26  ;;  %v4011_v42 = vld [vmem:[%s5589_s5 + $0x144] ss:$8 sps:$4 sm:$0xff]   ;;  %v3672_v44 = vcombine.high %v457_v40, %v461_v41 }
 0x1bf   :  { %v1833_v62 = vadd.f32 %v1832_v47, %v479_v49  ;;  %v465_v47 = vld [vmem:[%s5587_s3 + $0x7d8] sm:$0xff]  ;;  %v4009_v49 = vld [vmem:[%s5589_s5 + $0x140] ss:$8 sps:$4 sm:$0xff]  }
 0x1c1   :  { %2106 = vmatpush1.bf16.msra.mxu1 %v3607_v43  ;;  %v3663_v43 = vcombine.low %v449_v32, %v453_v34  ;;  %v4045_v34 = vld [vmem:[%s5589_s5 + $0x200] ss:$8 sps:$4 sm:$0xff]  }
 0x1c2   :  { %2107 = vmatprep.subr.bf16.mxu1 %v3616_v48  ;;  %v469_v48 = vld [vmem:[%s5587_s3 + $0x7f8] sm:$0xff] }
 0x1c3   :  { %v1869_v56 = vpop.f32.mrb[0].mxu0 }
 0x1c4   :  { %v1870_v60 = vadd.f32 %v1869_v56, %v1827_v53  ;;  %v1871_v61 = vpop.f32.mrb[1].mxu0  ;;  %v4012_v53 = vld [vmem:[%s5589_s5 + $0x150] ss:$8 sps:$4 sm:$0xff]   ;;  %v4015_v56 = vld [vmem:[%s5589_s5 + $0x160] ss:$8 sps:$4 sm:$0xff]  }
 0x1c5   :  { %v1872_v63 = vadd.f32 %v1871_v61, %v1829_v55  ;;  %2108 = vmatpush1.bf16.msra.mxu1 %v3615_v52  ;;  %v1873_v0 = vpop.f32.mrb[2].mxu0  ;;  %v3680_v52 = vcombine.high %v465_v47, %v469_v48  ;;  %v3679_v55 = vcombine.low %v465_v47, %v469_v48  ;;  %v4026_v61 = vld [vmem:[%s5589_s5 + $0x194] ss:$8 sps:$4 sm:$0xff]  }
 0x1c6   :  { %v1874_v3 = vadd.f32 %v1873_v0, %v1831_v59  ;;  %v1875_v4 = vpop.f32.mrb[3].mxu0  ;;  %2109 = vmatprep.subr.bf16.mxu1 %v3624_v54  ;;  %v2136_v10 = vmax.f32 %v1870_v60, 0.0  ;;  %v4017_v54 = vld [vmem:[%s5589_s5 + $0x164] ss:$8 sps:$4 sm:$0xff]   ;;  %v4021_v60 = vld [vmem:[%s5589_s5 + $0x180] ss:$8 sps:$4 sm:$0xff]  }
 0x1c7   :  { %v1876_v7 = vadd.f32 %v1875_v4, %v1833_v62  ;;  %v2137_v12 = vmax.f32 %v1872_v63, 0.0  ;;  %v4023_v59 = vld [vmem:[%s5589_s5 + $0x184] ss:$8 sps:$4 sm:$0xff]   ;;  %v4027_v63 = vld [vmem:[%s5589_s5 + $0x1a0] ss:$8 sps:$4 sm:$0xff]  }
 0x1c8   :  { %v2144_v11 = vmax.f32 %v1874_v3, 0.0  ;;  %v4029_v62 = vld [vmem:[%s5589_s5 + $0x1a4] ss:$8 sps:$4 sm:$0xff]   ;;  %v4032_v0 = vld [vmem:[%s5589_s5 + $0x1b4] ss:$8 sps:$4 sm:$0xff]  }
 0x1c9   :  { %v2145_v13 = vmax.f32 %v1876_v7, 0.0  ;;  %2110 = vmatpush1.bf16.msra.mxu1 %v3623_v1  ;;  %v4030_v1 = vld [vmem:[%s5589_s5 + $0x1b0] ss:$8 sps:$4 sm:$0xff]   ;;  %v4035_v3 = vld [vmem:[%s5589_s5 + $0x1c4] ss:$8 sps:$4 sm:$0xff]  }
 0x1ca   :  { %v2152_v15 = vpack.c.bf16 %v2144_v11, %v2136_v10  ;;  %2111 = vmatprep.subr.bf16.mxu1 %v3632_v6  ;;  %v4033_v4 = vld [vmem:[%s5589_s5 + $0x1c0] ss:$8 sps:$4 sm:$0xff]   ;;  %v4038_v6 = vld [vmem:[%s5589_s5 + $0x1d4] ss:$8 sps:$4 sm:$0xff]   ;;  %v4036_v7 = vld [vmem:[%s5589_s5 + $0x1d0] ss:$8 sps:$4 sm:$0xff]  }
 0x1cb   :  { %v2153_v20 = vpack.c.bf16 %v2145_v13, %v2137_v12  ;;  %v4044_v10 = vld [vmem:[%s5589_s5 + $0x1f4] ss:$8 sps:$4 sm:$0xff]   ;;  %v4042_v11 = vld [vmem:[%s5589_s5 + $0x1f0] ss:$8 sps:$4 sm:$0xff]   ;;  %v4047_v12 = vld [vmem:[%s5589_s5 + $0x204] ss:$8 sps:$4 sm:$0xff]   ;;  %v483_v13 = vrot.slane %v5133_v38, %v62_v30 }
 0x1cd   :  { %2112 = vmatpush1.bf16.msra.mxu1 %v3631_v14  ;;  %2972 = vmatprep.mubr.bf16.mxu0 %v2153_v20  ;;  %v487_v14 = vrot.slane %v5133_v38, %v66_v33 }
 0x1ce   :  { %2973 = vmatmul.mubr.bf16.vlgmr.msra.gmra.mrb[8].mxu0 %v2152_v15  ;;  %2113 = vmatprep.subr.bf16.mxu1 %v3640_v19 }
 0x1cf   :  { %2984 = vmatpush1.bf16.msra.mxu0 %v3997_v45  ;;  %v490_v45 = vsub.s32 4, %v4476_v21 }
 0x1d0   :  { %2985 = vmatprep.subr.bf16.mxu0 %v4002_v5 }
 0x1d1   :  { %2114 = vmatpush1.bf16.msra.mxu1 %v3639_v17 }
 0x1d2   :  { %2115 = vmatprep.subr.bf16.mxu1 %v3648_v18  ;;  %v494_v18 = vsub.s32 5, %v4476_v21 }
 0x1d3   :  { %2986 = vmatpush1.bf16.msra.mxu0 %v4000_v27 }
 0x1d4   :  { %2987 = vmatprep.subr.bf16.mxu0 %v4005_v28  ;;  %v495_v33 = vrot.slane %v5133_v38, %v494_v18  ;;  %v4086_v18 = vld [vmem:[%s5589_s5 + $0x2d4] ss:$8 sps:$4 sm:$0xff]  }
 0x1d5   :  { %2116 = vmatpush1.bf16.msra.mxu1 %v3647_v29  ;;  %v491_v29 = vrot.slane %v5133_v38, %v490_v45  ;;  %v4078_v45 = vld [vmem:[%s5589_s5 + $0x2b0] ss:$8 sps:$4 sm:$0xff]  }
 0x1d6   :  { %2117 = vmatprep.subr.bf16.mxu1 %v3656_v31 }
 0x1d7   :  { %2988 = vmatpush1.bf16.msra.mxu0 %v4003_v35 }
 0x1d8   :  { %2989 = vmatprep.subr.bf16.mxu0 %v4008_v36  ;;  %v4050_v36 = vld [vmem:[%s5589_s5 + $0x214] ss:$8 sps:$4 sm:$0xff]  }
 0x1d9   :  { %2118 = vmatpush1.bf16.msra.mxu1 %v3655_v37 }
 0x1da   :  { %2119 = vmatprep.subr.bf16.mxu1 %v3664_v39 }
 0x1db   :  { %2990 = vmatpush1.bf16.msra.mxu0 %v4006_v46  ;;  %v4048_v46 = vld [vmem:[%s5589_s5 + $0x210] ss:$8 sps:$4 sm:$0xff]  }
 0x1dc   :  { %2991 = vmatprep.subr.bf16.mxu0 %v4011_v42  ;;  %v4053_v42 = vld [vmem:[%s5589_s5 + $0x224] ss:$8 sps:$4 sm:$0xff]  }
 0x1dd   :  { %2120 = vmatpush1.bf16.msra.mxu1 %v3663_v43 }
 0x1de   :  { %2121 = vmatprep.subr.bf16.mxu1 %v3672_v44 }
 0x1df   :  { %2992 = vmatpush1.bf16.msra.mxu0 %v4009_v49 }
 0x1e0   :  { %2993 = vmatprep.subr.bf16.mxu0 %v4014_v50  ;;  %v4141_v50 = vld [vmem:[%s5591_s7 + $0x40] sm:$0xff]  }
 0x1e1   :  { %2122 = vmatpush1.bf16.msra.mxu1 %v3671_v51 }
 0x1e2   :  { %2123 = vmatprep.subr.bf16.mxu1 %v3680_v52  ;;  %v4051_v52 = vld [vmem:[%s5589_s5 + $0x220] ss:$8 sps:$4 sm:$0xff]  }
 0x1e3   :  { %2994 = vmatpush1.bf16.msra.mxu0 %v4012_v53  ;;  %v4142_v53 = vld [vmem:[%s5591_s7] sm:$0xff]  }
 0x1e4   :  { %2995 = vmatprep.subr.bf16.mxu0 %v4017_v54 }
 0x1e5   :  { %2124 = vmatpush1.bf16.msra.mxu1 %v3679_v55  ;;  %v4056_v55 = vld [vmem:[%s5589_s5 + $0x234] ss:$8 sps:$4 sm:$0xff]  }
 0x1e6   :  { %3835 = vmatprep.subr.bf16.mxu1 %v4141_v50  ;;  %v4122_v50 = vld [vmem:[%s5589_s5 + $0x394] ss:$8 sps:$4 sm:$0xff]  }
 0x1e7   :  { %2996 = vmatpush1.bf16.msra.mxu0 %v4015_v56  ;;  %v4143_v56 = vld [vmem:[%s5591_s7 + $0x48] sm:$0xff]  }
 0x1e8   :  { %2126 = vmatmul.mubr.bf16.vlgmr.msra.gmra.mrb[16].mxu1 %v4520_v2  ;;  %2997 = vmatprep.subr.bf16.mxu0 %v4020_v57  ;;  %v4024_v2 = vld [vmem:[%s5589_s5 + $0x190] ss:$8 sps:$4 sm:$0xff]  }
 0x1e9   :  { %3836 = vmatpush3.bf16.msra.mxu1 %v4142_v53  ;;  %v4123_v53 = vld [vmem:[%s5589_s5 + $0x3a0] ss:$8 sps:$4 sm:$0xff]  }
 0x1ea   :  { %3837 = vmatprep.subr.bf16.mxu1 %v4143_v56  ;;  %v4131_v56 = vld [vmem:[%s5589_s5 + $0x3c4] ss:$8 sps:$4 sm:$0xff]  }
 0x1eb   :  { %2998 = vmatpush1.bf16.msra.mxu0 %v4018_v58  ;;  %v4144_v58 = vld [vmem:[%s5591_s7 + $0x8] sm:$0xff]  }
 0x1ec   :  { %2999 = vmatprep.subr.bf16.mxu0 %v4023_v59 }
 0x1ed   :  { %3838 = vmatpush3.bf16.msra.mxu1 %v4144_v58  ;;  %v4134_v58 = vld [vmem:[%s5589_s5 + $0x3d4] ss:$8 sps:$4 sm:$0xff]  }
 0x1ef   :  { %3000 = vmatpush1.bf16.msra.mxu0 %v4021_v60  ;;  %v4145_v60 = vld [vmem:[%s5591_s7 + $0x50] sm:$0xff]  }
 0x1f0   :  { %3001 = vmatprep.subr.bf16.mxu0 %v4026_v61  ;;  %v4054_v61 = vld [vmem:[%s5589_s5 + $0x230] ss:$8 sps:$4 sm:$0xff]   ;;  %3839 = vmatprep.subr.bf16.mxu1 %v4145_v60  ;;  %v502_v60 = vsub.s32 7, %v4476_v21 }
 0x1f3   :  { %3002 = vmatpush1.bf16.msra.mxu0 %v4024_v2  ;;  %v4059_v2 = vld [vmem:[%s5589_s5 + $0x244] ss:$8 sps:$4 sm:$0xff]  }
 0x1f4   :  { %3003 = vmatprep.subr.bf16.mxu0 %v4029_v62  ;;  %v4146_v62 = vld [vmem:[%s5591_s7 + $0x10] sm:$0xff]  }
 0x1f5   :  { %3840 = vmatpush3.bf16.msra.mxu1 %v4146_v62  ;;  %v4137_v62 = vld [vmem:[%s5589_s5 + $0x3e4] ss:$8 sps:$4 sm:$0xff]  }
 0x1f7   :  { %3004 = vmatpush1.bf16.msra.mxu0 %v4027_v63  ;;  %v4147_v63 = vld [vmem:[%s5591_s7 + $0x58] sm:$0xff]  }
 0x1f8   :  { %3005 = vmatprep.subr.bf16.mxu0 %v4032_v0  ;;  %v4057_v0 = vld [vmem:[%s5589_s5 + $0x240] ss:$8 sps:$4 sm:$0xff]   ;;  %3841 = vmatprep.subr.bf16.mxu1 %v4147_v63  ;;  %v503_v63 = vrot.slane %v5133_v38, %v502_v60 }
 0x1fb   :  { %3006 = vmatpush1.bf16.msra.mxu0 %v4030_v1  ;;  %v4062_v1 = vld [vmem:[%s5589_s5 + $0x254] ss:$8 sps:$4 sm:$0xff]  }
 0x1fc   :  { %3007 = vmatprep.subr.bf16.mxu0 %v4035_v3  ;;  %v4148_v3 = vld [vmem:[%s5591_s7 + $0x18] sm:$0xff]  }
 0x1fd   :  { %3842 = vmatpush3.bf16.msra.mxu1 %v4148_v3 }
 0x1ff   :  { %3008 = vmatpush1.bf16.msra.mxu0 %v4033_v4  ;;  %v4149_v4 = vld [vmem:[%s5591_s7 + $0x60] sm:$0xff]  }
 0x200   :  { %3009 = vmatprep.subr.bf16.mxu0 %v4038_v6  ;;  %v4060_v6 = vld [vmem:[%s5589_s5 + $0x250] ss:$8 sps:$4 sm:$0xff]   ;;  %3843 = vmatprep.subr.bf16.mxu1 %v4149_v4  ;;  %v4140_v4 = vld [vmem:[%s5589_s5 + $0x3f4] ss:$8 sps:$4 sm:$0xff]  }
 0x203   :  { %3010 = vmatpush1.bf16.msra.mxu0 %v4036_v7  ;;  %v4150_v7 = vld [vmem:[%s5591_s7 + $0x20] sm:$0xff]  }
 0x204   :  { %3011 = vmatprep.subr.bf16.mxu0 %v4041_v8  ;;  %v4065_v8 = vld [vmem:[%s5589_s5 + $0x264] ss:$8 sps:$4 sm:$0xff]   ;;  %3844 = vmatpush3.bf16.msra.mxu1 %v4150_v7 }
 0x207   :  { %3012 = vmatpush1.bf16.msra.mxu0 %v4039_v9  ;;  %v4151_v9 = vld [vmem:[%s5591_s7 + $0x68] sm:$0xff]  }
 0x208   :  { %3013 = vmatprep.subr.bf16.mxu0 %v4044_v10  ;;  %v4063_v10 = vld [vmem:[%s5589_s5 + $0x260] ss:$8 sps:$4 sm:$0xff]   ;;  %3845 = vmatprep.subr.bf16.mxu1 %v4151_v9 }
 0x20b   :  { %3014 = vmatpush1.bf16.msra.mxu0 %v4042_v11  ;;  %v4068_v11 = vld [vmem:[%s5589_s5 + $0x274] ss:$8 sps:$4 sm:$0xff]  }
 0x20c   :  { %3026 = vmatprep.subr.bf16.mxu0 %v4047_v12  ;;  %v4066_v12 = vld [vmem:[%s5589_s5 + $0x270] ss:$8 sps:$4 sm:$0xff]  }
 0x23b   :  { %v1955_v15 = vpop.f32.mrb[12].mxu1 }
 0x23c   :  { %v3894_v19 = vadd.f32 %v1955_v15, %v483_v13  ;;  %v1957_v20 = vpop.f32.mrb[13].mxu1  ;;  %v4074_v15 = vld [vmem:[%s5589_s5 + $0x294] ss:$8 sps:$4 sm:$0xff]  }
 0x23d   :  { %v3895_v23 = vadd.f32 %v1957_v20, %v487_v14  ;;  %v1959_v16 = vpop.f32.mrb[14].mxu1  ;;  %v4077_v20 = vld [vmem:[%s5589_s5 + $0x2a4] ss:$8 sps:$4 sm:$0xff]  }
 0x23e   :  { %v3896_v5 = vadd.f32 %v1959_v16, %v483_v13  ;;  %v1961_v17 = vpop.f32.mrb[15].mxu1  ;;  %v2138_v26 = vmax.f32 %v3894_v19, 0.0  ;;  %v4071_v13 = vld [vmem:[%s5589_s5 + $0x284] ss:$8 sps:$4 sm:$0xff]   ;;  %v4072_v19 = vld [vmem:[%s5589_s5 + $0x290] ss:$8 sps:$4 sm:$0xff]  }
 0x23f   :  { %v3897_v25 = vadd.f32 %v1961_v17, %v487_v14  ;;  %v2139_v28 = vmax.f32 %v3895_v23, 0.0  ;;  %v4069_v14 = vld [vmem:[%s5589_s5 + $0x280] ss:$8 sps:$4 sm:$0xff]   ;;  %v4080_v16 = vld [vmem:[%s5589_s5 + $0x2b4] ss:$8 sps:$4 sm:$0xff]  }
 0x240   :  { %v2146_v27 = vmax.f32 %v3896_v5, 0.0  ;;  %v4075_v23 = vld [vmem:[%s5589_s5 + $0x2a0] ss:$8 sps:$4 sm:$0xff]   ;;  %v4083_v5 = vld [vmem:[%s5589_s5 + $0x2c4] ss:$8 sps:$4 sm:$0xff]  }
 0x241   :  { %v2147_v30 = vmax.f32 %v3897_v25, 0.0  ;;  %v4081_v17 = vld [vmem:[%s5589_s5 + $0x2c0] ss:$8 sps:$4 sm:$0xff]   ;;  %v4084_v25 = vld [vmem:[%s5589_s5 + $0x2d0] ss:$8 sps:$4 sm:$0xff]  }
 0x242   :  { %v2154_v31 = vpack.c.bf16 %v2146_v27, %v2138_v26  ;;  %v4089_v26 = vld [vmem:[%s5589_s5 + $0x2e4] ss:$8 sps:$4 sm:$0xff]   ;;  %v4087_v27 = vld [vmem:[%s5589_s5 + $0x2e0] ss:$8 sps:$4 sm:$0xff]  }
 0x243   :  { %v2155_v32 = vpack.c.bf16 %v2147_v30, %v2139_v28  ;;  %v4092_v28 = vld [vmem:[%s5589_s5 + $0x2f4] ss:$8 sps:$4 sm:$0xff]   ;;  %v4090_v30 = vld [vmem:[%s5589_s5 + $0x2f0] ss:$8 sps:$4 sm:$0xff]  }
 0x244   :  { %v2041_v35 = vpop.f32.mrb[4].mxu0 }
 0x245   :  { %v3898_v37 = vadd.f32 %v2041_v35, %v491_v29  ;;  %v2043_v39 = vpop.f32.mrb[5].mxu0  ;;  %3015 = vmatprep.mubr.bf16.mxu0 %v2155_v32  ;;  %v4096_v32 = vld [vmem:[%s5589_s5 + $0x310] ss:$8 sps:$4 sm:$0xff]   ;;  %v4099_v35 = vld [vmem:[%s5589_s5 + $0x320] ss:$8 sps:$4 sm:$0xff]  }
 0x246   :  { %v3899_v40 = vadd.f32 %v2043_v39, %v495_v33  ;;  %v2045_v41 = vpop.f32.mrb[6].mxu0  ;;  %3016 = vmatmul.mubr.bf16.vlgmr.msra.gmra.mrb[8].mxu0 %v2154_v31  ;;  %v4093_v31 = vld [vmem:[%s5589_s5 + $0x300] ss:$8 sps:$4 sm:$0xff]   ;;  %v4107_v39 = vld [vmem:[%s5589_s5 + $0x344] ss:$8 sps:$4 sm:$0xff]  }
 0x247   :  { %v2140_v43 = vmax.f32 %v3898_v37, 0.0  ;;  %v3900_v44 = vadd.f32 %v2045_v41, %v491_v29  ;;  %v2047_v47 = vpop.f32.mrb[7].mxu0  ;;  %3027 = vmatpush1.bf16.msra.mxu0 %v4045_v34  ;;  %v4095_v29 = vld [vmem:[%s5589_s5 + $0x304] ss:$8 sps:$4 sm:$0xff]   ;;  %v4102_v37 = vld [vmem:[%s5589_s5 + $0x330] ss:$8 sps:$4 sm:$0xff]  }
 0x248   :  { %v2141_v48 = vmax.f32 %v3899_v40, 0.0  ;;  %v3901_v49 = vadd.f32 %v2047_v47, %v495_v33  ;;  %3028 = vmatprep.subr.bf16.mxu0 %v4050_v36  ;;  %v4098_v33 = vld [vmem:[%s5589_s5 + $0x314] ss:$8 sps:$4 sm:$0xff]   ;;  %v4101_v34 = vld [vmem:[%s5589_s5 + $0x324] ss:$8 sps:$4 sm:$0xff]  }
 0x249   :  { %v2148_v51 = vmax.f32 %v3900_v44, 0.0  ;;  %v4104_v36 = vld [vmem:[%s5589_s5 + $0x334] ss:$8 sps:$4 sm:$0xff]   ;;  %v4105_v40 = vld [vmem:[%s5589_s5 + $0x340] ss:$8 sps:$4 sm:$0xff]  }
 0x24a   :  { %v2149_v54 = vmax.f32 %v3901_v49, 0.0  ;;  %v4110_v41 = vld [vmem:[%s5589_s5 + $0x354] ss:$8 sps:$4 sm:$0xff]   ;;  %v4114_v47 = vld [vmem:[%s5589_s5 + $0x370] ss:$8 sps:$4 sm:$0xff]  }
 0x24b   :  { %v5327_v57 = vpack.c.bf16 %v2148_v51, %v2140_v43  ;;  %3029 = vmatpush1.bf16.msra.mxu0 %v4048_v46  ;;  %v4108_v46 = vld [vmem:[%s5589_s5 + $0x350] ss:$8 sps:$4 sm:$0xff]   ;;  %v4111_v43 = vld [vmem:[%s5589_s5 + $0x360] ss:$8 sps:$4 sm:$0xff]   ;;  %v4116_v44 = vld [vmem:[%s5589_s5 + $0x374] ss:$8 sps:$4 sm:$0xff]  }
 0x24c   :  { %v2157_v59 = vpack.c.bf16 %v2149_v54, %v2141_v48  ;;  %3030 = vmatprep.subr.bf16.mxu0 %v4053_v42  ;;  %v4113_v42 = vld [vmem:[%s5589_s5 + $0x364] ss:$8 sps:$4 sm:$0xff]   ;;  %v4117_v49 = vld [vmem:[%s5589_s5 + $0x380] ss:$8 sps:$4 sm:$0xff]   ;;  %v4120_v51 = vld [vmem:[%s5589_s5 + $0x390] ss:$8 sps:$4 sm:$0xff]  }
 0x24d   :  { %v4119_v48 = vld [vmem:[%s5589_s5 + $0x384] ss:$8 sps:$4 sm:$0xff]   ;;  %v4128_v54 = vld [vmem:[%s5589_s5 + $0x3b4] ss:$8 sps:$4 sm:$0xff]  }
 0x24e   :  { %3058 = vmatprep.mubr.bf16.mxu0 %v2157_v59  ;;  %v498_v59 = vsub.s32 6, %v4476_v21  ;;  %v4135_v21 = vld [vmem:[%s5589_s5 + $0x3e0] ss:$8 sps:$4 sm:$0xff]  }
 0x24f   :  { %3031 = vmatpush1.bf16.msra.mxu0 %v4051_v52  ;;  %v4125_v52 = vld [vmem:[%s5589_s5 + $0x3a4] ss:$8 sps:$4 sm:$0xff]  }
 0x250   :  { %3032 = vmatprep.subr.bf16.mxu0 %v4056_v55  ;;  %v4126_v55 = vld [vmem:[%s5589_s5 + $0x3b0] ss:$8 sps:$4 sm:$0xff]  }
 0x253   :  { %3033 = vmatpush1.bf16.msra.mxu0 %v4054_v61  ;;  %v4132_v61 = vld [vmem:[%s5589_s5 + $0x3d0] ss:$8 sps:$4 sm:$0xff]  }
 0x254   :  { %3034 = vmatprep.subr.bf16.mxu0 %v4059_v2  ;;  %v499_v2 = vrot.slane %v5133_v38, %v498_v59  ;;  %v4138_v38 = vld [vmem:[%s5589_s5 + $0x3f0] ss:$8 sps:$4 sm:$0xff]  }
 0x257   :  { %3035 = vmatpush1.bf16.msra.mxu0 %v4057_v0 }
 0x258   :  { %3036 = vmatprep.subr.bf16.mxu0 %v4062_v1 }
 0x25b   :  { %3037 = vmatpush1.bf16.msra.mxu0 %v4060_v6 }
 0x25c   :  { %3038 = vmatprep.subr.bf16.mxu0 %v4065_v8 }
 0x25f   :  { %3039 = vmatpush1.bf16.msra.mxu0 %v4063_v10 }
 0x260   :  { %3040 = vmatprep.subr.bf16.mxu0 %v4068_v11 }
 0x263   :  { %3041 = vmatpush1.bf16.msra.mxu0 %v4066_v12 }
 0x264   :  { %3042 = vmatprep.subr.bf16.mxu0 %v4071_v13 }
 0x267   :  { %3043 = vmatpush1.bf16.msra.mxu0 %v4069_v14 }
 0x268   :  { %3044 = vmatprep.subr.bf16.mxu0 %v4074_v15 }
 0x26b   :  { %3045 = vmatpush1.bf16.msra.mxu0 %v4072_v19 }
 0x26c   :  { %3046 = vmatprep.subr.bf16.mxu0 %v4077_v20  ;;  %v4152_v20 = vld [vmem:[%s5591_s7 + $0x28] sm:$0xff]  }
 0x26d   :  { %3846 = vmatpush3.bf16.msra.mxu1 %v4152_v20 }
 0x26f   :  { %3047 = vmatpush1.bf16.msra.mxu0 %v4075_v23  ;;  %v4153_v23 = vld [vmem:[%s5591_s7 + $0x70] sm:$0xff]  }
 0x270   :  { %3048 = vmatprep.subr.bf16.mxu0 %v4080_v16  ;;  %v4154_v16 = vld [vmem:[%s5591_s7 + $0x30] sm:$0xff]   ;;  %3847 = vmatprep.subr.bf16.mxu1 %v4153_v23 }
 0x271   :  { %3848 = vmatpush3.bf16.msra.mxu1 %v4154_v16 }
 0x273   :  { %3049 = vmatpush1.bf16.msra.mxu0 %v4078_v45  ;;  %v4155_v45 = vld [vmem:[%s5591_s7 + $0x78] sm:$0xff]  }
 0x274   :  { %3050 = vmatprep.subr.bf16.mxu0 %v4083_v5  ;;  %v4156_v5 = vld [vmem:[%s5591_s7 + $0x38] sm:$0xff]   ;;  %3849 = vmatprep.subr.bf16.mxu1 %v4155_v45 }
 0x275   :  { %3850 = vmatpush3.bf16.msra.mxu1 %v4156_v5 }
 0x277   :  { %3051 = vmatpush1.bf16.msra.mxu0 %v4081_v17  ;;  %v4166_v17 = vmov 0.0  }
 0x278   :  { %3052 = vmatprep.subr.bf16.mxu0 %v4086_v18  ;;  %3866 = vmatprep.subr.bf16.mxu1 %v4166_v17  ;;  %v2288_v18 = vld [vmem:[%s5593_s6] sm:$0x3] }
 0x27b   :  { %3053 = vmatpush1.bf16.msra.mxu0 %v4084_v25  ;;  %v2293_v25 = vrot.slane %v2288_v18, %v4479_v22  ;;  %v4157_v22 = vld [vmem:[%s5592_s9] sm:$0xff]  }
 0x27c   :  { %3054 = vmatprep.subr.bf16.mxu0 %v4089_v26  ;;  %v2297_v26 = vrot.slane %v2288_v18, %v4485_v24  ;;  %v4158_v24 = vld [vmem:[%s5592_s9 + $0x8] sm:$0xff]  }
 0x27f   :  { %3055 = vmatpush1.bf16.msra.mxu0 %v4087_v27 }
 0x280   :  { %3056 = vmatprep.subr.bf16.mxu0 %v4092_v28 }
 0x283   :  { %3057 = vmatpush1.bf16.msra.mxu0 %v4090_v30 }
 0x284   :  { %3069 = vmatprep.subr.bf16.mxu0 %v4095_v29 }
 0x286   :  { %3059 = vmatmul.mubr.bf16.vlgmr.msra.gmra.mrb[8].mxu0 %v5327_v57  ;;  %v4129_v57 = vld [vmem:[%s5589_s5 + $0x3c0] ss:$8 sps:$4 sm:$0xff]  }
 0x287   :  { %3070 = vmatpush1.bf16.msra.mxu0 %v4093_v31 }
 0x288   :  { %3071 = vmatprep.subr.bf16.mxu0 %v4098_v33 }
 0x28b   :  { %3072 = vmatpush1.bf16.msra.mxu0 %v4096_v32 }
 0x28c   :  { %3073 = vmatprep.subr.bf16.mxu0 %v4101_v34 }
 0x28f   :  { %3074 = vmatpush1.bf16.msra.mxu0 %v4099_v35 }
 0x290   :  { %3075 = vmatprep.subr.bf16.mxu0 %v4104_v36 }
 0x293   :  { %3076 = vmatpush1.bf16.msra.mxu0 %v4102_v37 }
 0x294   :  { %3077 = vmatprep.subr.bf16.mxu0 %v4107_v39 }
 0x297   :  { %3078 = vmatpush1.bf16.msra.mxu0 %v4105_v40 }
 0x298   :  { %3079 = vmatprep.subr.bf16.mxu0 %v4110_v41 }
 0x29b   :  { %3080 = vmatpush1.bf16.msra.mxu0 %v4108_v46  ;;  %v4159_v46 = vld [vmem:[%s5592_s9 + $0x10] sm:$0xff]  }
 0x29c   :  { %3081 = vmatprep.subr.bf16.mxu0 %v4113_v42  ;;  %v4160_v42 = vld [vmem:[%s5592_s9 + $0x18] sm:$0xff]  }
 0x29f   :  { %3082 = vmatpush1.bf16.msra.mxu0 %v4111_v43  ;;  %v4161_v43 = vld [vmem:[%s5592_s9 + $0x20] sm:$0xff]  }
 0x2a0   :  { %3083 = vmatprep.subr.bf16.mxu0 %v4116_v44  ;;  %v4162_v44 = vld [vmem:[%s5592_s9 + $0x28] sm:$0xff]  }
 0x2a3   :  { %3084 = vmatpush1.bf16.msra.mxu0 %v4114_v47  ;;  %v4163_v47 = vld [vmem:[%s5592_s9 + $0x30] sm:$0xff]  }
 0x2a4   :  { %3085 = vmatprep.subr.bf16.mxu0 %v4119_v48  ;;  %v4164_v48 = vld [vmem:[%s5592_s9 + $0x38] sm:$0xff]  }
 0x2a7   :  { %3086 = vmatpush1.bf16.msra.mxu0 %v4117_v49 }
 0x2a8   :  { %3087 = vmatprep.subr.bf16.mxu0 %v4122_v50  ;;  %v3809_v50 = vld [vmem:[%s5594_s8] ss:$0 sm:$0xff] }
 0x2ab   :  { %3088 = vmatpush1.bf16.msra.mxu0 %v4120_v51 }
 0x2ac   :  { %3089 = vmatprep.subr.bf16.mxu0 %v4125_v52 }
 0x2af   :  { %3090 = vmatpush1.bf16.msra.mxu0 %v4123_v53 }
 0x2b0   :  { %3091 = vmatprep.subr.bf16.mxu0 %v4128_v54 }
 0x2b3   :  { %3092 = vmatpush1.bf16.msra.mxu0 %v4126_v55 }
 0x2b4   :  { %3093 = vmatprep.subr.bf16.mxu0 %v4131_v56 }
 0x2b7   :  { %3094 = vmatpush1.bf16.msra.mxu0 %v4129_v57 }
 0x2b8   :  { %3095 = vmatprep.subr.bf16.mxu0 %v4134_v58 }
 0x2bb   :  { %v2127_v0 = vpop.f32.mrb[16].mxu1  ;;  %3096 = vmatpush1.bf16.msra.mxu0 %v4132_v61  ;;  %v3826_v61 = vld [vmem:[%s5595_s10] ss:$0 sm:$0xff] }
 0x2bc   :  { %v3902_v1 = vadd.f32 %v2127_v0, %v499_v2  ;;  %v2129_v3 = vpop.f32.mrb[17].mxu1  ;;  %3097 = vmatprep.subr.bf16.mxu0 %v4137_v62 }
 0x2bd   :  { %v3903_v6 = vadd.f32 %v2129_v3, %v503_v63  ;;  %v2131_v7 = vpop.f32.mrb[18].mxu1 }
 0x2be   :  { %v3904_v8 = vadd.f32 %v2131_v7, %v499_v2  ;;  %v2133_v9 = vpop.f32.mrb[19].mxu1  ;;  %v2142_v11 = vmax.f32 %v3902_v1, 0.0 }
 0x2bf   :  { %v3905_v10 = vadd.f32 %v2133_v9, %v503_v63  ;;  %3098 = vmatpush1.bf16.msra.mxu0 %v4135_v21  ;;  %v2143_v13 = vmax.f32 %v3903_v6, 0.0 }
 0x2c0   :  { %v2150_v12 = vmax.f32 %v3904_v8, 0.0  ;;  %3099 = vmatprep.subr.bf16.mxu0 %v4140_v4 }
 0x2c1   :  { %v2151_v14 = vmax.f32 %v3905_v10, 0.0 }
 0x2c2   :  { %v2158_v15 = vpack.c.bf16 %v2150_v12, %v2142_v11 }
 0x2c3   :  { %v2159_v19 = vpack.c.bf16 %v2151_v14, %v2143_v13  ;;  %3100 = vmatpush1.bf16.msra.mxu0 %v4138_v38 }
 0x2c5   :  { %3101 = vmatprep.mubr.bf16.mxu0 %v2159_v19 }
 0x2c6   :  { %3102 = vmatmul.mubr.bf16.vlgmr.msra.gmra.mrb[8].mxu0 %v2158_v15 }
 0x399   :  { %v3103_v27 = vpop.f32.mrb[8].mxu0 }
 0x39a   :  { %v3906_v28 = vadd.f32 %v3103_v27, %v2293_v25  ;;  %v3105_v30 = vpop.f32.mrb[9].mxu0 }
 0x39b   :  { %v3907_v29 = vadd.f32 %v3105_v30, %v2297_v26  ;;  %v3107_v31 = vpop.f32.mrb[10].mxu0 }
 0x39c   :  { %v3908_v33 = vadd.f32 %v3107_v31, %v2293_v25  ;;  %v3109_v32 = vpop.f32.mrb[11].mxu0  ;;  %v3112_v35 = vmax.f32 %v3906_v28, 0.0 }
 0x39d   :  { %v3909_v34 = vadd.f32 %v3109_v32, %v2297_v26  ;;  %v3113_v37 = vmax.f32 %v3907_v29, 0.0 }
 0x39e   :  { %v3114_v36 = vmax.f32 %v3908_v33, 0.0 }
 0x39f   :  { %v3115_v39 = vmax.f32 %v3909_v34, 0.0 }
 0x3a0   :  { %v3116_v40 = vpack.c.bf16 %v3114_v36, %v3112_v35 }
 0x3a1   :  { %v3117_v41 = vpack.c.bf16 %v3115_v39, %v3113_v37 }
 0x3a3   :  { %3285 = vmatprep.mubr.bf16.mxu1 %v3117_v41 }
 0x3a4   :  { %3286 = vmatmul.mubr.bf16.vlgmr.msra.gmra.mrb[20].mxu1 %v3116_v40 }
 0x3a5   :  { %3867 = vmatpush3.bf16.msra.mxu1 %v4157_v22  ;;  %3882 = vmatprep.mubr.msk.bf16.mxu1 %vm4167_vm1, %v4166_v17 }
 0x3a6   :  { %3868 = vmatprep.subr.bf16.mxu1 %v4166_v17 }
 0x3a9   :  { %3869 = vmatpush3.bf16.msra.mxu1 %v4158_v24 }
 0x3aa   :  { %3870 = vmatprep.subr.bf16.mxu1 %v4166_v17 }
 0x3ad   :  { %3871 = vmatpush3.bf16.msra.mxu1 %v4159_v46 }
 0x3ae   :  { %3872 = vmatprep.subr.bf16.mxu1 %v4166_v17 }
 0x3b1   :  { %3873 = vmatpush3.bf16.msra.mxu1 %v4160_v42 }
 0x3b2   :  { %3874 = vmatprep.subr.bf16.mxu1 %v4166_v17 }
 0x3b5   :  { %3875 = vmatpush3.bf16.msra.mxu1 %v4161_v43 }
 0x3b6   :  { %3876 = vmatprep.subr.bf16.mxu1 %v4166_v17 }
 0x3b9   :  { %3877 = vmatpush3.bf16.msra.mxu1 %v4162_v44 }
 0x3ba   :  { %3878 = vmatprep.subr.bf16.mxu1 %v4166_v17 }
 0x3bd   :  { %3879 = vmatpush3.bf16.msra.mxu1 %v4163_v47 }
 0x3be   :  { %3880 = vmatprep.subr.bf16.mxu1 %v4166_v17 }
 0x3c1   :  { %3881 = vmatpush3.bf16.msra.mxu1 %v4164_v48 }
 0x477   :  { %v3851_v49 = vpop.f32.mrb[20].mxu1 }
 0x478   :  { %v3852_v51 = vpop.f32.mrb[21].mxu1 }
 0x479   :  { %v3853_v52 = vadd.f32 %v3852_v51, %v3851_v49  ;;  %v3854_v53 = vpop.f32.mrb[22].mxu1 }
 0x47a   :  { %v3855_v54 = vpop.f32.mrb[23].mxu1 }
 0x47b   :  { %v3288_v55 = vadd.f32 %v3853_v52, %v3809_v50  ;;  %v3856_v56 = vadd.f32 %v3855_v54, %v3854_v53 }
 0x47d   :  { %v3291_v57 = vadd.f32 %v3856_v56, %v3809_v50  ;;  %v3294_v58 = vmax.f32 %v3288_v55, 0.0 }
 0x47f   :  { %v3295_v59 = vmax.f32 %v3291_v57, 0.0 }
 0x481   :  { %v3296_v60 = vpack.c.bf16 %v3295_v59, %v3294_v58 }
 0x483   :  { %3883 = vmatmul.mubr.bf16.vlgmr.msra.gmra.mrb[24].mxu1 %v3296_v60 }
 0x556   :  { %v3402_v2 = vpop.f32.mrb[24].mxu1 }
 0x557   :  { %v3403_v62 = vadd.f32 %v3826_v61, %v3402_v2  ;;  %v3884_v63 = vpop.f32.mrb[25].mxu1 }
 0x558   :  { %v3405_v0 = vpop.f32.mrb[26].mxu1 }
 0x559   :  { %3409 = vst [vmem:[%s5596_s11] sm:$0xff] %v3403_v62  ;;  %v3406_v21 = vadd.f32 %v3826_v61, %v3405_v0  ;;  %v3885_v1 = vpop.f32.mrb[27].mxu1 }
 0x55b   :  { %3410 = vst [vmem:[%s5596_s11 + $0x8] sm:$0xff] %v3406_v21 }

</bundles_post_ra>
